<compile_context>
chip_gen: v7x
topology: tpu7x:2x2x1
jax: 0.10.0
libtpu: 0.0.40
codegen_flags: <defaults>
</compile_context>

<pallas_src>
import jax
import jax.numpy as jnp
from jax.experimental import pallas as pl
from jax.experimental.pallas import tpu as pltpu

MATMUL_DTYPE = jnp.bfloat16   # MXU operand dtype; accumulation is always f32
EPS = 1e-5                    # nn.BatchNorm2d default eps

# ----------------------------------------------------------------------------
# Packed-parameter layout (shared by init_params and the kernel).
# Weights are stored pre-reshaped to (kh*kw*Cin, Cout), rows ordered (i,j,cin),
# zero-padded to 128 lanes, stacked along rows with 16-row (bf16 sublane pack)
# aligned starts.  Biases live one-per-row in a small f32 (8,128) buffer.
# ----------------------------------------------------------------------------
_LANE = 128
_ALIGN = 16

_W_SEGS = [            # (name, K = kh*kw*Cin rows, Cout cols)
    ("fp1", 12, 32),   # first_part Conv2d(3, 32, k=2)
    ("fp2", 128, 64),  # first_part Conv2d(32, 64, k=2)          (+BN, bias dropped)
    ("fp3", 576, 64),  # first_part Conv2d(64, 64, k=3)
    ("up0", 96, 128),  # ConvTranspose2d(96,64,2,s=2): di=0 half, cols (dj, c)
    ("up1", 96, 128),  #                               di=1 half, cols (dj, c)
    ("c1a", 256, 64),  # conv_1 Conv2d(64,64,k=2,p=1)
    ("c1b", 256, 64),  # conv_1 Conv2d(64,64,k=2,p=0)             (+BN, bias dropped)
    ("c1c", 256, 64),  # conv_1 Conv2d(64,64,k=2,p=1)
    ("c2a", 256, 64),  # conv_2 Conv2d(64,64,k=2,p=1)
    ("c2b", 256, 64),  # conv_2 Conv2d(64,64,k=2,p=0)             (+BN, bias dropped)
    ("c2c", 256, 3),   # conv_2 Conv2d(64, 3,k=2,p=0) + Sigmoid
]


def _build_w_offsets():
    offs, r = {}, 0
    for name, k, c in _W_SEGS:
        offs[name] = (r, k, c)
        r += ((k + _ALIGN - 1) // _ALIGN) * _ALIGN
    return offs, r


_W_OFFS, _W_ROWS = _build_w_offsets()          # _W_ROWS == 2448

_BIAS_OFFS = {   # name -> (row, Cout) in the packed f32 bias buffer
    "fp1": (0, 32), "fp3": (1, 64), "up": (2, 128),
    "c1a": (3, 64), "c1c": (4, 64), "c2a": (5, 64), "c2c": (6, 3),
}
_B_ROWS = 8


def _w(w_ref, name):
    """Static VMEM view -> (K, Cout) bf16 weight value."""
    r0, k, c = _W_OFFS[name]
    return w_ref[r0:r0 + k, :c]


def _b(b_ref, name):
    """Static VMEM view -> (1, Cout) f32 bias value."""
    row, c = _BIAS_OFFS[name]
    return b_ref[row:row + 1, :c]


# ----------------------------------------------------------------------------
# In-kernel building blocks (values only; everything stays in VMEM / vregs)
# ----------------------------------------------------------------------------
def _pad_hw(h, p):
    """Zero-pad H and W of an NHWC bf16 value using concats (non-lane axes)."""
    if p == 0:
        return h
    B, H, W, C = h.shape
    zw = jnp.zeros((B, H, p, C), h.dtype)
    h = jnp.concatenate([zw, h, zw], axis=2)            # pad W (sublane axis)
    zh = jnp.zeros((B, p, W + 2 * p, C), h.dtype)
    return jnp.concatenate([zh, h, zh], axis=1)         # pad H (major axis)


def _conv2d(h, w, b, *, k, p, bn=False, act="none", out_4d=True):
    """k x k conv on an NHWC bf16 value as ONE MXU matmul (K = k*k*Cin) with a
    fused bias / training-mode BatchNorm (gamma=1, beta=0) / activation
    epilogue.  h: (B,H,W,Cin) bf16; w: (k*k*Cin, Cout) bf16; b: (1,Cout) f32.
    Returns bf16 (B,OH,OW,Cout) if out_4d else the f32 (B*OH*OW, Cout) slab.
    """
    hp = _pad_hw(h, p)
    B, Hp, Wp, Cin = hp.shape
    OH, OW = Hp - k + 1, Wp - k + 1
    # im2col in bf16: concatenate the k*k taps along the lane (channel) axis so
    # the whole conv is one contraction of depth k*k*Cin.
    taps = [hp[:, i:i + OH, j:j + OW, :] for i in range(k) for j in range(k)]
    patch = jnp.concatenate(taps, axis=-1).reshape(B * OH * OW, k * k * Cin)
    acc = jnp.dot(patch, w, preferred_element_type=jnp.float32)   # (N,Cout) f32
    if b is not None:
        acc = acc + b
    if bn:
        # nn.BatchNorm2d training-mode biased batch stats, gamma=1, beta=0,
        # computed in ONE pass (mean and E[x^2] are independent reductions).
        # Conv bias is omitted for these layers: it cancels in (x - mean).
        mean = jnp.mean(acc, axis=0, keepdims=True)
        ex2 = jnp.mean(acc * acc, axis=0, keepdims=True)
        var = jnp.maximum(ex2 - mean * mean, 0.0)
        acc = (acc - mean) * jax.lax.rsqrt(var + EPS)
    if act == "relu":
        acc = jnp.maximum(acc, 0.0)
    elif act == "sigmoid":
        acc = 1.0 / (1.0 + jnp.exp(-acc))               # exact sigmoid
    if not out_4d:
        return acc                                      # flat f32 (final store)
    return acc.astype(MATMUL_DTYPE).reshape(B, OH, OW, -1)


# ----------------------------------------------------------------------------
# The fused forward-pass kernel (single grid point; 5 input refs, 1 output)
# ----------------------------------------------------------------------------
def _net8group2_kernel(x_ref, kp_ref, emb_ref, w_ref, b_ref, o_ref):
    x = x_ref[...].astype(MATMUL_DTYPE)
    B = x.shape[0]

    # ---- first_part ---------------------------------------------------------
    h = _conv2d(x, _w(w_ref, "fp1"), _b(b_ref, "fp1"), k=2, p=0)   # (B,3,3,32)
    # MaxPool2d(2) on a 3x3 map (floor mode -> top-left 2x2 window), fused ReLU.
    h = jnp.maximum(
        jnp.maximum(jnp.maximum(h[:, 0:1, 0:1, :], h[:, 0:1, 1:2, :]),
                    jnp.maximum(h[:, 1:2, 0:1, :], h[:, 1:2, 1:2, :])),
        0)                                                         # (B,1,1,32)
    h = _conv2d(h, _w(w_ref, "fp2"), None, k=2, p=1,
                bn=True, act="relu")                               # (B,2,2,64)
    h = _conv2d(h, _w(w_ref, "fp3"), _b(b_ref, "fp3"), k=3, p=1,
                act="relu")                                        # (B,2,2,64)

    # ---- torch.cat((x, keypoints, embeddings), dim=1) -----------------------
    h = jnp.concatenate([h,
                         kp_ref[...].astype(MATMUL_DTYPE),
                         emb_ref[...].astype(MATMUL_DTYPE)], axis=-1)  # (B,2,2,96)

    # ---- up_1: ConvTranspose2d(96, 64, 2, stride=2) -------------------------
    # stride == kernel -> per-pixel matmul + depth-to-space.  One matmul per
    # output-row parity di (columns ordered (dj, c)); the shuffle uses only
    # 64-lane slices / row slices / concats (patterns known to lower cleanly).
    h2 = h.reshape(B * 4, 96)                                      # rows (b,i,j)
    up_b = _b(b_ref, "up")                                         # (1,128): bias tiled over dj
    z0 = (jnp.dot(h2, _w(w_ref, "up0"), preferred_element_type=jnp.float32)
          + up_b).astype(MATMUL_DTYPE).reshape(B, 2, 2, 128)       # di = 0
    z1 = (jnp.dot(h2, _w(w_ref, "up1"), preferred_element_type=jnp.float32)
          + up_b).astype(MATMUL_DTYPE).reshape(B, 2, 2, 128)       # di = 1

    def _interleave_w(z):            # (B,2,2,(dj,c)) -> (B,2,4,c), width = 2j+dj
        a, b_ = z[..., :64], z[..., 64:]
        return jnp.concatenate(
            [a[:, :, 0:1], b_[:, :, 0:1], a[:, :, 1:2], b_[:, :, 1:2]], axis=2)

    r0, r1 = _interleave_w(z0), _interleave_w(z1)                  # rows 2i+0 / 2i+1
    h = jnp.concatenate(
        [r0[:, 0:1], r1[:, 0:1], r0[:, 1:2], r1[:, 1:2]], axis=1)  # (B,4,4,64)

    # ---- conv_1 --------------------------------------------------------------
    h = _conv2d(h, _w(w_ref, "c1a"), _b(b_ref, "c1a"), k=2, p=1, act="relu")  # (B,5,5,64)
    h = _conv2d(h, _w(w_ref, "c1b"), None, k=2, p=0, bn=True, act="relu")     # (B,4,4,64)
    h = _conv2d(h, _w(w_ref, "c1c"), _b(b_ref, "c1c"), k=2, p=1, act="relu")  # (B,5,5,64)

    # ---- conv_2 --------------------------------------------------------------
    h = _conv2d(h, _w(w_ref, "c2a"), _b(b_ref, "c2a"), k=2, p=1, act="relu")  # (B,6,6,64)
    h = _conv2d(h, _w(w_ref, "c2b"), None, k=2, p=0, bn=True, act="relu")     # (B,5,5,64)
    out = _conv2d(h, _w(w_ref, "c2c"), _b(b_ref, "c2c"), k=2, p=0,
                  act="sigmoid", out_4d=False)                                # (B*16,3) f32

    o_ref[...] = out                                               # flat, lane-dense-ish store


# ----------------------------------------------------------------------------
# Wrapper: one pallas_call, whole arrays resident in VMEM, no grid.
# (No megacore split on v7x on purpose: BatchNorm uses full-batch statistics.)
# ----------------------------------------------------------------------------
@jax.jit
def net8group2_forward(params, x, keypoints, embeddings):
    B = x.shape[0]
    vmem = pl.BlockSpec(memory_space=pltpu.MemorySpace.VMEM)
    flat = pl.pallas_call(
        _net8group2_kernel,
        out_shape=jax.ShapeDtypeStruct((B * 16, 3), jnp.float32),
        in_specs=[vmem] * 5,
        out_specs=vmem,
    )(x, keypoints, embeddings, params["w_packed"], params["b_packed"])
    return flat.reshape(B, 4, 4, 3)                    # NHWC (== PyTorch NCHW transposed)


# ----------------------------------------------------------------------------
# Parameters (deterministic synthetic init; shapes from Net8Group2.__init__).
# Everything is packed into ONE bf16 weight buffer + ONE f32 bias buffer.
# Conv weight rows are ordered (i, j, cin) to match the in-kernel im2col; the
# ConvTranspose is stored as two (96,128) halves with columns ordered (dj, c).
# BN-layer conv biases are dropped (they cancel in the batch-mean subtract
# with gamma=1, beta=0 training-mode BN).
# ----------------------------------------------------------------------------
def init_params(key):
    keys = iter(jax.random.split(key, 18))
    scale = 0.1

    def rnd(shape):
        return scale * jax.random.normal(next(keys), shape, jnp.float32)

    w_buf = jnp.zeros((_W_ROWS, _LANE), jnp.float32)
    b_buf = jnp.zeros((_B_ROWS, _LANE), jnp.float32)

    def put_w(buf, name, w):
        r0, k, c = _W_OFFS[name]
        assert w.shape == (k, c), (name, w.shape)
        return buf.at[r0:r0 + k, :c].set(w)

    def put_b(buf, name, b):
        row, c = _BIAS_OFFS[name]
        assert b.shape == (c,), (name, b.shape)
        return buf.at[row, :c].set(b)

    # first_part
    w_buf = put_w(w_buf, "fp1", rnd((12, 32)))      # Conv2d(3,32,k=2)
    b_buf = put_b(b_buf, "fp1", rnd((32,)))
    w_buf = put_w(w_buf, "fp2", rnd((128, 64)))     # Conv2d(32,64,k=2) + BN: bias dropped
    w_buf = put_w(w_buf, "fp3", rnd((576, 64)))     # Conv2d(64,64,k=3)
    b_buf = put_b(b_buf, "fp3", rnd((64,)))
    # up_1: ConvTranspose2d(96,64,2,s=2); PyTorch weight (Cin,Cout,kh,kw) maps
    # to two halves W_half[di][cin, dj*64+c] = W_pt[cin, c, di, dj].
    up_w = rnd((96, 2, 2, 64))                      # (cin, di, dj, cout)
    w_buf = put_w(w_buf, "up0", up_w[:, 0].reshape(96, 128))
    w_buf = put_w(w_buf, "up1", up_w[:, 1].reshape(96, 128))
    b_buf = put_b(b_buf, "up", jnp.tile(rnd((64,)), 2))   # bias tiled over dj
    # conv_1
    w_buf = put_w(w_buf, "c1a", rnd((256, 64)))
    b_buf = put_b(b_buf, "c1a", rnd((64,)))
    w_buf = put_w(w_buf, "c1b", rnd((256, 64)))     # + BN: bias dropped
    w_buf = put_w(w_buf, "c1c", rnd((256, 64)))
    b_buf = put_b(b_buf, "c1c", rnd((64,)))
    # conv_2
    w_buf = put_w(w_buf, "c2a", rnd((256, 64)))
    b_buf = put_b(b_buf, "c2a", rnd((64,)))
    w_buf = put_w(w_buf, "c2b", rnd((256, 64)))     # + BN: bias dropped
    w_buf = put_w(w_buf, "c2c", rnd((256, 3)))      # Conv2d(64,3,k=2) + Sigmoid
    b_buf = put_b(b_buf, "c2c", rnd((3,)))

    return {"w_packed": w_buf.astype(MATMUL_DTYPE),   # single ~612 KiB bf16 DMA
            "b_packed": b_buf}                        # single 4 KiB f32 DMA


# ----------------------------------------------------------------------------
if __name__ == "__main__":
    key = jax.random.PRNGKey(0)
    k_x, k_kp, k_em, k_p = jax.random.split(key, 4)

    B = 2
    # NHWC inputs (PyTorch NCHW equivalents: x (2,3,4,4), keypoints (2,16,2,2),
    # embeddings (2,16,2,2); keypoint/embedding channels chosen so the channel
    # concat provides the 96 inputs required by up_1).
    x = jax.random.normal(k_x, (B, 4, 4, 3), jnp.float32)
    keypoints = jax.random.normal(k_kp, (B, 2, 2, 16), jnp.float32)
    embeddings = jax.random.normal(k_em, (B, 2, 2, 16), jnp.float32)

    params = init_params(k_p)

    out = net8group2_forward(params, x, keypoints, embeddings)
    out = jax.block_until_ready(out)

    assert out.shape == (B, 4, 4, 3), out.shape
    assert bool(jnp.all(jnp.isfinite(out)))
    # exact sigmoid -> strictly inside [0, 1]
    assert bool(jnp.all((out >= 0.0) & (out <= 1.0)))

    print("KERNEL_OK")
</pallas_src>

<mosaic_0001>
module attributes {stable_mosaic.version = 11 : i64} {
  func.func @_net8group2_kernel(%arg0: memref<2x4x4x3xf32, #tpu.memory_space<vmem>>, %arg1: memref<2x2x2x16xf32, #tpu.memory_space<vmem>>, %arg2: memref<2x2x2x16xf32, #tpu.memory_space<vmem>>, %arg3: memref<2448x128xbf16, #tpu.memory_space<vmem>>, %arg4: memref<8x128xf32, #tpu.memory_space<vmem>>, %arg5: memref<32x3xf32, #tpu.memory_space<vmem>>) attributes {dimension_semantics = [], scalar_prefetch = 0 : i64, scratch_operands = 0 : i64, tpu.core_type = #tpu.core_type<tc>} {
    %c0 = arith.constant 0 : index
    %c0_0 = arith.constant 0 : index
    %c0_1 = arith.constant 0 : index
    %c0_2 = arith.constant 0 : index
    %0 = vector.load %arg0[%c0, %c0_0, %c0_1, %c0_2] : memref<2x4x4x3xf32, #tpu.memory_space<vmem>>, vector<2x4x4x3xf32>
    %1 = arith.truncf %0 : vector<2x4x4x3xf32> to vector<2x4x4x3xbf16>
    %c0_3 = arith.constant 0 : index
    %c0_4 = arith.constant 0 : index
    %2 = vector.load %arg3[%c0_3, %c0_4] : memref<2448x128xbf16, #tpu.memory_space<vmem>>, vector<12x32xbf16>
    %c0_5 = arith.constant 0 : index
    %c0_6 = arith.constant 0 : index
    %3 = vector.load %arg4[%c0_5, %c0_6] : memref<8x128xf32, #tpu.memory_space<vmem>>, vector<1x32xf32>
    %4 = vector.extract_strided_slice %1 {offsets = [0, 0, 0, 0], sizes = [2, 3, 3, 3], strides = [1, 1, 1, 1]} : vector<2x4x4x3xbf16> to vector<2x3x3x3xbf16>
    %5 = vector.extract_strided_slice %1 {offsets = [0, 0, 1, 0], sizes = [2, 3, 3, 3], strides = [1, 1, 1, 1]} : vector<2x4x4x3xbf16> to vector<2x3x3x3xbf16>
    %6 = vector.extract_strided_slice %1 {offsets = [0, 1, 0, 0], sizes = [2, 3, 3, 3], strides = [1, 1, 1, 1]} : vector<2x4x4x3xbf16> to vector<2x3x3x3xbf16>
    %7 = vector.extract_strided_slice %1 {offsets = [0, 1, 1, 0], sizes = [2, 3, 3, 3], strides = [1, 1, 1, 1]} : vector<2x4x4x3xbf16> to vector<2x3x3x3xbf16>
    %8 = tpu.concatenate %4, %5, %6, %7 in 3 : vector<2x3x3x3xbf16>, vector<2x3x3x3xbf16>, vector<2x3x3x3xbf16>, vector<2x3x3x3xbf16> -> vector<2x3x3x12xbf16>
    %9 = vector.shape_cast %8 : vector<2x3x3x12xbf16> to vector<18x12xbf16>
    %cst = arith.constant dense<0.000000e+00> : vector<18x32xf32>
    %10 = tpu.matmul %9, %2, %cst {dimension_numbers = #tpu.dot_dimension_numbers<[1], [0], [0], [1], [0, 0, 1, 1], [], []>} : vector<18x12xbf16>, vector<12x32xbf16>, vector<18x32xf32> -> vector<18x32xf32>
    %11 = vector.broadcast %3 : vector<1x32xf32> to vector<18x32xf32>
    %12 = arith.addf %10, %11 : vector<18x32xf32>
    %13 = arith.truncf %12 : vector<18x32xf32> to vector<18x32xbf16>
    %14 = vector.shape_cast %13 : vector<18x32xbf16> to vector<2x3x3x32xbf16>
    %15 = vector.extract_strided_slice %14 {offsets = [0, 0, 0, 0], sizes = [2, 1, 1, 32], strides = [1, 1, 1, 1]} : vector<2x3x3x32xbf16> to vector<2x1x1x32xbf16>
    %16 = vector.extract_strided_slice %14 {offsets = [0, 0, 1, 0], sizes = [2, 1, 1, 32], strides = [1, 1, 1, 1]} : vector<2x3x3x32xbf16> to vector<2x1x1x32xbf16>
    %17 = arith.maximumf %15, %16 : vector<2x1x1x32xbf16>
    %18 = vector.extract_strided_slice %14 {offsets = [0, 1, 0, 0], sizes = [2, 1, 1, 32], strides = [1, 1, 1, 1]} : vector<2x3x3x32xbf16> to vector<2x1x1x32xbf16>
    %19 = vector.extract_strided_slice %14 {offsets = [0, 1, 1, 0], sizes = [2, 1, 1, 32], strides = [1, 1, 1, 1]} : vector<2x3x3x32xbf16> to vector<2x1x1x32xbf16>
    %20 = arith.maximumf %18, %19 : vector<2x1x1x32xbf16>
    %21 = arith.maximumf %17, %20 : vector<2x1x1x32xbf16>
    %cst_7 = arith.constant 0.000000e+00 : bf16
    %22 = vector.broadcast %cst_7 : bf16 to vector<2x1x1x32xbf16>
    %23 = arith.maximumf %21, %22 : vector<2x1x1x32xbf16>
    %c16 = arith.constant 16 : index
    %c0_8 = arith.constant 0 : index
    %24 = vector.load %arg3[%c16, %c0_8] : memref<2448x128xbf16, #tpu.memory_space<vmem>>, vector<128x64xbf16>
    %cst_9 = arith.constant 0.000000e+00 : bf16
    %25 = vector.broadcast %cst_9 : bf16 to vector<2x1x1x32xbf16>
    %26 = tpu.concatenate %25, %23, %25 in 2 : vector<2x1x1x32xbf16>, vector<2x1x1x32xbf16>, vector<2x1x1x32xbf16> -> vector<2x1x3x32xbf16>
    %cst_10 = arith.constant 0.000000e+00 : bf16
    %27 = vector.broadcast %cst_10 : bf16 to vector<2x1x3x32xbf16>
    %28 = tpu.concatenate %27, %26, %27 in 1 : vector<2x1x3x32xbf16>, vector<2x1x3x32xbf16>, vector<2x1x3x32xbf16> -> vector<2x3x3x32xbf16>
    %29 = vector.extract_strided_slice %28 {offsets = [0, 0, 0, 0], sizes = [2, 2, 2, 32], strides = [1, 1, 1, 1]} : vector<2x3x3x32xbf16> to vector<2x2x2x32xbf16>
    %30 = vector.extract_strided_slice %28 {offsets = [0, 0, 1, 0], sizes = [2, 2, 2, 32], strides = [1, 1, 1, 1]} : vector<2x3x3x32xbf16> to vector<2x2x2x32xbf16>
    %31 = vector.extract_strided_slice %28 {offsets = [0, 1, 0, 0], sizes = [2, 2, 2, 32], strides = [1, 1, 1, 1]} : vector<2x3x3x32xbf16> to vector<2x2x2x32xbf16>
    %32 = vector.extract_strided_slice %28 {offsets = [0, 1, 1, 0], sizes = [2, 2, 2, 32], strides = [1, 1, 1, 1]} : vector<2x3x3x32xbf16> to vector<2x2x2x32xbf16>
    %33 = tpu.concatenate %29, %30, %31, %32 in 3 : vector<2x2x2x32xbf16>, vector<2x2x2x32xbf16>, vector<2x2x2x32xbf16>, vector<2x2x2x32xbf16> -> vector<2x2x2x128xbf16>
    %34 = vector.shape_cast %33 : vector<2x2x2x128xbf16> to vector<8x128xbf16>
    %cst_11 = arith.constant dense<0.000000e+00> : vector<8x64xf32>
    %35 = tpu.matmul %34, %24, %cst_11 {dimension_numbers = #tpu.dot_dimension_numbers<[1], [0], [0], [1], [0, 0, 1, 1], [], []>} : vector<8x128xbf16>, vector<128x64xbf16>, vector<8x64xf32> -> vector<8x64xf32>
    %cst_12 = arith.constant dense<0.000000e+00> : vector<64xf32>
    %36 = vector.multi_reduction <add>, %35, %cst_12 [0] : vector<8x64xf32> to vector<64xf32>
    %37 = vector.shape_cast %36 : vector<64xf32> to vector<1x64xf32>
    %cst_13 = arith.constant 8.000000e+00 : f32
    %38 = vector.broadcast %cst_13 : f32 to vector<1x64xf32>
    %39 = arith.divf %37, %38 : vector<1x64xf32>
    %40 = arith.mulf %35, %35 : vector<8x64xf32>
    %cst_14 = arith.constant dense<0.000000e+00> : vector<64xf32>
    %41 = vector.multi_reduction <add>, %40, %cst_14 [0] : vector<8x64xf32> to vector<64xf32>
    %42 = vector.shape_cast %41 : vector<64xf32> to vector<1x64xf32>
    %cst_15 = arith.constant 8.000000e+00 : f32
    %43 = vector.broadcast %cst_15 : f32 to vector<1x64xf32>
    %44 = arith.divf %42, %43 : vector<1x64xf32>
    %45 = arith.mulf %39, %39 : vector<1x64xf32>
    %46 = arith.subf %44, %45 : vector<1x64xf32>
    %cst_16 = arith.constant 0.000000e+00 : f32
    %47 = vector.broadcast %cst_16 : f32 to vector<1x64xf32>
    %48 = arith.maximumf %46, %47 : vector<1x64xf32>
    %49 = vector.broadcast %39 : vector<1x64xf32> to vector<8x64xf32>
    %50 = arith.subf %35, %49 : vector<8x64xf32>
    %cst_17 = arith.constant 9.99999974E-6 : f32
    %51 = vector.broadcast %cst_17 : f32 to vector<1x64xf32>
    %52 = arith.addf %48, %51 : vector<1x64xf32>
    %53 = math.rsqrt %52 : vector<1x64xf32>
    %54 = vector.broadcast %53 : vector<1x64xf32> to vector<8x64xf32>
    %55 = arith.mulf %50, %54 : vector<8x64xf32>
    %cst_18 = arith.constant 0.000000e+00 : f32
    %56 = vector.broadcast %cst_18 : f32 to vector<8x64xf32>
    %57 = arith.maximumf %55, %56 : vector<8x64xf32>
    %58 = arith.truncf %57 : vector<8x64xf32> to vector<8x64xbf16>
    %59 = vector.shape_cast %58 : vector<8x64xbf16> to vector<2x2x2x64xbf16>
    %c144 = arith.constant 144 : index
    %c0_19 = arith.constant 0 : index
    %60 = vector.load %arg3[%c144, %c0_19] : memref<2448x128xbf16, #tpu.memory_space<vmem>>, vector<576x64xbf16>
    %c1 = arith.constant 1 : index
    %c0_20 = arith.constant 0 : index
    %61 = vector.load %arg4[%c1, %c0_20] : memref<8x128xf32, #tpu.memory_space<vmem>>, vector<1x64xf32>
    %cst_21 = arith.constant 0.000000e+00 : bf16
    %62 = vector.broadcast %cst_21 : bf16 to vector<2x2x1x64xbf16>
    %63 = tpu.concatenate %62, %59, %62 in 2 : vector<2x2x1x64xbf16>, vector<2x2x2x64xbf16>, vector<2x2x1x64xbf16> -> vector<2x2x4x64xbf16>
    %cst_22 = arith.constant 0.000000e+00 : bf16
    %64 = vector.broadcast %cst_22 : bf16 to vector<2x1x4x64xbf16>
    %65 = tpu.concatenate %64, %63, %64 in 1 : vector<2x1x4x64xbf16>, vector<2x2x4x64xbf16>, vector<2x1x4x64xbf16> -> vector<2x4x4x64xbf16>
    %66 = vector.extract_strided_slice %65 {offsets = [0, 0, 0, 0], sizes = [2, 2, 2, 64], strides = [1, 1, 1, 1]} : vector<2x4x4x64xbf16> to vector<2x2x2x64xbf16>
    %67 = vector.extract_strided_slice %65 {offsets = [0, 0, 1, 0], sizes = [2, 2, 2, 64], strides = [1, 1, 1, 1]} : vector<2x4x4x64xbf16> to vector<2x2x2x64xbf16>
    %68 = vector.extract_strided_slice %65 {offsets = [0, 0, 2, 0], sizes = [2, 2, 2, 64], strides = [1, 1, 1, 1]} : vector<2x4x4x64xbf16> to vector<2x2x2x64xbf16>
    %69 = vector.extract_strided_slice %65 {offsets = [0, 1, 0, 0], sizes = [2, 2, 2, 64], strides = [1, 1, 1, 1]} : vector<2x4x4x64xbf16> to vector<2x2x2x64xbf16>
    %70 = vector.extract_strided_slice %65 {offsets = [0, 1, 1, 0], sizes = [2, 2, 2, 64], strides = [1, 1, 1, 1]} : vector<2x4x4x64xbf16> to vector<2x2x2x64xbf16>
    %71 = vector.extract_strided_slice %65 {offsets = [0, 1, 2, 0], sizes = [2, 2, 2, 64], strides = [1, 1, 1, 1]} : vector<2x4x4x64xbf16> to vector<2x2x2x64xbf16>
    %72 = vector.extract_strided_slice %65 {offsets = [0, 2, 0, 0], sizes = [2, 2, 2, 64], strides = [1, 1, 1, 1]} : vector<2x4x4x64xbf16> to vector<2x2x2x64xbf16>
    %73 = vector.extract_strided_slice %65 {offsets = [0, 2, 1, 0], sizes = [2, 2, 2, 64], strides = [1, 1, 1, 1]} : vector<2x4x4x64xbf16> to vector<2x2x2x64xbf16>
    %74 = vector.extract_strided_slice %65 {offsets = [0, 2, 2, 0], sizes = [2, 2, 2, 64], strides = [1, 1, 1, 1]} : vector<2x4x4x64xbf16> to vector<2x2x2x64xbf16>
    %75 = tpu.concatenate %66, %67, %68, %69, %70, %71, %72, %73, %74 in 3 : vector<2x2x2x64xbf16>, vector<2x2x2x64xbf16>, vector<2x2x2x64xbf16>, vector<2x2x2x64xbf16>, vector<2x2x2x64xbf16>, vector<2x2x2x64xbf16>, vector<2x2x2x64xbf16>, vector<2x2x2x64xbf16>, vector<2x2x2x64xbf16> -> vector<2x2x2x576xbf16>
    %76 = vector.shape_cast %75 : vector<2x2x2x576xbf16> to vector<8x576xbf16>
    %cst_23 = arith.constant dense<0.000000e+00> : vector<8x64xf32>
    %77 = tpu.matmul %76, %60, %cst_23 {dimension_numbers = #tpu.dot_dimension_numbers<[1], [0], [0], [1], [0, 0, 1, 1], [], []>} : vector<8x576xbf16>, vector<576x64xbf16>, vector<8x64xf32> -> vector<8x64xf32>
    %78 = vector.broadcast %61 : vector<1x64xf32> to vector<8x64xf32>
    %79 = arith.addf %77, %78 : vector<8x64xf32>
    %cst_24 = arith.constant 0.000000e+00 : f32
    %80 = vector.broadcast %cst_24 : f32 to vector<8x64xf32>
    %81 = arith.maximumf %79, %80 : vector<8x64xf32>
    %82 = arith.truncf %81 : vector<8x64xf32> to vector<8x64xbf16>
    %83 = vector.shape_cast %82 : vector<8x64xbf16> to vector<2x2x2x64xbf16>
    %c0_25 = arith.constant 0 : index
    %c0_26 = arith.constant 0 : index
    %c0_27 = arith.constant 0 : index
    %c0_28 = arith.constant 0 : index
    %84 = vector.load %arg1[%c0_25, %c0_26, %c0_27, %c0_28] : memref<2x2x2x16xf32, #tpu.memory_space<vmem>>, vector<2x2x2x16xf32>
    %85 = arith.truncf %84 : vector<2x2x2x16xf32> to vector<2x2x2x16xbf16>
    %c0_29 = arith.constant 0 : index
    %c0_30 = arith.constant 0 : index
    %c0_31 = arith.constant 0 : index
    %c0_32 = arith.constant 0 : index
    %86 = vector.load %arg2[%c0_29, %c0_30, %c0_31, %c0_32] : memref<2x2x2x16xf32, #tpu.memory_space<vmem>>, vector<2x2x2x16xf32>
    %87 = arith.truncf %86 : vector<2x2x2x16xf32> to vector<2x2x2x16xbf16>
    %88 = tpu.concatenate %83, %85, %87 in 3 : vector<2x2x2x64xbf16>, vector<2x2x2x16xbf16>, vector<2x2x2x16xbf16> -> vector<2x2x2x96xbf16>
    %89 = vector.shape_cast %88 : vector<2x2x2x96xbf16> to vector<8x96xbf16>
    %c2 = arith.constant 2 : index
    %c0_33 = arith.constant 0 : index
    %90 = vector.load %arg4[%c2, %c0_33] : memref<8x128xf32, #tpu.memory_space<vmem>>, vector<1x128xf32>
    %c720 = arith.constant 720 : index
    %c0_34 = arith.constant 0 : index
    %91 = vector.load %arg3[%c720, %c0_34] : memref<2448x128xbf16, #tpu.memory_space<vmem>>, vector<96x128xbf16>
    %cst_35 = arith.constant dense<0.000000e+00> : vector<8x128xf32>
    %92 = tpu.matmul %89, %91, %cst_35 {dimension_numbers = #tpu.dot_dimension_numbers<[1], [0], [0], [1], [0, 0, 1, 1], [], []>} : vector<8x96xbf16>, vector<96x128xbf16>, vector<8x128xf32> -> vector<8x128xf32>
    %93 = vector.broadcast %90 : vector<1x128xf32> to vector<8x128xf32>
    %94 = arith.addf %92, %93 : vector<8x128xf32>
    %95 = arith.truncf %94 : vector<8x128xf32> to vector<8x128xbf16>
    %96 = vector.shape_cast %95 : vector<8x128xbf16> to vector<2x2x2x128xbf16>
    %c816 = arith.constant 816 : index
    %c0_36 = arith.constant 0 : index
    %97 = vector.load %arg3[%c816, %c0_36] : memref<2448x128xbf16, #tpu.memory_space<vmem>>, vector<96x128xbf16>
    %cst_37 = arith.constant dense<0.000000e+00> : vector<8x128xf32>
    %98 = tpu.matmul %89, %97, %cst_37 {dimension_numbers = #tpu.dot_dimension_numbers<[1], [0], [0], [1], [0, 0, 1, 1], [], []>} : vector<8x96xbf16>, vector<96x128xbf16>, vector<8x128xf32> -> vector<8x128xf32>
    %99 = vector.broadcast %90 : vector<1x128xf32> to vector<8x128xf32>
    %100 = arith.addf %98, %99 : vector<8x128xf32>
    %101 = arith.truncf %100 : vector<8x128xf32> to vector<8x128xbf16>
    %102 = vector.shape_cast %101 : vector<8x128xbf16> to vector<2x2x2x128xbf16>
    %103 = vector.extract_strided_slice %96 {offsets = [0, 0, 0, 0], sizes = [2, 2, 2, 64], strides = [1, 1, 1, 1]} : vector<2x2x2x128xbf16> to vector<2x2x2x64xbf16>
    %104 = vector.extract_strided_slice %96 {offsets = [0, 0, 0, 64], sizes = [2, 2, 2, 64], strides = [1, 1, 1, 1]} : vector<2x2x2x128xbf16> to vector<2x2x2x64xbf16>
    %105 = vector.extract_strided_slice %103 {offsets = [0, 0, 0, 0], sizes = [2, 2, 1, 64], strides = [1, 1, 1, 1]} : vector<2x2x2x64xbf16> to vector<2x2x1x64xbf16>
    %106 = vector.extract_strided_slice %104 {offsets = [0, 0, 0, 0], sizes = [2, 2, 1, 64], strides = [1, 1, 1, 1]} : vector<2x2x2x64xbf16> to vector<2x2x1x64xbf16>
    %107 = vector.extract_strided_slice %103 {offsets = [0, 0, 1, 0], sizes = [2, 2, 1, 64], strides = [1, 1, 1, 1]} : vector<2x2x2x64xbf16> to vector<2x2x1x64xbf16>
    %108 = vector.extract_strided_slice %104 {offsets = [0, 0, 1, 0], sizes = [2, 2, 1, 64], strides = [1, 1, 1, 1]} : vector<2x2x2x64xbf16> to vector<2x2x1x64xbf16>
    %109 = tpu.concatenate %105, %106, %107, %108 in 2 : vector<2x2x1x64xbf16>, vector<2x2x1x64xbf16>, vector<2x2x1x64xbf16>, vector<2x2x1x64xbf16> -> vector<2x2x4x64xbf16>
    %110 = vector.extract_strided_slice %102 {offsets = [0, 0, 0, 0], sizes = [2, 2, 2, 64], strides = [1, 1, 1, 1]} : vector<2x2x2x128xbf16> to vector<2x2x2x64xbf16>
    %111 = vector.extract_strided_slice %102 {offsets = [0, 0, 0, 64], sizes = [2, 2, 2, 64], strides = [1, 1, 1, 1]} : vector<2x2x2x128xbf16> to vector<2x2x2x64xbf16>
    %112 = vector.extract_strided_slice %110 {offsets = [0, 0, 0, 0], sizes = [2, 2, 1, 64], strides = [1, 1, 1, 1]} : vector<2x2x2x64xbf16> to vector<2x2x1x64xbf16>
    %113 = vector.extract_strided_slice %111 {offsets = [0, 0, 0, 0], sizes = [2, 2, 1, 64], strides = [1, 1, 1, 1]} : vector<2x2x2x64xbf16> to vector<2x2x1x64xbf16>
    %114 = vector.extract_strided_slice %110 {offsets = [0, 0, 1, 0], sizes = [2, 2, 1, 64], strides = [1, 1, 1, 1]} : vector<2x2x2x64xbf16> to vector<2x2x1x64xbf16>
    %115 = vector.extract_strided_slice %111 {offsets = [0, 0, 1, 0], sizes = [2, 2, 1, 64], strides = [1, 1, 1, 1]} : vector<2x2x2x64xbf16> to vector<2x2x1x64xbf16>
    %116 = tpu.concatenate %112, %113, %114, %115 in 2 : vector<2x2x1x64xbf16>, vector<2x2x1x64xbf16>, vector<2x2x1x64xbf16>, vector<2x2x1x64xbf16> -> vector<2x2x4x64xbf16>
    %117 = vector.extract_strided_slice %109 {offsets = [0, 0, 0, 0], sizes = [2, 1, 4, 64], strides = [1, 1, 1, 1]} : vector<2x2x4x64xbf16> to vector<2x1x4x64xbf16>
    %118 = vector.extract_strided_slice %116 {offsets = [0, 0, 0, 0], sizes = [2, 1, 4, 64], strides = [1, 1, 1, 1]} : vector<2x2x4x64xbf16> to vector<2x1x4x64xbf16>
    %119 = vector.extract_strided_slice %109 {offsets = [0, 1, 0, 0], sizes = [2, 1, 4, 64], strides = [1, 1, 1, 1]} : vector<2x2x4x64xbf16> to vector<2x1x4x64xbf16>
    %120 = vector.extract_strided_slice %116 {offsets = [0, 1, 0, 0], sizes = [2, 1, 4, 64], strides = [1, 1, 1, 1]} : vector<2x2x4x64xbf16> to vector<2x1x4x64xbf16>
    %121 = tpu.concatenate %117, %118, %119, %120 in 1 : vector<2x1x4x64xbf16>, vector<2x1x4x64xbf16>, vector<2x1x4x64xbf16>, vector<2x1x4x64xbf16> -> vector<2x4x4x64xbf16>
    %c912 = arith.constant 912 : index
    %c0_38 = arith.constant 0 : index
    %122 = vector.load %arg3[%c912, %c0_38] : memref<2448x128xbf16, #tpu.memory_space<vmem>>, vector<256x64xbf16>
    %c3 = arith.constant 3 : index
    %c0_39 = arith.constant 0 : index
    %123 = vector.load %arg4[%c3, %c0_39] : memref<8x128xf32, #tpu.memory_space<vmem>>, vector<1x64xf32>
    %cst_40 = arith.constant 0.000000e+00 : bf16
    %124 = vector.broadcast %cst_40 : bf16 to vector<2x4x1x64xbf16>
    %125 = tpu.concatenate %124, %121, %124 in 2 : vector<2x4x1x64xbf16>, vector<2x4x4x64xbf16>, vector<2x4x1x64xbf16> -> vector<2x4x6x64xbf16>
    %cst_41 = arith.constant 0.000000e+00 : bf16
    %126 = vector.broadcast %cst_41 : bf16 to vector<2x1x6x64xbf16>
    %127 = tpu.concatenate %126, %125, %126 in 1 : vector<2x1x6x64xbf16>, vector<2x4x6x64xbf16>, vector<2x1x6x64xbf16> -> vector<2x6x6x64xbf16>
    %128 = vector.extract_strided_slice %127 {offsets = [0, 0, 0, 0], sizes = [2, 5, 5, 64], strides = [1, 1, 1, 1]} : vector<2x6x6x64xbf16> to vector<2x5x5x64xbf16>
    %129 = vector.extract_strided_slice %127 {offsets = [0, 0, 1, 0], sizes = [2, 5, 5, 64], strides = [1, 1, 1, 1]} : vector<2x6x6x64xbf16> to vector<2x5x5x64xbf16>
    %130 = vector.extract_strided_slice %127 {offsets = [0, 1, 0, 0], sizes = [2, 5, 5, 64], strides = [1, 1, 1, 1]} : vector<2x6x6x64xbf16> to vector<2x5x5x64xbf16>
    %131 = vector.extract_strided_slice %127 {offsets = [0, 1, 1, 0], sizes = [2, 5, 5, 64], strides = [1, 1, 1, 1]} : vector<2x6x6x64xbf16> to vector<2x5x5x64xbf16>
    %132 = tpu.concatenate %128, %129, %130, %131 in 3 : vector<2x5x5x64xbf16>, vector<2x5x5x64xbf16>, vector<2x5x5x64xbf16>, vector<2x5x5x64xbf16> -> vector<2x5x5x256xbf16>
    %133 = vector.shape_cast %132 : vector<2x5x5x256xbf16> to vector<50x256xbf16>
    %cst_42 = arith.constant dense<0.000000e+00> : vector<50x64xf32>
    %134 = tpu.matmul %133, %122, %cst_42 {dimension_numbers = #tpu.dot_dimension_numbers<[1], [0], [0], [1], [0, 0, 1, 1], [], []>} : vector<50x256xbf16>, vector<256x64xbf16>, vector<50x64xf32> -> vector<50x64xf32>
    %135 = vector.broadcast %123 : vector<1x64xf32> to vector<50x64xf32>
    %136 = arith.addf %134, %135 : vector<50x64xf32>
    %cst_43 = arith.constant 0.000000e+00 : f32
    %137 = vector.broadcast %cst_43 : f32 to vector<50x64xf32>
    %138 = arith.maximumf %136, %137 : vector<50x64xf32>
    %139 = arith.truncf %138 : vector<50x64xf32> to vector<50x64xbf16>
    %140 = vector.shape_cast %139 : vector<50x64xbf16> to vector<2x5x5x64xbf16>
    %c1168 = arith.constant 1168 : index
    %c0_44 = arith.constant 0 : index
    %141 = vector.load %arg3[%c1168, %c0_44] : memref<2448x128xbf16, #tpu.memory_space<vmem>>, vector<256x64xbf16>
    %142 = vector.extract_strided_slice %140 {offsets = [0, 0, 0, 0], sizes = [2, 4, 4, 64], strides = [1, 1, 1, 1]} : vector<2x5x5x64xbf16> to vector<2x4x4x64xbf16>
    %143 = vector.extract_strided_slice %140 {offsets = [0, 0, 1, 0], sizes = [2, 4, 4, 64], strides = [1, 1, 1, 1]} : vector<2x5x5x64xbf16> to vector<2x4x4x64xbf16>
    %144 = vector.extract_strided_slice %140 {offsets = [0, 1, 0, 0], sizes = [2, 4, 4, 64], strides = [1, 1, 1, 1]} : vector<2x5x5x64xbf16> to vector<2x4x4x64xbf16>
    %145 = vector.extract_strided_slice %140 {offsets = [0, 1, 1, 0], sizes = [2, 4, 4, 64], strides = [1, 1, 1, 1]} : vector<2x5x5x64xbf16> to vector<2x4x4x64xbf16>
    %146 = tpu.concatenate %142, %143, %144, %145 in 3 : vector<2x4x4x64xbf16>, vector<2x4x4x64xbf16>, vector<2x4x4x64xbf16>, vector<2x4x4x64xbf16> -> vector<2x4x4x256xbf16>
    %147 = vector.shape_cast %146 : vector<2x4x4x256xbf16> to vector<32x256xbf16>
    %cst_45 = arith.constant dense<0.000000e+00> : vector<32x64xf32>
    %148 = tpu.matmul %147, %141, %cst_45 {dimension_numbers = #tpu.dot_dimension_numbers<[1], [0], [0], [1], [0, 0, 1, 1], [], []>} : vector<32x256xbf16>, vector<256x64xbf16>, vector<32x64xf32> -> vector<32x64xf32>
    %cst_46 = arith.constant dense<0.000000e+00> : vector<64xf32>
    %149 = vector.multi_reduction <add>, %148, %cst_46 [0] : vector<32x64xf32> to vector<64xf32>
    %150 = vector.shape_cast %149 : vector<64xf32> to vector<1x64xf32>
    %cst_47 = arith.constant 3.200000e+01 : f32
    %151 = vector.broadcast %cst_47 : f32 to vector<1x64xf32>
    %152 = arith.divf %150, %151 : vector<1x64xf32>
    %153 = arith.mulf %148, %148 : vector<32x64xf32>
    %cst_48 = arith.constant dense<0.000000e+00> : vector<64xf32>
    %154 = vector.multi_reduction <add>, %153, %cst_48 [0] : vector<32x64xf32> to vector<64xf32>
    %155 = vector.shape_cast %154 : vector<64xf32> to vector<1x64xf32>
    %cst_49 = arith.constant 3.200000e+01 : f32
    %156 = vector.broadcast %cst_49 : f32 to vector<1x64xf32>
    %157 = arith.divf %155, %156 : vector<1x64xf32>
    %158 = arith.mulf %152, %152 : vector<1x64xf32>
    %159 = arith.subf %157, %158 : vector<1x64xf32>
    %cst_50 = arith.constant 0.000000e+00 : f32
    %160 = vector.broadcast %cst_50 : f32 to vector<1x64xf32>
    %161 = arith.maximumf %159, %160 : vector<1x64xf32>
    %162 = vector.broadcast %152 : vector<1x64xf32> to vector<32x64xf32>
    %163 = arith.subf %148, %162 : vector<32x64xf32>
    %cst_51 = arith.constant 9.99999974E-6 : f32
    %164 = vector.broadcast %cst_51 : f32 to vector<1x64xf32>
    %165 = arith.addf %161, %164 : vector<1x64xf32>
    %166 = math.rsqrt %165 : vector<1x64xf32>
    %167 = vector.broadcast %166 : vector<1x64xf32> to vector<32x64xf32>
    %168 = arith.mulf %163, %167 : vector<32x64xf32>
    %cst_52 = arith.constant 0.000000e+00 : f32
    %169 = vector.broadcast %cst_52 : f32 to vector<32x64xf32>
    %170 = arith.maximumf %168, %169 : vector<32x64xf32>
    %171 = arith.truncf %170 : vector<32x64xf32> to vector<32x64xbf16>
    %172 = vector.shape_cast %171 : vector<32x64xbf16> to vector<2x4x4x64xbf16>
    %c1424 = arith.constant 1424 : index
    %c0_53 = arith.constant 0 : index
    %173 = vector.load %arg3[%c1424, %c0_53] : memref<2448x128xbf16, #tpu.memory_space<vmem>>, vector<256x64xbf16>
    %c4 = arith.constant 4 : index
    %c0_54 = arith.constant 0 : index
    %174 = vector.load %arg4[%c4, %c0_54] : memref<8x128xf32, #tpu.memory_space<vmem>>, vector<1x64xf32>
    %cst_55 = arith.constant 0.000000e+00 : bf16
    %175 = vector.broadcast %cst_55 : bf16 to vector<2x4x1x64xbf16>
    %176 = tpu.concatenate %175, %172, %175 in 2 : vector<2x4x1x64xbf16>, vector<2x4x4x64xbf16>, vector<2x4x1x64xbf16> -> vector<2x4x6x64xbf16>
    %cst_56 = arith.constant 0.000000e+00 : bf16
    %177 = vector.broadcast %cst_56 : bf16 to vector<2x1x6x64xbf16>
    %178 = tpu.concatenate %177, %176, %177 in 1 : vector<2x1x6x64xbf16>, vector<2x4x6x64xbf16>, vector<2x1x6x64xbf16> -> vector<2x6x6x64xbf16>
    %179 = vector.extract_strided_slice %178 {offsets = [0, 0, 0, 0], sizes = [2, 5, 5, 64], strides = [1, 1, 1, 1]} : vector<2x6x6x64xbf16> to vector<2x5x5x64xbf16>
    %180 = vector.extract_strided_slice %178 {offsets = [0, 0, 1, 0], sizes = [2, 5, 5, 64], strides = [1, 1, 1, 1]} : vector<2x6x6x64xbf16> to vector<2x5x5x64xbf16>
    %181 = vector.extract_strided_slice %178 {offsets = [0, 1, 0, 0], sizes = [2, 5, 5, 64], strides = [1, 1, 1, 1]} : vector<2x6x6x64xbf16> to vector<2x5x5x64xbf16>
    %182 = vector.extract_strided_slice %178 {offsets = [0, 1, 1, 0], sizes = [2, 5, 5, 64], strides = [1, 1, 1, 1]} : vector<2x6x6x64xbf16> to vector<2x5x5x64xbf16>
    %183 = tpu.concatenate %179, %180, %181, %182 in 3 : vector<2x5x5x64xbf16>, vector<2x5x5x64xbf16>, vector<2x5x5x64xbf16>, vector<2x5x5x64xbf16> -> vector<2x5x5x256xbf16>
    %184 = vector.shape_cast %183 : vector<2x5x5x256xbf16> to vector<50x256xbf16>
    %cst_57 = arith.constant dense<0.000000e+00> : vector<50x64xf32>
    %185 = tpu.matmul %184, %173, %cst_57 {dimension_numbers = #tpu.dot_dimension_numbers<[1], [0], [0], [1], [0, 0, 1, 1], [], []>} : vector<50x256xbf16>, vector<256x64xbf16>, vector<50x64xf32> -> vector<50x64xf32>
    %186 = vector.broadcast %174 : vector<1x64xf32> to vector<50x64xf32>
    %187 = arith.addf %185, %186 : vector<50x64xf32>
    %cst_58 = arith.constant 0.000000e+00 : f32
    %188 = vector.broadcast %cst_58 : f32 to vector<50x64xf32>
    %189 = arith.maximumf %187, %188 : vector<50x64xf32>
    %190 = arith.truncf %189 : vector<50x64xf32> to vector<50x64xbf16>
    %191 = vector.shape_cast %190 : vector<50x64xbf16> to vector<2x5x5x64xbf16>
    %c1680 = arith.constant 1680 : index
    %c0_59 = arith.constant 0 : index
    %192 = vector.load %arg3[%c1680, %c0_59] : memref<2448x128xbf16, #tpu.memory_space<vmem>>, vector<256x64xbf16>
    %c5 = arith.constant 5 : index
    %c0_60 = arith.constant 0 : index
    %193 = vector.load %arg4[%c5, %c0_60] : memref<8x128xf32, #tpu.memory_space<vmem>>, vector<1x64xf32>
    %cst_61 = arith.constant 0.000000e+00 : bf16
    %194 = vector.broadcast %cst_61 : bf16 to vector<2x5x1x64xbf16>
    %195 = tpu.concatenate %194, %191, %194 in 2 : vector<2x5x1x64xbf16>, vector<2x5x5x64xbf16>, vector<2x5x1x64xbf16> -> vector<2x5x7x64xbf16>
    %cst_62 = arith.constant 0.000000e+00 : bf16
    %196 = vector.broadcast %cst_62 : bf16 to vector<2x1x7x64xbf16>
    %197 = tpu.concatenate %196, %195, %196 in 1 : vector<2x1x7x64xbf16>, vector<2x5x7x64xbf16>, vector<2x1x7x64xbf16> -> vector<2x7x7x64xbf16>
    %198 = vector.extract_strided_slice %197 {offsets = [0, 0, 0, 0], sizes = [2, 6, 6, 64], strides = [1, 1, 1, 1]} : vector<2x7x7x64xbf16> to vector<2x6x6x64xbf16>
    %199 = vector.extract_strided_slice %197 {offsets = [0, 0, 1, 0], sizes = [2, 6, 6, 64], strides = [1, 1, 1, 1]} : vector<2x7x7x64xbf16> to vector<2x6x6x64xbf16>
    %200 = vector.extract_strided_slice %197 {offsets = [0, 1, 0, 0], sizes = [2, 6, 6, 64], strides = [1, 1, 1, 1]} : vector<2x7x7x64xbf16> to vector<2x6x6x64xbf16>
    %201 = vector.extract_strided_slice %197 {offsets = [0, 1, 1, 0], sizes = [2, 6, 6, 64], strides = [1, 1, 1, 1]} : vector<2x7x7x64xbf16> to vector<2x6x6x64xbf16>
    %202 = tpu.concatenate %198, %199, %200, %201 in 3 : vector<2x6x6x64xbf16>, vector<2x6x6x64xbf16>, vector<2x6x6x64xbf16>, vector<2x6x6x64xbf16> -> vector<2x6x6x256xbf16>
    %203 = vector.shape_cast %202 : vector<2x6x6x256xbf16> to vector<72x256xbf16>
    %cst_63 = arith.constant dense<0.000000e+00> : vector<72x64xf32>
    %204 = tpu.matmul %203, %192, %cst_63 {dimension_numbers = #tpu.dot_dimension_numbers<[1], [0], [0], [1], [0, 0, 1, 1], [], []>} : vector<72x256xbf16>, vector<256x64xbf16>, vector<72x64xf32> -> vector<72x64xf32>
    %205 = vector.broadcast %193 : vector<1x64xf32> to vector<72x64xf32>
    %206 = arith.addf %204, %205 : vector<72x64xf32>
    %cst_64 = arith.constant 0.000000e+00 : f32
    %207 = vector.broadcast %cst_64 : f32 to vector<72x64xf32>
    %208 = arith.maximumf %206, %207 : vector<72x64xf32>
    %209 = arith.truncf %208 : vector<72x64xf32> to vector<72x64xbf16>
    %210 = vector.shape_cast %209 : vector<72x64xbf16> to vector<2x6x6x64xbf16>
    %c1936 = arith.constant 1936 : index
    %c0_65 = arith.constant 0 : index
    %211 = vector.load %arg3[%c1936, %c0_65] : memref<2448x128xbf16, #tpu.memory_space<vmem>>, vector<256x64xbf16>
    %212 = vector.extract_strided_slice %210 {offsets = [0, 0, 0, 0], sizes = [2, 5, 5, 64], strides = [1, 1, 1, 1]} : vector<2x6x6x64xbf16> to vector<2x5x5x64xbf16>
    %213 = vector.extract_strided_slice %210 {offsets = [0, 0, 1, 0], sizes = [2, 5, 5, 64], strides = [1, 1, 1, 1]} : vector<2x6x6x64xbf16> to vector<2x5x5x64xbf16>
    %214 = vector.extract_strided_slice %210 {offsets = [0, 1, 0, 0], sizes = [2, 5, 5, 64], strides = [1, 1, 1, 1]} : vector<2x6x6x64xbf16> to vector<2x5x5x64xbf16>
    %215 = vector.extract_strided_slice %210 {offsets = [0, 1, 1, 0], sizes = [2, 5, 5, 64], strides = [1, 1, 1, 1]} : vector<2x6x6x64xbf16> to vector<2x5x5x64xbf16>
    %216 = tpu.concatenate %212, %213, %214, %215 in 3 : vector<2x5x5x64xbf16>, vector<2x5x5x64xbf16>, vector<2x5x5x64xbf16>, vector<2x5x5x64xbf16> -> vector<2x5x5x256xbf16>
    %217 = vector.shape_cast %216 : vector<2x5x5x256xbf16> to vector<50x256xbf16>
    %cst_66 = arith.constant dense<0.000000e+00> : vector<50x64xf32>
    %218 = tpu.matmul %217, %211, %cst_66 {dimension_numbers = #tpu.dot_dimension_numbers<[1], [0], [0], [1], [0, 0, 1, 1], [], []>} : vector<50x256xbf16>, vector<256x64xbf16>, vector<50x64xf32> -> vector<50x64xf32>
    %cst_67 = arith.constant dense<0.000000e+00> : vector<64xf32>
    %219 = vector.multi_reduction <add>, %218, %cst_67 [0] : vector<50x64xf32> to vector<64xf32>
    %220 = vector.shape_cast %219 : vector<64xf32> to vector<1x64xf32>
    %cst_68 = arith.constant 5.000000e+01 : f32
    %221 = vector.broadcast %cst_68 : f32 to vector<1x64xf32>
    %222 = arith.divf %220, %221 : vector<1x64xf32>
    %223 = arith.mulf %218, %218 : vector<50x64xf32>
    %cst_69 = arith.constant dense<0.000000e+00> : vector<64xf32>
    %224 = vector.multi_reduction <add>, %223, %cst_69 [0] : vector<50x64xf32> to vector<64xf32>
    %225 = vector.shape_cast %224 : vector<64xf32> to vector<1x64xf32>
    %cst_70 = arith.constant 5.000000e+01 : f32
    %226 = vector.broadcast %cst_70 : f32 to vector<1x64xf32>
    %227 = arith.divf %225, %226 : vector<1x64xf32>
    %228 = arith.mulf %222, %222 : vector<1x64xf32>
    %229 = arith.subf %227, %228 : vector<1x64xf32>
    %cst_71 = arith.constant 0.000000e+00 : f32
    %230 = vector.broadcast %cst_71 : f32 to vector<1x64xf32>
    %231 = arith.maximumf %229, %230 : vector<1x64xf32>
    %232 = vector.broadcast %222 : vector<1x64xf32> to vector<50x64xf32>
    %233 = arith.subf %218, %232 : vector<50x64xf32>
    %cst_72 = arith.constant 9.99999974E-6 : f32
    %234 = vector.broadcast %cst_72 : f32 to vector<1x64xf32>
    %235 = arith.addf %231, %234 : vector<1x64xf32>
    %236 = math.rsqrt %235 : vector<1x64xf32>
    %237 = vector.broadcast %236 : vector<1x64xf32> to vector<50x64xf32>
    %238 = arith.mulf %233, %237 : vector<50x64xf32>
    %cst_73 = arith.constant 0.000000e+00 : f32
    %239 = vector.broadcast %cst_73 : f32 to vector<50x64xf32>
    %240 = arith.maximumf %238, %239 : vector<50x64xf32>
    %241 = arith.truncf %240 : vector<50x64xf32> to vector<50x64xbf16>
    %242 = vector.shape_cast %241 : vector<50x64xbf16> to vector<2x5x5x64xbf16>
    %c2192 = arith.constant 2192 : index
    %c0_74 = arith.constant 0 : index
    %243 = vector.load %arg3[%c2192, %c0_74] : memref<2448x128xbf16, #tpu.memory_space<vmem>>, vector<256x3xbf16>
    %c6 = arith.constant 6 : index
    %c0_75 = arith.constant 0 : index
    %244 = vector.load %arg4[%c6, %c0_75] : memref<8x128xf32, #tpu.memory_space<vmem>>, vector<1x3xf32>
    %245 = vector.extract_strided_slice %242 {offsets = [0, 0, 0, 0], sizes = [2, 4, 4, 64], strides = [1, 1, 1, 1]} : vector<2x5x5x64xbf16> to vector<2x4x4x64xbf16>
    %246 = vector.extract_strided_slice %242 {offsets = [0, 0, 1, 0], sizes = [2, 4, 4, 64], strides = [1, 1, 1, 1]} : vector<2x5x5x64xbf16> to vector<2x4x4x64xbf16>
    %247 = vector.extract_strided_slice %242 {offsets = [0, 1, 0, 0], sizes = [2, 4, 4, 64], strides = [1, 1, 1, 1]} : vector<2x5x5x64xbf16> to vector<2x4x4x64xbf16>
    %248 = vector.extract_strided_slice %242 {offsets = [0, 1, 1, 0], sizes = [2, 4, 4, 64], strides = [1, 1, 1, 1]} : vector<2x5x5x64xbf16> to vector<2x4x4x64xbf16>
    %249 = tpu.concatenate %245, %246, %247, %248 in 3 : vector<2x4x4x64xbf16>, vector<2x4x4x64xbf16>, vector<2x4x4x64xbf16>, vector<2x4x4x64xbf16> -> vector<2x4x4x256xbf16>
    %250 = vector.shape_cast %249 : vector<2x4x4x256xbf16> to vector<32x256xbf16>
    %cst_76 = arith.constant dense<0.000000e+00> : vector<32x3xf32>
    %251 = tpu.matmul %250, %243, %cst_76 {dimension_numbers = #tpu.dot_dimension_numbers<[1], [0], [0], [1], [0, 0, 1, 1], [], []>} : vector<32x256xbf16>, vector<256x3xbf16>, vector<32x3xf32> -> vector<32x3xf32>
    %252 = vector.broadcast %244 : vector<1x3xf32> to vector<32x3xf32>
    %253 = arith.addf %251, %252 : vector<32x3xf32>
    %cst_77 = arith.constant 0.000000e+00 : f32
    %254 = vector.broadcast %cst_77 : f32 to vector<32x3xf32>
    %255 = arith.subf %254, %253 : vector<32x3xf32>
    %256 = math.exp %255 : vector<32x3xf32>
    %cst_78 = arith.constant 1.000000e+00 : f32
    %257 = vector.broadcast %cst_78 : f32 to vector<32x3xf32>
    %258 = arith.addf %257, %256 : vector<32x3xf32>
    %cst_79 = arith.constant 1.000000e+00 : f32
    %259 = vector.broadcast %cst_79 : f32 to vector<32x3xf32>
    %260 = arith.divf %259, %258 : vector<32x3xf32>
    %c0_80 = arith.constant 0 : index
    %c0_81 = arith.constant 0 : index
    %261 = vector.load %arg5[%c0_80, %c0_81] : memref<32x3xf32, #tpu.memory_space<vmem>>, vector<32x3xf32>
    tpu.vector_store %arg5[%c0_80, %c0_81], %260 {strides = array<i32>} : memref<32x3xf32, #tpu.memory_space<vmem>>, vector<32x3xf32>,
    return
  }
}

</mosaic_0001>

<bundles_post_ra>
// kernel: net8group2_forward.1
= control target key start
LH: loop header
LB: loop body
LE: loop exit
PB: predicated region body
PF: predicated region fallthrough
CT: control target
= control target key end

     0   :  { %10 = vsyncpa [#allocation3], 0  ;;  %s10026_s18 = smov [#allocation2]   ;;  %s12119_s0 = inlined_call_operand.vmem [shape: f32[2,4,4,3], index: 0, kind: input, shape index: {}]   ;;  %s12120_s1 = inlined_call_operand.vmem [shape: f32[2,2,2,16], index: 1, kind: input, shape index: {}]   ;;  %s12121_s2 = inlined_call_operand.vmem [shape: f32[2,2,2,16], index: 2, kind: input, shape index: {}]   ;;  %s12122_s3 = inlined_call_operand.hbm [shape: bf16[2448,128], index: 3, kind: input, shape index: {}]   ;;  %s12123_s4 = inlined_call_operand.vmem [shape: f32[8,128], index: 4, kind: input, shape index: {}]   ;;  %s12124_s5 = inlined_call_operand.vmem [shape: f32[32,3], index: 5, kind: output, shape index: {}]  }
   0x1   :  { %s22_s19 = sshll.u32 %s10026_s18, 4  ;;  %s10002_s22 = scalar_lea.hbm %s12122_s3, 19584  ;;  %s23_s19 = int_to_ptr.vmem [resolvable:$true] %s22_s19 }
   0x2   :  { %p10003_p0 = scmp.ne.s32.totalorder %s12122_s3, %s10002_s22  ;;  %p10006_p1 = scmp.lt.u32.totalorder %s10002_s22, %s12122_s3 }
   0x4   :  { %p10008_p2 = pnand %p10006_p1, %p10003_p0 }
   0x6   :  { %10011 = shalt.err (!%p10008_p2)
}
   0x7   :  { %s10012_s27 = scalar_lea.vmem %s23_s19, 19584  ;;  %p10017_p4 = scmp.lt.s32.totalorder %s23_s19, %s23_s19 }
   0x8   :  { %p10013_p3 = scmp.ne.s32.totalorder %s23_s19, %s10012_s27  ;;  %p10018_p5 = scmp.lt.s32.totalorder %s10012_s27, %s10012_s27 }
   0xa   :  { %p10019_p6 = por %p10018_p5, %p10017_p4 }
   0xc   :  { %p10020_p7 = pnand %p10019_p6, %p10013_p3 }
   0xe   :  { %10023 = shalt.err (!%p10020_p7)
}
   0xf   :  { %s10027_s28 = smov 64   ;;  %s10028_s29 = smov 4  }
  0x10   :  { %28 = dma.hbm_to_vmem [thread:$0]  %s12122_s3, 19584, %s23_s19, [#allocation3], %s10027_s28, %s10027_s28, %s10028_s29  }
  0x11   :  { %10024 = dma.done.wait [#allocation3], 19584  }
  0x12   :  { %10025 = vsyncadd [#allocation3], 4294947712  ;;  %v37_v0 = vld [vmem:[%s12119_s0 + $0x8] sm:$0xf]  ;;  %v36_v1 = vld [vmem:[%s12119_s0 + $0x4] sm:$0xf]  ;;  %v200_v60 = vlaneseq }
  0x13   :  { %v40_v2 = vld [vmem:[%s12119_s0 + $0x14] sm:$0xf]  ;;  %v10093_v3 = vpack.c.bf16 %v37_v0, %v37_v0  ;;  %v10095_v4 = vpack.c.bf16 %v36_v1, %v36_v1  ;;  %v38_v5 = vld [vmem:[%s12119_s0 + $0xc] sm:$0xf]  ;;  %v41_v6 = vld [vmem:[%s12119_s0 + $0x18] sm:$0xf] }
  0x14   :  { %v35_v7 = vld [vmem:[%s12119_s0] sm:$0xf]  ;;  %v39_v9 = vld [vmem:[%s12119_s0 + $0x10] sm:$0xf]  ;;  %s10029_s20 = smov 6   ;;  %v10115_v10 = vpack.c.bf16 %v40_v2, %v40_v2  ;;  %v46_v11 = vpack.c.bf16 %v38_v5, %v38_v5  ;;  %v10119_v14 = vpack.c.bf16 %v41_v6, %v41_v6  ;;  %s10031_s23 = smov 9  }
  0x15   :  { %v10106_v8 = vpack.c.bf16 %v35_v7, %v35_v7  ;;  %116 = vrot.lane.b32.xlu0 %v10093_v3, %s10029_s20  ;;  %114 = vrot.lane.b32.xlu1 %v10095_v4, %s10029_s20  ;;  %v71_v12 = vshll.u32 %v10093_v3, 16  ;;  %v64_v13 = vshll.u32 %v10095_v4, 16  ;;  %v10123_v17 = vpack.c.bf16 %v39_v9, %v39_v9  ;;  %v42_v20 = vld [vmem:[%s12119_s0 + $0x1c] sm:$0xf]  ;;  %s10030_s0 = smov 3   ;;  %s10034_s24 = smov 32  }
  0x16   :  { %v69_v18 = vshrl.u32 %v10093_v3, 16  ;;  %v85_v19 = vshll.u32 %v10115_v10, 16  ;;  %v62_v22 = vshrl.u32 %v10095_v4, 16  ;;  %v92_v24 = vshll.u32 %v10119_v14, 16  ;;  %v9827_v48 = vld [vmem:[#allocation2] sm:$0x3f]  }
  0x17   :  { %v55_v15 = vshrl.u32 %v10106_v8, 16  ;;  %v57_v16 = vshll.u32 %v10106_v8, 16  ;;  %v78_v23 = vshll.u32 %v10123_v17, 16  ;;  %v73_v25 = vrot.slane %v71_v12, 1  ;;  %s10037_s27 = smov 96   ;;  %s10038_s18 = smov 80  }
  0x18   :  { %v66_v26 = vrot.slane %v64_v13, 1  ;;  %v83_v28 = vshrl.u32 %v10115_v10, 16  ;;  %v90_v29 = vshrl.u32 %v10119_v14, 16  ;;  %v129_v30 = vshll.u32 %v46_v11, 16 }
  0x19   :  { %v59_v21 = vrot.slane %v57_v16, 1  ;;  %120 = vrot.lane.b32.xlu0 %v10115_v10, %s10029_s20  ;;  %118 = vrot.lane.b32.xlu1 %v46_v11, %s10029_s20  ;;  %v76_v31 = vshrl.u32 %v10123_v17, 16  ;;  %v87_v32 = vrot.slane %v85_v19, 1  ;;  %v127_v33 = vshrl.u32 %v46_v11, 16 }
  0x1a   :  { %v50_v34 = vpack.c.bf16 %v42_v20, %v42_v20  ;;  %v80_v35 = vrot.slane %v78_v23, 1  ;;  %v94_v36 = vrot.slane %v92_v24, 1  ;;  %v74_v37 = vor.u32 %v73_v25, %v69_v18 }
  0x1b   :  { %v60_v27 = vor.u32 %v59_v21, %v55_v15  ;;  %v67_v38 = vor.u32 %v66_v26, %v62_v22  ;;  %v131_v39 = vrot.slane %v129_v30, 1  ;;  %v88_v44 = vor.u32 %v87_v32, %v83_v28 }
  0x1c   :  { %v136_v40 = vshll.u32 %v50_v34, 16  ;;  %v134_v41 = vshrl.u32 %v50_v34, 16  ;;  %v81_v43 = vor.u32 %v80_v35, %v76_v31  ;;  %v95_v45 = vor.u32 %v94_v36, %v90_v29 }
  0x1d   :  { %122 = vrot.lane.b32.xlu1 %v10119_v14, %s10029_s20  ;;  %96 = vrot.lane.b32.xlu0 %v60_v27, %s10030_s0  ;;  %v132_v46 = vor.u32 %v131_v39, %v127_v33  ;;  %vm435_vm0 = vcmask 1045504   ;;  %v10032_v58 = vmov 1966171168   ;;  %vm152_vm1 = vcmask 23552  }
  0x1e   :  { %v138_v42 = vrot.slane %v136_v40, 1  ;;  %9807 = vmatprep.subr.msk.bf16.mxu0 %vm435_vm0, %v9827_v48  ;;  %v437_v49 = vsel %vm435_vm0, %v9827_v48, 0  ;;  %v198_v59 = vunpack.c.l.s4 %v10032_v58  ;;  %v10142_v0 = vshrl.u32 %v200_v60, 7 }
  0x1f   :  { %9738 = vmatpush3.bf16.msra.mxu0 %v437_v49  ;;  %vm165_vm2 = vcmask 48128   ;;  %vm178_vm3 = vcmask 72704   ;;  %vm428_vm4 = vcmask 97280   ;;  %vm599_vm5 = vcmask 1040384  }
  0x20   :  { %v139_v47 = vor.u32 %v138_v42, %v134_v41  ;;  %v199_v63 = vunpack.c.0.s8 %v198_v59  ;;  %vm600_vm6 = vsmask.f32 256  ;;  %vm10036_vm8 = vmmov 0  }
  0x21   :  { %100 = vrot.lane.b32.xlu1 %v74_v37, %s10030_s0  ;;  %98 = vrot.lane.b32.xlu0 %v67_v38, %s10030_s0  ;;  %vm10218_vm7 = vmand %vm599_vm5, %vm600_vm6  ;;  %vm649_vm9 = vcmask 261120   ;;  %vm656_vm10 = vcmask 523264   ;;  %vm664_vm11 = vcmask 785408   ;;  %vm1006_vm12 = vcmask 1041408  }
  0x22   :  { %v10147_v2 = vsub.s32 %v199_v63, %v10142_v0  ;;  %vm1007_vm13 = vsmask.f32 1280  ;;  %vm1748_vm15 = vcmask 654336   ;;  %vm2510_vm0 = vcmask 1042432  }
  0x23   :  { %vm10264_vm14 = vmand %vm1006_vm12, %vm1007_vm13 }
  0x25   :  { %102 = vrot.lane.b32.xlu1 %v81_v43, %s10030_s0  ;;  %104 = vrot.lane.b32.xlu0 %v88_v44, %s10030_s0 }
  0x29   :  { %140 = vrot.lane.b32.xlu1 %v67_v38, %s10031_s23  ;;  %106 = vrot.lane.b32.xlu0 %v95_v45, %s10030_s0 }
  0x2d   :  { %144 = vrot.lane.b32.xlu1 %v132_v46, %s10031_s23  ;;  %142 = vrot.lane.b32.xlu0 %v74_v37, %s10031_s23 }
  0x31   :  { %148 = vrot.lane.b32.xlu1 %v95_v45, %s10031_s23  ;;  %146 = vrot.lane.b32.xlu0 %v88_v44, %s10031_s23 }
  0x35   :  { %124 = vrot.lane.b32.xlu0 %v50_v34, %s10029_s20  ;;  %150 = vrot.lane.b32.xlu1 %v139_v47, %s10031_s23 }
  0x87   :  { %v117_v50 = vpop.permute.xlu0 %116  ;;  %v115_v51 = vpop.permute.xlu1 %114 }
  0x8b   :  { %v121_v52 = vpop.permute.xlu0 %120  ;;  %v119_v53 = vpop.permute.xlu1 %118 }
  0x8f   :  { %v123_v54 = vpop.permute.xlu1 %122  ;;  %v97_v55 = vpop.permute.xlu0 %96 }
  0x90   :  { %v154_v1 = vsel %vm152_vm1, %v10106_v8, %v97_v55 }
  0x91   :  { %v167_v6 = vsel %vm165_vm2, %v154_v1, %v115_v51 }
  0x93   :  { %v101_v56 = vpop.permute.xlu1 %100  ;;  %v99_v57 = vpop.permute.xlu0 %98 }
  0x94   :  { %v156_v9 = vsel %vm152_vm1, %v10095_v4, %v99_v57  ;;  %v158_v12 = vsel %vm152_vm1, %v10093_v3, %v101_v56 }
  0x95   :  { %v169_v16 = vsel %vm165_vm2, %v156_v9, %v117_v50  ;;  %v171_v20 = vsel %vm165_vm2, %v158_v12, %v119_v53 }
  0x97   :  { %v103_v61 = vpop.permute.xlu1 %102  ;;  %v105_v62 = vpop.permute.xlu0 %104 }
  0x98   :  { %v162_v8 = vsel %vm152_vm1, %v10115_v10, %v105_v62  ;;  %v160_v19 = vsel %vm152_vm1, %v10123_v17, %v103_v61 }
  0x99   :  { %v175_v22 = vsel %vm165_vm2, %v162_v8, %v123_v54  ;;  %v173_v26 = vsel %vm165_vm2, %v160_v19, %v121_v52  ;;  %v10033_v19 = vmov 0  }
  0x9b   :  { %v141_v5 = vpop.permute.xlu1 %140  ;;  %v107_v7 = vpop.permute.xlu0 %106 }
  0x9c   :  { %v180_v11 = vsel %vm178_vm3, %v167_v6, %v141_v5  ;;  %v164_v37 = vsel %vm152_vm1, %v10119_v14, %v107_v7 }
  0x9d   :  { %v203_v13 = vrot.slane %v180_v11, %v10147_v2 }
  0x9f   :  { %v145_v15 = vpop.permute.xlu1 %144  ;;  %v143_v18 = vpop.permute.xlu0 %142  ;;  %v204_v10 = vcombine.high %v203_v13, %v203_v13  ;;  %v211_v48 = vrot.slane %v203_v13, %v10147_v2 }
  0xa0   :  { %v182_v4 = vsel %vm178_vm3, %v169_v16, %v143_v18  ;;  %v184_v21 = vsel %vm178_vm3, %v171_v20, %v145_v15  ;;  %v10197_v20 = vrot.slane %v10033_v19, 1 }
  0xa1   :  { %v225_v3 = vrot.slane %v182_v4, %v10147_v2  ;;  %v247_v17 = vrot.slane %v184_v21, %v10147_v2  ;;  %v218_v34 = vrot.slane %v204_v10, %v10147_v2  ;;  %v9828_v4 = vld [vmem:[#allocation2 + $0x8] sm:$0xff]   ;;  %v10035_v21 = vmov 0.0  }
  0xa2   :  { %628 = vrot.lane.b32.xlu0 %v10197_v20, %s10034_s24  ;;  %9743 = vmatprep.subr.bf16.mxu1 %v10035_v21 }
  0xa3   :  { %v226_v23 = vcombine.high %v225_v3, %v225_v3  ;;  %v233_v24 = vrot.slane %v225_v3, %v10147_v2  ;;  %v149_v25 = vpop.permute.xlu1 %148  ;;  %v147_v27 = vpop.permute.xlu0 %146  ;;  %v248_v38 = vcombine.high %v247_v17, %v247_v17  ;;  %v255_v42 = vrot.slane %v247_v17, %v10147_v2  ;;  %9744 = vmatpush3.bf16.msra.mxu1 %v9828_v4  ;;  %v9829_v3 = vld [vmem:[#allocation2 + $0x10] sm:$0xff]  }
  0xa4   :  { %v188_v28 = vsel %vm178_vm3, %v175_v22, %v149_v25  ;;  %v186_v29 = vsel %vm178_vm3, %v173_v26, %v147_v27  ;;  %9745 = vmatprep.subr.bf16.mxu1 %v10035_v21  ;;  %9759 = vmatprep.mubr.msk.bf16.mxu1 %vm10036_vm8, %v10035_v21 }
  0xa5   :  { %v240_v30 = vrot.slane %v226_v23, %v10147_v2  ;;  %v333_v31 = vunpack.i.h.s16 %v233_v24  ;;  %v291_v32 = vrot.slane %v188_v28, %v10147_v2  ;;  %v269_v33 = vrot.slane %v186_v29, %v10147_v2  ;;  %v9134_v23 = vld [vmem:[%s12123_s4] ss:$0 sm:$0xff] }
  0xa6   :  { %v9135_v43 = vpack.i.b16 %v233_v24, %v218_v34  ;;  %v262_v14 = vrot.slane %v248_v38, %v10147_v2  ;;  %639 = vrot.lane.b32.xlu0 %v10033_v19, %s10027_s28 }
  0xa7   :  { %v9136_v35 = vpack.i.b16 %v240_v30, %v333_v31  ;;  %v125_v36 = vpop.permute.xlu0 %124  ;;  %v270_v39 = vcombine.high %v269_v33, %v269_v33  ;;  %v277_v40 = vrot.slane %v269_v33, %v10147_v2  ;;  %v151_v41 = vpop.permute.xlu1 %150  ;;  %v292_v45 = vcombine.high %v291_v32, %v291_v32  ;;  %9746 = vmatpush3.bf16.msra.mxu1 %v9829_v3 }
  0xa8   :  { %v177_v44 = vsel %vm165_vm2, %v164_v37, %v125_v36  ;;  %v360_v53 = vcombine.low %v211_v48, %v9135_v43  ;;  %v299_v58 = vrot.slane %v291_v32, %v10147_v2  ;;  %9747 = vmatprep.subr.bf16.mxu1 %v10035_v21  ;;  %vm2511_vm2 = vsmask.f32 2304 }
  0xa9   :  { %v284_v46 = vrot.slane %v270_v39, %v10147_v2  ;;  %v339_v47 = vunpack.i.h.s16 %v277_v40  ;;  %v190_v49 = vsel %vm178_vm3, %v177_v44, %v151_v41  ;;  %v361_v50 = vcombine.low %v9136_v35, %v255_v42  ;;  %vm10600_vm3 = vmand %vm2510_vm0, %vm2511_vm2 }
  0xaa   :  { %v313_v52 = vrot.slane %v190_v49, %v10147_v2  ;;  %v306_v54 = vrot.slane %v292_v45, %v10147_v2  ;;  %v9137_v55 = vpack.i.b16 %v277_v40, %v262_v14  ;;  %v370_v5 = vrot.slane %v360_v53, %v10147_v2 }
  0xab   :  { %v9138_v51 = vpack.i.b16 %v284_v46, %v339_v47  ;;  %v377_v59 = vrot.slane %v361_v50, %v10147_v2 }
  0xac   :  { %v314_v56 = vcombine.high %v313_v52, %v313_v52  ;;  %v321_v57 = vrot.slane %v313_v52, %v10147_v2 }
  0xad   :  { %v362_v60 = vcombine.low %v9137_v55, %v9138_v51  ;;  %v392_v11 = vcombine.low %v370_v5, %v377_v59  ;;  %v9831_v59 = vld [vmem:[#allocation2 + $0x20] sm:$0xff]   ;;  %v9832_v5 = vld [vmem:[#allocation2 + $0x28] sm:$0xff]  }
  0xae   :  { %v328_v61 = vrot.slane %v314_v56, %v10147_v2  ;;  %v345_v62 = vunpack.i.h.s16 %v321_v57  ;;  %v9139_v63 = vpack.i.b16 %v321_v57, %v306_v54  ;;  %v9830_v54 = vld [vmem:[#allocation2 + $0x18] sm:$0xff]  }
  0xaf   :  { %v384_v7 = vrot.slane %v362_v60, %v10147_v2  ;;  %v400_v13 = vrot.slane %v392_v11, %v10147_v2  ;;  %9748 = vmatpush3.bf16.msra.mxu1 %v9830_v54  ;;  %v591_v60 = vsub.s32 0, %v10142_v0 }
  0xb0   :  { %v363_v1 = vcombine.low %v299_v58, %v9139_v63  ;;  %v9140_v6 = vpack.i.b16 %v328_v61, %v345_v62  ;;  %9749 = vmatprep.subr.bf16.mxu1 %v10035_v21 }
  0xb2   :  { %v391_v9 = vrot.slane %v363_v1, %v10147_v2  ;;  %v415_v8 = vrot.slane %v9140_v6, %v10147_v2 }
  0xb3   :  { %9750 = vmatpush3.bf16.msra.mxu1 %v9831_v59 }
  0xb4   :  { %v393_v12 = vcombine.low %v384_v7, %v391_v9  ;;  %v422_v18 = vrot.slane %v415_v8, %v10147_v2  ;;  %9751 = vmatprep.subr.bf16.mxu1 %v10035_v21  ;;  %v9833_v8 = vld [vmem:[#allocation2 + $0x30] sm:$0xff]  }
  0xb6   :  { %v407_v15 = vrot.slane %v393_v12, %v10147_v2 }
  0xb7   :  { %9752 = vmatpush3.bf16.msra.mxu1 %v9832_v5 }
  0xb8   :  { %v408_v16 = vcombine.low %v400_v13, %v407_v15  ;;  %9753 = vmatprep.subr.bf16.mxu1 %v10035_v21 }
  0xba   :  { %9739 = vmatprep.mubr.msk.bf16.mxu0 %vm428_vm4, %v408_v16 }
  0xbb   :  { %9740 = vmatmul.mubr.msk.bf16.vlgmr.msra.gmra.mrb[0].mxu0 %vm428_vm4, %v422_v18  ;;  %9754 = vmatpush3.bf16.msra.mxu1 %v9833_v8  ;;  %vm8132_vm4 = vcmask 517120  }
  0xbc   :  { %9755 = vmatprep.subr.bf16.mxu1 %v10035_v21 }
 0x18e   :  { %v9741_v22 = vpop.f32.mrb[0].mxu0 }
 0x18f   :  { %v473_v10 = vpop.f32.mrb[1].mxu0  ;;  %v9834_v22 = vld [vmem:[#allocation2 + $0x38] sm:$0xff]  }
 0x190   :  { %v9742_v24 = vpop.f32.mrb[2].mxu0  ;;  %v474_v26 = vadd.f32 %v9134_v23, %v473_v10  ;;  %9756 = vmatpush3.bf16.msra.mxu1 %v9834_v22 }
 0x191   :  { %v476_v25 = vpop.f32.mrb[3].mxu0  ;;  %v9835_v24 = vld [vmem:[#allocation2 + $0x40] sm:$0xff]   ;;  %9757 = vmatprep.subr.bf16.mxu1 %v10035_v21 }
 0x192   :  { %v477_v27 = vadd.f32 %v9134_v23, %v476_v25 }
 0x194   :  { %v486_v17 = vpack.c.bf16 %v477_v27, %v474_v26  ;;  %v9144_v28 = vpack.c.bf16 %v477_v27, %v477_v27  ;;  %9758 = vmatpush3.bf16.msra.mxu1 %v9835_v24  ;;  %v629_v26 = vpop.permute.xlu0 %628 }
 0x196   :  { %v495_v29 = vrot.slane %v486_v17, %v10147_v2  ;;  %v502_v30 = vrot.slane %v9144_v28, %v10147_v2 }
 0x198   :  { %v503_v31 = vcombine.high %v495_v29, %v495_v29  ;;  %v504_v32 = vcombine.high %v502_v30, %v502_v30  ;;  %v511_v33 = vrot.slane %v495_v29, %v10147_v2  ;;  %v518_v34 = vrot.slane %v502_v30, %v10147_v2  ;;  %v640_v17 = vpop.permute.xlu0 %639 }
 0x19a   :  { %v525_v35 = vrot.slane %v503_v31, %v10147_v2  ;;  %v532_v36 = vrot.slane %v504_v32, %v10147_v2  ;;  %v533_v37 = vcombine.high %v511_v33, %v511_v33  ;;  %v534_v38 = vcombine.high %v518_v34, %v518_v34 }
 0x19b   :  { %v536_v39 = vunpack.i.h.s16 %v511_v33  ;;  %v539_v40 = vunpack.i.h.s16 %v518_v34  ;;  %v9145_v44 = vpack.c.b16 %v511_v33, %v511_v33  ;;  %v651_v31 = vsel %vm649_vm9, 0, %v629_v26 }
 0x19c   :  { %v537_v41 = vunpack.i.h.s16 %v525_v35  ;;  %v542_v42 = vunpack.i.h.s16 %v534_v38  ;;  %v9147_v43 = vpack.c.b16 %v532_v36, %v532_v36  ;;  %v9146_v48 = vpack.c.b16 %v533_v37, %v533_v37 }
 0x19d   :  { %v544_v45 = vpack.c.b16 %v536_v39, %v536_v39  ;;  %v547_v46 = vpack.c.b16 %v539_v40, %v539_v40  ;;  %v9148_v49 = vpack.c.b16 %v534_v38, %v534_v38 }
 0x19e   :  { %v545_v47 = vpack.c.b16 %v537_v41, %v537_v41  ;;  %v550_v50 = vpack.c.b16 %v542_v42, %v542_v42 }
 0x19f   :  { %v559_v14 = vmax.bf16 %v9145_v44, %v544_v45  ;;  %v560_v51 = vmax.bf16 %v9147_v43, %v547_v46 }
 0x1a0   :  { %v561_v52 = vmax.bf16 %v9146_v48, %v545_v47  ;;  %v562_v53 = vmax.bf16 %v9148_v49, %v550_v50 }
 0x1a2   :  { %v563_v55 = vmax.bf16 %v561_v52, %v559_v14  ;;  %v564_v56 = vmax.bf16 %v562_v53, %v560_v51 }
 0x1a4   :  { %v565_v57 = vmax.bf16 %v10033_v19, %v563_v55  ;;  %v566_v58 = vmax.bf16 %v10033_v19, %v564_v56 }
 0x1a6   :  { %v585_v61 = vunpack.c.l.b16 %v565_v57  ;;  %v586_v62 = vunpack.c.l.b16 %v566_v58 }
 0x1a8   :  { %v587_v63 = vpack.i.b16 %v585_v61, %v585_v61  ;;  %v588_v1 = vpack.i.b16 %v586_v62, %v586_v62 }
 0x1aa   :  { %v592_v7 = vrot.slane %v587_v63, %v591_v60  ;;  %v596_v9 = vrot.slane %v588_v1, %v591_v60 }
 0x1ac   :  { %v602_v11 = vsel %vm10218_vm7, 0, %v592_v7  ;;  %v603_v12 = vsel %vm10218_vm7, 0, %v596_v9 }
 0x1ad   :  { %v607_v13 = vsel %vm599_vm5, %v602_v11, 0  ;;  %v609_v15 = vsel %vm599_vm5, %v603_v12, 0 }
 0x1ae   :  { %637 = vrot.lane.b32.xlu1 %v607_v13, %s10027_s28  ;;  %v624_v16 = vshll.u32 %v609_v15, 16  ;;  %v618_v18 = vshll.u32 %v607_v13, 16  ;;  %v622_v19 = vshrl.u32 %v609_v15, 16  ;;  %v616_v23 = vshrl.u32 %v607_v13, 16 }
 0x1b0   :  { %v626_v4 = vrot.slane %v624_v16, 1  ;;  %v620_v3 = vrot.slane %v618_v18, 1 }
 0x1b2   :  { %641 = vrot.lane.b32.xlu1 %v609_v15, %s10027_s28  ;;  %v627_v10 = vor.u32 %v626_v4, %v622_v19  ;;  %v621_v25 = vor.u32 %v620_v3, %v616_v23 }
 0x1b4   :  { %632 = vrot.lane.b32.xlu0 %v627_v10, %s10034_s24 }
 0x1b6   :  { %630 = vrot.lane.b32.xlu1 %v621_v25, %s10034_s24 }
 0x1b8   :  { %643 = vrot.lane.b32.xlu0 %v621_v25, %s10037_s27 }
 0x1ba   :  { %645 = vrot.lane.b32.xlu1 %v10197_v20, %s10037_s27 }
 0x1bc   :  { %647 = vrot.lane.b32.xlu0 %v627_v10, %s10037_s27 }
 0x1be   :  { %1027 = vrot.lane.b32.xlu1 %v10197_v20, %s10027_s28 }
 0x220   :  { %v638_v27 = vpop.permute.xlu1 %637 }
 0x221   :  { %v658_v35 = vsel %vm656_vm10, %v651_v31, %v638_v27 }
 0x224   :  { %v642_v28 = vpop.permute.xlu1 %641 }
 0x225   :  { %v662_v40 = vsel %vm656_vm10, %v651_v31, %v642_v28 }
 0x226   :  { %v633_v29 = vpop.permute.xlu0 %632 }
 0x227   :  { %v655_v34 = vsel %vm649_vm9, %v609_v15, %v633_v29 }
 0x228   :  { %v631_v30 = vpop.permute.xlu1 %630  ;;  %v663_v41 = vsel %vm656_vm10, %v655_v34, %v640_v17 }
 0x229   :  { %v653_v32 = vsel %vm649_vm9, %v607_v13, %v631_v30 }
 0x22a   :  { %v644_v33 = vpop.permute.xlu0 %643  ;;  %v660_v37 = vsel %vm656_vm10, %v653_v32, %v640_v17 }
 0x22b   :  { %v666_v38 = vsel %vm664_vm11, %v658_v35, %v644_v33 }
 0x22c   :  { %v646_v36 = vpop.permute.xlu1 %645 }
 0x22d   :  { %v668_v39 = vsel %vm664_vm11, %v660_v37, %v646_v36  ;;  %v671_v44 = vsel %vm664_vm11, %v663_v41, %v646_v36 }
 0x22e   :  { %v676_v42 = vcombine.low %v666_v38, %v668_v39  ;;  %v648_v43 = vpop.permute.xlu0 %647 }
 0x22f   :  { %v670_v45 = vsel %vm664_vm11, %v662_v40, %v648_v43  ;;  %v9836_v40 = vld [vmem:[#allocation2 + $0x88] sm:$0xff]  }
 0x230   :  { %v677_v46 = vcombine.low %v670_v45, %v671_v44  ;;  %v684_v47 = vrot.slane %v676_v42, %v10147_v2  ;;  %v9837_v43 = vld [vmem:[#allocation2 + $0x48] sm:$0xff]   ;;  %9452 = vmatprep.subr.bf16.mxu0 %v9836_v40 }
 0x231   :  { %9453 = vmatpush3.bf16.msra.mxu0 %v9837_v43 }
 0x232   :  { %v691_v48 = vrot.slane %v677_v46, %v10147_v2 }
 0x234   :  { %v692_v49 = vcombine.low %v684_v47, %v691_v48 }
 0x236   :  { %v699_v50 = vrot.slane %v692_v49, %v10147_v2 }
 0x238   :  { %9760 = vmatmul.mubr.bf16.vlgmr.msra.gmra.mrb[0].mxu1 %v699_v50  ;;  %v9838_v50 = vld [vmem:[#allocation2 + $0x108] sm:$0xff]  }
 0x239   :  { %9474 = vmatprep.subr.bf16.mxu1 %v9838_v50 }
 0x30b   :  { %v783_v14 = vpop.f32.mrb[0].mxu1 }
 0x30c   :  { %v789_v51 = vsel %vm656_vm10, %v783_v14, 0.0  ;;  %v798_v52 = vmul.f32 %v783_v14, %v783_v14  ;;  %v9761_v53 = vpop.f32.mrb[1].mxu1 }
 0x30d   :  { %v790_v54 = vrot.slane %v789_v51, 4  ;;  %v786_v55 = vpop.f32.mrb[2].mxu1  ;;  %v9839_v53 = vld [vmem:[#allocation2 + $0x90] sm:$0xff]  }
 0x30e   :  { %v799_v56 = vsel %vm656_vm10, %v798_v52, 0.0  ;;  %v9762_v57 = vpop.f32.mrb[3].mxu1  ;;  %9454 = vmatprep.subr.bf16.mxu0 %v9839_v53  ;;  %v9859_v53 = vld [vmem:[#allocation2 + $0xb8] sm:$0xff]  }
 0x30f   :  { %v791_v58 = vadd.f32 %v790_v54, %v789_v51  ;;  %v800_v59 = vrot.slane %v799_v56, 4  ;;  %v9840_v54 = vld [vmem:[#allocation2 + $0xc8] sm:$0xff]  }
 0x310   :  { %9475 = vmatpush3.bf16.msra.mxu1 %v9840_v54  ;;  %v9860_v54 = vld [vmem:[#allocation2 + $0xf0] sm:$0xff]  }
 0x311   :  { %v792_v60 = vrot.slane %v791_v58, 2  ;;  %v801_v61 = vadd.f32 %v800_v59, %v799_v56 }
 0x313   :  { %v793_v62 = vadd.f32 %v792_v60, %v791_v58  ;;  %v802_v63 = vrot.slane %v801_v61, 2  ;;  %v9841_v58 = vld [vmem:[#allocation2 + $0x50] sm:$0xff]  }
 0x314   :  { %9455 = vmatpush3.bf16.msra.mxu0 %v9841_v58 }
 0x315   :  { %v794_v1 = vrot.slane %v793_v62, 1  ;;  %v803_v5 = vadd.f32 %v802_v63, %v801_v61  ;;  %v1183_v63 = vrot.slane %v10197_v20, %v10147_v2 }
 0x317   :  { %v795_v7 = vadd.f32 %v794_v1, %v793_v62  ;;  %v804_v9 = vrot.slane %v803_v5, 1  ;;  %v9842_v1 = vld [vmem:[#allocation2 + $0x110] sm:$0xff]  }
 0x318   :  { %9476 = vmatprep.subr.bf16.mxu1 %v9842_v1  ;;  %v9865_v1 = vld [vmem:[#allocation2 + $0x80] sm:$0xff]  }
 0x319   :  { %v797_v11 = vmul.f32 0.125, %v795_v7  ;;  %v805_v12 = vadd.f32 %v804_v9, %v803_v5  ;;  %v9843_v7 = vld [vmem:[#allocation2 + $0x98] sm:$0xff]   ;;  %v9844_v9 = vld [vmem:[#allocation2 + $0xd0] sm:$0xff]  }
 0x31a   :  { %9456 = vmatprep.subr.bf16.mxu0 %v9843_v7  ;;  %9477 = vmatpush3.bf16.msra.mxu1 %v9844_v9  ;;  %v9867_v7 = vld [vmem:[#allocation2 + $0x100] sm:$0xff]  }
 0x31b   :  { %v806_v8 = vmul.f32 0.125, %v805_v12  ;;  %v807_v13 = vmul.f32 %v797_v11, %v797_v11  ;;  %v810_v19 = vsub.f32 %v783_v14, %v797_v11  ;;  %v1696_v9 = vld [vmem:[%s12120_s1] sm:$0x3] }
 0x31d   :  { %v808_v15 = vsub.f32 %v806_v8, %v807_v13  ;;  %v9845_v8 = vld [vmem:[#allocation2 + $0x58] sm:$0xff]  }
 0x31e   :  { %9457 = vmatpush3.bf16.msra.mxu0 %v9845_v8  ;;  %v1698_v8 = vld [vmem:[%s12120_s1 + $0x4] sm:$0x3] }
 0x31f   :  { %v809_v16 = vmax.f32 %v808_v15, 0.0 }
 0x321   :  { %v811_v18 = vadd.f32 1e-05, %v809_v16  ;;  %v1198_v16 = vrot.slane %v1183_v63, %v10147_v2  ;;  %v9864_v63 = vld [vmem:[#allocation2 + $0xf8] sm:$0xff]  }
 0x323   :  { %9980 = vrsqrt.f32 %v811_v18 }
 0x32d   :  { %v9981_v4 = vpop.eup %9980 }
 0x32e   :  { %v813_v3 = vmul.f32 %v9981_v4, %v810_v19  ;;  %v9846_v19 = vld [vmem:[#allocation2 + $0x118] sm:$0xff]  }
 0x32f   :  { %9478 = vmatprep.subr.bf16.mxu1 %v9846_v19  ;;  %v1702_v19 = vpack.c.bf16 %v1698_v8, %v1698_v8 }
 0x330   :  { %v814_v22 = vmax.f32 %v813_v3, 0.0 }
 0x332   :  { %v815_v10 = vpack.c.bf16 %v814_v22, %v814_v22 }
 0x334   :  { %v823_v23 = vrot.slane %v815_v10, %v10147_v2  ;;  %v9847_v10 = vld [vmem:[#allocation2 + $0xa0] sm:$0xff]  }
 0x335   :  { %9458 = vmatprep.subr.bf16.mxu0 %v9847_v10  ;;  %v1705_v10 = vld [vmem:[%s12121_s2 + $0x2] sm:$0x3] }
 0x336   :  { %v824_v24 = vcombine.high %v823_v23, %v823_v23  ;;  %v831_v25 = vrot.slane %v823_v23, %v10147_v2  ;;  %v9848_v23 = vld [vmem:[#allocation2 + $0xd8] sm:$0xff]  }
 0x337   :  { %9479 = vmatpush3.bf16.msra.mxu1 %v9848_v23 }
 0x338   :  { %v838_v26 = vrot.slane %v824_v24, %v10147_v2  ;;  %v839_v27 = vcombine.high %v831_v25, %v831_v25  ;;  %v920_v17 = vrot.slane %v831_v25, %v10147_v2  ;;  %v9849_v25 = vld [vmem:[#allocation2 + $0x60] sm:$0xff]  }
 0x339   :  { %9459 = vmatpush3.bf16.msra.mxu0 %v9849_v25  ;;  %v1706_v25 = vld [vmem:[%s12121_s2 + $0x4] sm:$0x3] }
 0x33a   :  { %v840_v28 = vcombine.high %v838_v26, %v838_v26  ;;  %v934_v29 = vrot.slane %v838_v26, %v10147_v2  ;;  %v948_v30 = vrot.slane %v839_v27, %v10147_v2  ;;  %v927_v31 = vrot.slane %v920_v17, %v10147_v2 }
 0x33c   :  { %v971_v32 = vshrl.u32 %v927_v31, 16  ;;  %v941_v33 = vrot.slane %v934_v29, %v10147_v2  ;;  %v955_v34 = vrot.slane %v948_v30, %v10147_v2  ;;  %v962_v35 = vrot.slane %v840_v28, %v10147_v2  ;;  %v9850_v28 = vld [vmem:[#allocation2 + $0x120] sm:$0xff]  }
 0x33d   :  { %v974_v37 = vshll.u32 %v927_v31, 16  ;;  %9480 = vmatprep.subr.bf16.mxu1 %v9850_v28  ;;  %v1028_v28 = vpop.permute.xlu1 %1027 }
 0x33e   :  { %v973_v36 = vrot.slane %v971_v32, 7  ;;  %v978_v38 = vshrl.u32 %v941_v33, 16  ;;  %v985_v39 = vshrl.u32 %v955_v34, 16  ;;  %v981_v41 = vshll.u32 %v941_v33, 16  ;;  %v9851_v32 = vld [vmem:[#allocation2 + $0xa8] sm:$0xff]   ;;  %v9852_v33 = vld [vmem:[#allocation2 + $0xe0] sm:$0xff]  }
 0x33f   :  { %v969_v42 = vrot.slane %v962_v35, %v10147_v2  ;;  %v988_v48 = vshll.u32 %v955_v34, 16  ;;  %v9853_v35 = vld [vmem:[#allocation2 + $0x68] sm:$0xff]   ;;  %9460 = vmatprep.subr.bf16.mxu0 %v9851_v32  ;;  %9481 = vmatpush3.bf16.msra.mxu1 %v9852_v33 }
 0x340   :  { %v976_v44 = vor.u32 %v974_v37, %v973_v36  ;;  %v980_v46 = vrot.slane %v978_v38, 7  ;;  %v987_v47 = vrot.slane %v985_v39, 7  ;;  %9461 = vmatpush3.bf16.msra.mxu0 %v9853_v35 }
 0x341   :  { %v992_v49 = vshrl.u32 %v969_v42, 16  ;;  %v995_v57 = vshll.u32 %v969_v42, 16 }
 0x342   :  { %v1002_v14 = vsel %vm10218_vm7, 0, %v976_v44  ;;  %v983_v51 = vor.u32 %v981_v41, %v980_v46  ;;  %v990_v52 = vor.u32 %v988_v48, %v987_v47  ;;  %v9854_v41 = vld [vmem:[#allocation2 + $0x128] sm:$0xff]   ;;  %v9855_v46 = vld [vmem:[#allocation2 + $0xb0] sm:$0xff]  }
 0x343   :  { %v10272_v55 = vsel %vm10264_vm14, %v1002_v14, 0  ;;  %v994_v56 = vrot.slane %v992_v49, 7  ;;  %v9856_v47 = vld [vmem:[#allocation2 + $0xe8] sm:$0xff]   ;;  %9482 = vmatprep.subr.bf16.mxu1 %v9854_v41  ;;  %v9857_v49 = vld [vmem:[#allocation2 + $0x70] sm:$0xff]   ;;  %9462 = vmatprep.subr.bf16.mxu0 %v9855_v46  ;;  %v10375_v41 = vsel %vm656_vm10, 0, %v1028_v28 }
 0x344   :  { %1040 = vrot.lane.b32.xlu0 %v10272_v55, %s10027_s28  ;;  %v1003_v59 = vsel %vm10218_vm7, 0, %v983_v51  ;;  %v1004_v60 = vsel %vm10218_vm7, 0, %v990_v52  ;;  %v1036_v4 = vrot.slane %v10272_v55, 1  ;;  %v1016_v22 = vshll.u32 %v10272_v55, 16  ;;  %v9858_v52 = vld [vmem:[#allocation2 + $0x130] sm:$0xff]   ;;  %9483 = vmatpush3.bf16.msra.mxu1 %v9856_v47  ;;  %v9868_v28 = vld [vmem:[#allocation2 + $0x148] sm:$0xff]  }
 0x345   :  { %v10282_v61 = vsel %vm10264_vm14, %v1003_v59, 0  ;;  %v997_v62 = vor.u32 %v995_v57, %v994_v56  ;;  %v10291_v11 = vsel %vm10264_vm14, %v1004_v60, 0  ;;  %v1014_v36 = vshrl.u32 %v10272_v55, 16  ;;  %9463 = vmatpush3.bf16.msra.mxu0 %v9857_v49  ;;  %v9861_v56 = vld [vmem:[#allocation2 + $0x78] sm:$0xff]   ;;  %9484 = vmatprep.subr.bf16.mxu1 %v9858_v52  ;;  %v9863_v60 = vld [vmem:[#allocation2 + $0xc0] sm:$0xff]  }
 0x346   :  { %1042 = vrot.lane.b32.xlu1 %v10282_v61, %s10027_s28  ;;  %v1062_v5 = vrot.slane %v10282_v61, 1  ;;  %v1023_v26 = vshll.u32 %v10291_v11, 16  ;;  %v1037_v29 = vrot.slane %v10291_v11, 1  ;;  %v1018_v30 = vrot.slane %v1016_v22, 1  ;;  %v9862_v59 = vld [vmem:[#allocation2 + $0x138] sm:$0xff]   ;;  %9464 = vmatprep.subr.bf16.mxu0 %v9859_v53 }
 0x347   :  { %v1005_v12 = vsel %vm10218_vm7, 0, %v997_v62  ;;  %v1051_v31 = vshll.u32 %v10282_v61, 16  ;;  %v1021_v43 = vshrl.u32 %v10291_v11, 16  ;;  %v1049_v14 = vshrl.u32 %v10282_v61, 16  ;;  %v1704_v22 = vld [vmem:[%s12121_s2] sm:$0x3] }
 0x348   :  { %1044 = vrot.lane.b32.xlu0 %v10291_v11, %s10027_s28  ;;  %v10299_v13 = vsel %vm10264_vm14, %v1005_v12, 0  ;;  %v1144_v15 = vrot.slane %v1062_v5, %v10147_v2  ;;  %v1025_v37 = vrot.slane %v1023_v26, 1  ;;  %v10326_v42 = vor.u32 %v1018_v30, %v1014_v36  ;;  %9485 = vmatpush3.bf16.msra.mxu1 %v9860_v54  ;;  %v1697_v12 = vld [vmem:[%s12120_s1 + $0x2] sm:$0x3]  ;;  %v1707_v26 = vld [vmem:[%s12121_s2 + $0x6] sm:$0x3] }
 0x349   :  { %v1063_v18 = vrot.slane %v10299_v13, 1  ;;  %v1058_v38 = vshll.u32 %v10299_v13, 16  ;;  %v1053_v44 = vrot.slane %v1051_v31, 1  ;;  %v1056_v58 = vshrl.u32 %v10299_v13, 16  ;;  %9465 = vmatpush3.bf16.msra.mxu0 %v9861_v56  ;;  %9486 = vmatprep.subr.bf16.mxu1 %v9862_v59 }
 0x34a   :  { %1046 = vrot.lane.b32.xlu1 %v10299_v13, %s10027_s28  ;;  %v1159_v3 = vrot.slane %v1144_v15, %v10147_v2  ;;  %v10333_v50 = vor.u32 %v1025_v37, %v1021_v43  ;;  %9466 = vmatprep.subr.bf16.mxu0 %v9863_v60  ;;  %v1700_v15 = vpack.c.bf16 %v1696_v9, %v1696_v9 }
 0x34b   :  { %v1222_v24 = vrot.slane %v1063_v18, %v10147_v2  ;;  %v1060_v51 = vrot.slane %v1058_v38, 1  ;;  %v1054_v57 = vor.u32 %v1053_v44, %v1049_v14  ;;  %v1708_v23 = vpack.c.bf16 %v1704_v22, %v1704_v22 }
 0x34c   :  { %1064 = vrot.lane.b32.xlu0 %v1036_v4, %s10027_s28  ;;  %v9159_v27 = vcombine.low %v1159_v3, %v1198_v16  ;;  %9487 = vmatpush3.bf16.msra.mxu1 %v9864_v63 }
 0x34d   :  { %v1237_v17 = vrot.slane %v1222_v24, %v10147_v2  ;;  %v1061_v62 = vor.u32 %v1060_v51, %v1056_v58  ;;  %9467 = vmatpush3.bf16.msra.mxu0 %v9865_v1  ;;  %v1709_v24 = vpack.c.bf16 %v1705_v10, %v1705_v10 }
 0x34e   :  { %1066 = vrot.lane.b32.xlu1 %v1062_v5, %s10027_s28  ;;  %v1285_v39 = vrot.slane %v9159_v27, %v10147_v2  ;;  %v9866_v5 = vld [vmem:[#allocation2 + $0x140] sm:$0xff]   ;;  %9763 = vmatprep.subr.bf16.mxu0 %v10035_v21  ;;  %v1710_v27 = vpack.c.bf16 %v1706_v25, %v1706_v25 }
 0x34f   :  { %v9161_v34 = vcombine.low %v1237_v17, %v1198_v16  ;;  %9488 = vmatprep.subr.bf16.mxu1 %v9866_v5  ;;  %v1701_v16 = vpack.c.bf16 %v1697_v12, %v1697_v12  ;;  %v1711_v17 = vpack.c.bf16 %v1707_v26, %v1707_v26 }
 0x350   :  { %1068 = vrot.lane.b32.xlu0 %v1037_v29, %s10027_s28  ;;  %9489 = vmatpush3.bf16.msra.mxu1 %v9867_v7 }
 0x351   :  { %v1299_v40 = vrot.slane %v9161_v34, %v10147_v2  ;;  %9791 = vmatprep.subr.bf16.mxu1 %v10035_v21 }
 0x352   :  { %1070 = vrot.lane.b32.xlu1 %v1063_v18, %s10027_s28  ;;  %v1699_v18 = vld [vmem:[%s12120_s1 + $0x6] sm:$0x3] }
 0x353   :  { %v10329_v48 = vcombine.low %v1285_v39, %v1299_v40  ;;  %v1703_v3 = vpack.c.bf16 %v1699_v18, %v1699_v18 }
 0x354   :  { %1029 = vrot.lane.b32.xlu0 %v10326_v42, %s10027_s28 }
 0x356   :  { %1031 = vrot.lane.b32.xlu1 %v10333_v50, %s10027_s28 }
 0x358   :  { %1072 = vrot.lane.b32.xlu0 %v1054_v57, %s10027_s28 }
 0x35a   :  { %1074 = vrot.lane.b32.xlu1 %v1061_v62, %s10027_s28 }
 0x35c   :  { %1716 = vrot.lane.b32.xlu0 %v1700_v15, %s10027_s28 }
 0x35e   :  { %1718 = vrot.lane.b32.xlu1 %v1701_v16, %s10027_s28 }
 0x360   :  { %1720 = vrot.lane.b32.xlu0 %v1702_v19, %s10027_s28 }
 0x362   :  { %1722 = vrot.lane.b32.xlu1 %v1703_v3, %s10027_s28 }
 0x364   :  { %1728 = vrot.lane.b32.xlu0 %v1708_v23, %s10038_s18 }
 0x366   :  { %1730 = vrot.lane.b32.xlu1 %v1709_v24, %s10038_s18 }
 0x368   :  { %1732 = vrot.lane.b32.xlu0 %v1710_v27, %s10038_s18 }
 0x36a   :  { %1734 = vrot.lane.b32.xlu1 %v1711_v17, %s10038_s18 }
 0x3b6   :  { %v1041_v30 = vpop.permute.xlu0 %1040 }
 0x3b7   :  { %v1084_v39 = vsel %vm656_vm10, %v10197_v20, %v1041_v30 }
 0x3b8   :  { %v1043_v31 = vpop.permute.xlu1 %1042  ;;  %v1122_v51 = vcombine.low %v10375_v41, %v1084_v39  ;;  %v9875_v39 = vld [vmem:[#allocation2 + $0x1a0] sm:$0xff]  }
 0x3b9   :  { %v1087_v43 = vsel %vm656_vm10, %v1036_v4, %v1043_v31 }
 0x3ba   :  { %v1045_v32 = vpop.permute.xlu0 %1044  ;;  %v1130_v63 = vrot.slane %v1122_v51, %v10147_v2 }
 0x3bb   :  { %v1089_v52 = vsel %vm656_vm10, %v10197_v20, %v1045_v32  ;;  %v9869_v32 = vld [vmem:[#allocation2 + $0x150] sm:$0xff]  }
 0x3bc   :  { %v1047_v33 = vpop.permute.xlu1 %1046  ;;  %v1200_v20 = vcombine.low %v10375_v41, %v1089_v52  ;;  %v9157_v52 = vld [vmem:[%s12123_s4 + $0x1] ss:$0 sm:$0xff] }
 0x3bd   :  { %v1092_v53 = vsel %vm656_vm10, %v1037_v29, %v1047_v33  ;;  %v9870_v33 = vld [vmem:[#allocation2 + $0x158] sm:$0xff]  }
 0x3be   :  { %v1065_v34 = vpop.permute.xlu0 %1064  ;;  %v1208_v12 = vrot.slane %v1200_v20, %v10147_v2 }
 0x3bf   :  { %v1095_v58 = vsel %vm656_vm10, %v10326_v42, %v1065_v34  ;;  %v9871_v34 = vld [vmem:[#allocation2 + $0x160] sm:$0xff]  }
 0x3c0   :  { %v1067_v35 = vpop.permute.xlu1 %1066 }
 0x3c1   :  { %v1098_v38 = vsel %vm656_vm10, %v1054_v57, %v1067_v35  ;;  %v1316_v35 = vrot.slane %v10329_v48, %v10147_v2  ;;  %v9876_v48 = vld [vmem:[#allocation2 + $0x178] sm:$0xff]  }
 0x3c2   :  { %v1069_v36 = vpop.permute.xlu0 %1068  ;;  %v1162_v47 = vcombine.low %v1098_v38, %v10375_v41  ;;  %v9874_v38 = vld [vmem:[#allocation2 + $0x170] sm:$0xff]  }
 0x3c3   :  { %v1101_v1 = vsel %vm656_vm10, %v10333_v50, %v1069_v36  ;;  %v9872_v36 = vld [vmem:[#allocation2 + $0x168] sm:$0xff]  }
 0x3c4   :  { %v1071_v37 = vpop.permute.xlu1 %1070  ;;  %v1176_v60 = vrot.slane %v1162_v47, %v10147_v2  ;;  %v9881_v47 = vld [vmem:[#allocation2 + $0x1b8] sm:$0xff]  }
 0x3c5   :  { %v1104_v44 = vsel %vm656_vm10, %v1061_v62, %v1071_v37  ;;  %v9873_v37 = vld [vmem:[#allocation2 + $0x198] sm:$0xff]  }
 0x3c6   :  { %v1030_v40 = vpop.permute.xlu0 %1029  ;;  %v1240_v54 = vcombine.low %v1104_v44, %v10375_v41  ;;  %v9879_v44 = vld [vmem:[#allocation2 + $0x1b0] sm:$0xff]  }
 0x3c7   :  { %v1079_v46 = vsel %vm656_vm10, %v10272_v55, %v1030_v40  ;;  %v9877_v40 = vld [vmem:[#allocation2 + $0x1a8] sm:$0xff]  }
 0x3c8   :  { %v1161_v49 = vcombine.low %v1079_v46, %v1087_v43  ;;  %v1032_v14 = vpop.permute.xlu1 %1031  ;;  %v1254_v42 = vrot.slane %v1240_v54, %v10147_v2  ;;  %v9878_v43 = vld [vmem:[#allocation2 + $0x180] sm:$0xff]   ;;  %v9880_v46 = vld [vmem:[#allocation2 + $0x188] sm:$0xff]  }
 0x3c9   :  { %v1081_v4 = vsel %vm656_vm10, %v10291_v11, %v1032_v14  ;;  %v9883_v14 = vld [vmem:[#allocation2 + $0x1c0] sm:$0xff]  }
 0x3ca   :  { %v1169_v55 = vrot.slane %v1161_v49, %v10147_v2  ;;  %v1239_v56 = vcombine.low %v1081_v4, %v1092_v53  ;;  %v1073_v57 = vpop.permute.xlu0 %1072  ;;  %v9882_v49 = vld [vmem:[#allocation2 + $0x190] sm:$0xff]  }
 0x3cb   :  { %v1106_v59 = vsel %vm656_vm10, %v10282_v61, %v1073_v57 }
 0x3cc   :  { %v1247_v29 = vrot.slane %v1239_v56, %v10147_v2  ;;  %v1123_v62 = vcombine.low %v1095_v58, %v1106_v59  ;;  %v1075_v11 = vpop.permute.xlu1 %1074  ;;  %v1184_v7 = vcombine.low %v1169_v55, %v1176_v60 }
 0x3cd   :  { %v1108_v5 = vsel %vm656_vm10, %v10299_v13, %v1075_v11 }
 0x3ce   :  { %v1137_v61 = vrot.slane %v1123_v62, %v10147_v2  ;;  %v1201_v9 = vcombine.low %v1101_v1, %v1108_v5  ;;  %v1255_v8 = vcombine.low %v1247_v29, %v1254_v42  ;;  %v1191_v18 = vrot.slane %v1184_v7, %v10147_v2  ;;  %v1717_v29 = vpop.permute.xlu0 %1716 }
 0x3d0   :  { %v1145_v15 = vcombine.low %v1130_v63, %v1137_v61  ;;  %v1215_v16 = vrot.slane %v1201_v9, %v10147_v2  ;;  %v1262_v3 = vrot.slane %v1255_v8, %v10147_v2  ;;  %v1719_v62 = vpop.permute.xlu1 %1718 }
 0x3d2   :  { %v1152_v19 = vrot.slane %v1145_v15, %v10147_v2  ;;  %v1223_v50 = vcombine.low %v1208_v12, %v1215_v16  ;;  %v1721_v63 = vpop.permute.xlu0 %1720 }
 0x3d4   :  { %v1230_v13 = vrot.slane %v1223_v50, %v10147_v2  ;;  %v9158_v22 = vcombine.low %v1152_v19, %v1191_v18  ;;  %v1723_v42 = vpop.permute.xlu1 %1722 }
 0x3d6   :  { %v9160_v10 = vcombine.low %v1230_v13, %v1262_v3  ;;  %v1278_v23 = vrot.slane %v9158_v22, %v10147_v2  ;;  %v1729_v15 = vpop.permute.xlu0 %1728 }
 0x3d8   :  { %v1292_v24 = vrot.slane %v9160_v10, %v10147_v2  ;;  %v1731_v16 = vpop.permute.xlu1 %1730 }
 0x3da   :  { %v1301_v25 = vcombine.high %v1278_v23, %v1292_v24  ;;  %v1300_v26 = vcombine.low %v1278_v23, %v1292_v24  ;;  %v1733_v24 = vpop.permute.xlu0 %1732 }
 0x3dc   :  { %v1323_v27 = vrot.slane %v1301_v25, %v10147_v2  ;;  %v1309_v17 = vrot.slane %v1300_v26, %v10147_v2  ;;  %v1735_v25 = vpop.permute.xlu1 %1734 }
 0x3de   :  { %1581 = vmatprep.mubr.bf16.mxu0 %v1323_v27  ;;  %v1325_v30 = vcombine.high %v1323_v27, %v1323_v27  ;;  %v1324_v31 = vcombine.high %v1309_v17, %v1309_v17 }
 0x3df   :  { %1582 = vmatmul.mubr.bf16.vlgmr.msra.gmra.mrb[4].mxu0 %v1309_v17 }
 0x3e0   :  { %9764 = vmatpush3.bf16.msra.mxu0 %v9868_v28  ;;  %1621 = vmatprep.mubr.bf16.mxu1 %v1325_v30 }
 0x3e1   :  { %1622 = vmatmul.mubr.bf16.vlgmr.msra.gmra.mrb[4].mxu1 %v1324_v31  ;;  %9765 = vmatprep.subr.bf16.mxu0 %v10035_v21 }
 0x3e2   :  { %9771 = vmatprep.mubr.msk.bf16.mxu0 %vm10036_vm8, %v10035_v21  ;;  %9803 = vmatprep.mubr.msk.bf16.mxu1 %vm10036_vm8, %v10035_v21 }
 0x3e3   :  { %9792 = vmatpush3.bf16.msra.mxu1 %v9873_v37  ;;  %v9199_v37 = vld [vmem:[%s12123_s4 + $0x2] ss:$0 sm:$0xff] }
 0x3e4   :  { %9766 = vmatpush3.bf16.msra.mxu0 %v9869_v32  ;;  %9793 = vmatprep.subr.bf16.mxu1 %v10035_v21 }
 0x3e5   :  { %9767 = vmatprep.subr.bf16.mxu0 %v10035_v21 }
 0x3e7   :  { %9794 = vmatpush3.bf16.msra.mxu1 %v9875_v39 }
 0x3e8   :  { %9768 = vmatpush3.bf16.msra.mxu0 %v9870_v33  ;;  %9795 = vmatprep.subr.bf16.mxu1 %v10035_v21 }
 0x3e9   :  { %9769 = vmatprep.subr.bf16.mxu0 %v10035_v21 }
 0x3eb   :  { %9796 = vmatpush3.bf16.msra.mxu1 %v9877_v40 }
 0x3ec   :  { %9770 = vmatpush3.bf16.msra.mxu0 %v9871_v34  ;;  %9797 = vmatprep.subr.bf16.mxu1 %v10035_v21 }
 0x3ed   :  { %9775 = vmatprep.subr.bf16.mxu0 %v10035_v21 }
 0x3ef   :  { %9772 = vmatmul.mubr.msk.bf16.vlgmr.msra.gmra.mrb[8].mxu0 %vm656_vm10, %v1316_v35  ;;  %9798 = vmatpush3.bf16.msra.mxu1 %v9879_v44 }
 0x3f0   :  { %9787 = vmatprep.mubr.msk.bf16.mxu0 %vm10036_vm8, %v10035_v21  ;;  %9776 = vmatpush3.bf16.msra.mxu0 %v9872_v36 }
 0x3f1   :  { %9777 = vmatprep.subr.bf16.mxu0 %v10035_v21  ;;  %9799 = vmatprep.subr.bf16.mxu1 %v10035_v21 }
 0x3f3   :  { %9800 = vmatpush3.bf16.msra.mxu1 %v9881_v47 }
 0x3f4   :  { %9778 = vmatpush3.bf16.msra.mxu0 %v9874_v38  ;;  %9801 = vmatprep.subr.bf16.mxu1 %v10035_v21 }
 0x3f5   :  { %9779 = vmatprep.subr.bf16.mxu0 %v10035_v21 }
 0x3f7   :  { %9802 = vmatpush3.bf16.msra.mxu1 %v9883_v14 }
 0x3f8   :  { %9780 = vmatpush3.bf16.msra.mxu0 %v9876_v48 }
 0x3f9   :  { %9781 = vmatprep.subr.bf16.mxu0 %v10035_v21 }
 0x3fc   :  { %9782 = vmatpush3.bf16.msra.mxu0 %v9878_v43 }
 0x3fd   :  { %9783 = vmatprep.subr.bf16.mxu0 %v10035_v21 }
 0x400   :  { %9784 = vmatpush3.bf16.msra.mxu0 %v9880_v46 }
 0x401   :  { %9785 = vmatprep.subr.bf16.mxu0 %v10035_v21 }
 0x404   :  { %9786 = vmatpush3.bf16.msra.mxu0 %v9882_v49 }
 0x4b2   :  { %v9468_v51 = vpop.f32.mrb[4].mxu0 }
 0x4b3   :  { %v9469_v53 = vpop.f32.mrb[5].mxu0 }
 0x4b4   :  { %v9470_v4 = vadd.f32 %v9469_v53, %v9468_v51  ;;  %v9471_v54 = vpop.f32.mrb[6].mxu0  ;;  %v9490_v55 = vpop.f32.mrb[4].mxu1 }
 0x4b5   :  { %v9472_v56 = vpop.f32.mrb[7].mxu0  ;;  %v9491_v57 = vpop.f32.mrb[5].mxu1 }
 0x4b6   :  { %v1584_v58 = vadd.f32 %v9470_v4, %v9157_v52  ;;  %v9492_v59 = vadd.f32 %v9491_v57, %v9490_v55  ;;  %v9493_v20 = vpop.f32.mrb[6].mxu1 }
 0x4b7   :  { %v9494_v60 = vpop.f32.mrb[7].mxu1 }
 0x4b8   :  { %v1624_v21 = vadd.f32 %v9492_v59, %v1584_v58 }
 0x4c2   :  { %v1663_v11 = vpop.f32.mrb[8].mxu0 }
 0x4c3   :  { %v1664_v1 = vadd.f32 %v1663_v11, %v1624_v21  ;;  %v9773_v5 = vpop.f32.mrb[9].mxu0 }
 0x4c4   :  { %v1666_v7 = vpop.f32.mrb[10].mxu0 }
 0x4c5   :  { %v1669_v61 = vmax.f32 %v1664_v1, 0.0  ;;  %v9774_v9 = vpop.f32.mrb[11].mxu0 }
 0x4c7   :  { %v1670_v12 = vpack.c.bf16 %v1669_v61, %v1669_v61 }
 0x4c9   :  { %v1678_v8 = vrot.slane %v1670_v12, %v10147_v2 }
 0x4cb   :  { %v1679_v18 = vcombine.high %v1678_v8, %v1678_v8  ;;  %v1686_v19 = vrot.slane %v1678_v8, %v10147_v2 }
 0x4cd   :  { %v1738_v50 = vsel %vm656_vm10, %v1686_v19, %v1717_v29  ;;  %v1693_v3 = vrot.slane %v1679_v18, %v10147_v2  ;;  %v1694_v13 = vcombine.high %v1686_v19, %v1686_v19 }
 0x4ce   :  { %v1750_v26 = vsel %vm1748_vm15, %v1738_v50, %v1729_v15 }
 0x4cf   :  { %v1741_v22 = vsel %vm656_vm10, %v1693_v3, %v1719_v62  ;;  %v1744_v10 = vsel %vm656_vm10, %v1694_v13, %v1721_v63  ;;  %v1695_v23 = vcombine.high %v1693_v3, %v1693_v3 }
 0x4d0   :  { %v1752_v27 = vsel %vm1748_vm15, %v1741_v22, %v1731_v16  ;;  %v1754_v30 = vsel %vm1748_vm15, %v1744_v10, %v1733_v24 }
 0x4d1   :  { %v1747_v17 = vsel %vm656_vm10, %v1695_v23, %v1723_v42  ;;  %v1778_v28 = vcombine.low %v1750_v26, %v1752_v27 }
 0x4d2   :  { %v1756_v31 = vsel %vm1748_vm15, %v1747_v17, %v1735_v25 }
 0x4d3   :  { %v1779_v32 = vcombine.low %v1754_v30, %v1756_v31  ;;  %v1786_v33 = vrot.slane %v1778_v28, %v10147_v2 }
 0x4d5   :  { %v1793_v34 = vrot.slane %v1779_v32, %v10147_v2 }
 0x4d7   :  { %v1794_v35 = vcombine.low %v1786_v33, %v1793_v34 }
 0x4d9   :  { %v1801_v36 = vrot.slane %v1794_v35, %v10147_v2 }
 0x4db   :  { %9788 = vmatmul.mubr.msk.bf16.vlgmr.msra.gmra.mrb[12].mxu0 %vm664_vm11, %v1801_v36  ;;  %9804 = vmatmul.mubr.msk.bf16.vlgmr.msra.gmra.mrb[8].mxu1 %vm664_vm11, %v1801_v36 }
 0x5ae   :  { %v1875_v38 = vpop.f32.mrb[12].mxu0  ;;  %v1993_v39 = vpop.f32.mrb[8].mxu1 }
 0x5af   :  { %v1876_v48 = vadd.f32 %v9199_v37, %v1875_v38  ;;  %v1994_v40 = vadd.f32 %v9199_v37, %v1993_v39  ;;  %v9789_v43 = vpop.f32.mrb[13].mxu0  ;;  %v9805_v44 = vpop.f32.mrb[9].mxu1 }
 0x5b0   :  { %v1878_v46 = vpop.f32.mrb[14].mxu0  ;;  %v1996_v47 = vpop.f32.mrb[10].mxu1 }
 0x5b1   :  { %v1881_v49 = vpack.c.bf16 %v1876_v48, %v1876_v48  ;;  %v1999_v14 = vpack.c.bf16 %v1994_v40, %v1994_v40  ;;  %v9790_v51 = vpop.f32.mrb[15].mxu0  ;;  %v9806_v52 = vpop.f32.mrb[11].mxu1  ;;  %v9884_v48 = vld [vmem:[#allocation2 + $0x208] sm:$0xff]  }
 0x5b2   :  { %v9885_v40 = vld [vmem:[#allocation2 + $0x1c8] sm:$0xff]   ;;  %9515 = vmatprep.subr.bf16.mxu0 %v9884_v48  ;;  %v9887_v48 = vld [vmem:[#allocation2 + $0x1d0] sm:$0xff]  }
 0x5b3   :  { %v1889_v53 = vrot.slane %v1881_v49, %v10147_v2  ;;  %v2007_v4 = vrot.slane %v1999_v14, %v10147_v2  ;;  %9516 = vmatpush3.bf16.msra.mxu0 %v9885_v40 }
 0x5b5   :  { %v1890_v54 = vcombine.high %v1889_v53, %v1889_v53  ;;  %v10462_v55 = vrot.slane %v1889_v53, %v10147_v2  ;;  %v2008_v56 = vcombine.high %v2007_v4, %v2007_v4  ;;  %v10465_v57 = vrot.slane %v2007_v4, %v10147_v2 }
 0x5b7   :  { %v10468_v58 = vrot.slane %v1890_v54, %v10147_v2  ;;  %v10471_v59 = vrot.slane %v2008_v56, %v10147_v2  ;;  %v2309_v20 = vcombine.low %v10465_v57, %v10465_v57  ;;  %v2035_v60 = vrot.slane %v10462_v55, %v10147_v2 }
 0x5b8   :  { %v2223_v21 = vrot.slane %v10465_v57, %v10147_v2  ;;  %v2121_v1 = vcombine.low %v10462_v55, %v10462_v55  ;;  %v10492_v5 = vcombine.high %v10462_v55, %v10462_v55  ;;  %v10514_v3 = vcombine.high %v10465_v57, %v10465_v57 }
 0x5b9   :  { %v2316_v29 = vrot.slane %v2309_v20, %v10147_v2  ;;  %v10481_v62 = vrot.slane %v2035_v60, %v10147_v2  ;;  %v2049_v11 = vrot.slane %v10468_v58, %v10147_v2  ;;  %v2237_v9 = vrot.slane %v10471_v59, %v10147_v2 }
 0x5ba   :  { %v10486_v63 = vrot.slane %v2223_v21, %v10147_v2  ;;  %v2128_v15 = vrot.slane %v2121_v1, %v10147_v2  ;;  %v2136_v16 = vcombine.low %v10468_v58, %v10468_v58  ;;  %v2063_v50 = vrot.slane %v10492_v5, %v10147_v2 }
 0x5bb   :  { %v2323_v42 = vrot.slane %v2316_v29, %v10147_v2  ;;  %v2086_v7 = vshll.u32 %v10481_v62, 16  ;;  %v10497_v61 = vrot.slane %v2049_v11, %v10147_v2  ;;  %v10508_v19 = vrot.slane %v2237_v9, %v10147_v2 }
 0x5bc   :  { %v2274_v12 = vshll.u32 %v10486_v63, 16  ;;  %v2135_v13 = vrot.slane %v2128_v15, %v10147_v2  ;;  %v2143_v22 = vrot.slane %v2136_v16, %v10147_v2  ;;  %v2324_v10 = vcombine.low %v10471_v59, %v10471_v59 }
 0x5bd   :  { %2369 = vrot.lane.b32.xlu1 %v2323_v42, %s10027_s28  ;;  %v2089_v18 = vshll.u32 %v10497_v61, 16  ;;  %v2277_v23 = vshll.u32 %v10508_v19, 16  ;;  %v10524_v24 = vrot.slane %v2063_v50, %v10147_v2  ;;  %v2251_v25 = vrot.slane %v10514_v3, %v10147_v2 }
 0x5be   :  { %v9822_v8 = vpack.i.bf16 %v2274_v12, %v2086_v7  ;;  %v10530_v26 = vcombine.high %v10468_v58, %v10468_v58  ;;  %v2150_v27 = vrot.slane %v2143_v22, %v10147_v2  ;;  %v2331_v17 = vrot.slane %v2324_v10, %v10147_v2 }
 0x5bf   :  { %v2092_v28 = vshll.u32 %v10524_v24, 16  ;;  %v10538_v30 = vrot.slane %v2251_v25, %v10147_v2  ;;  %v10544_v32 = vcombine.high %v10471_v59, %v10471_v59  ;;  %v2109_v44 = vshrl.u32 %v10481_v62, 16 }
 0x5c0   :  { %9823 = vrot.lane.b32.xlu0 %v9822_v8, %s10027_s28  ;;  %v2077_v31 = vrot.slane %v10530_v26, %v10147_v2  ;;  %v2338_v33 = vrot.slane %v2331_v17, %v10147_v2  ;;  %v2297_v46 = vshrl.u32 %v10486_v63, 16  ;;  %v2112_v49 = vshrl.u32 %v10497_v61, 16 }
 0x5c1   :  { %2099 = vrot.lane.b32.xlu1 %v2089_v18, %s10027_s28  ;;  %v2280_v34 = vshll.u32 %v10538_v30, 16  ;;  %v2265_v36 = vrot.slane %v10544_v32, %v10147_v2  ;;  %v2111_v53 = vrot.slane %v2109_v44, 7  ;;  %v2300_v11 = vshrl.u32 %v10508_v19, 16 }
 0x5c2   :  { %v10551_v35 = vrot.slane %v2077_v31, %v10147_v2  ;;  %v2299_v4 = vrot.slane %v2297_v46, 7  ;;  %v2114_v62 = vrot.slane %v2112_v49, 7  ;;  %v2115_v19 = vshrl.u32 %v10524_v24, 16 }
 0x5c3   :  { %v10559_v38 = vrot.slane %v2265_v36, %v10147_v2  ;;  %v2302_v15 = vrot.slane %v2300_v11, 7  ;;  %v2303_v10 = vshrl.u32 %v10538_v30, 16 }
 0x5c4   :  { %2181 = vrot.lane.b32.xlu0 %v2135_v13, %s10027_s28  ;;  %v2095_v37 = vshll.u32 %v10551_v35, 16  ;;  %v2117_v36 = vrot.slane %v2115_v19, 7  ;;  %v2118_v44 = vshrl.u32 %v10551_v35, 16 }
 0x5c5   :  { %2287 = vrot.lane.b32.xlu1 %v2277_v23, %s10027_s28  ;;  %v2283_v39 = vshll.u32 %v10559_v38, 16  ;;  %v9927_v23 = vld [vmem:[#allocation2 + $0x2f0] sm:$0xff]  }
 0x5c8   :  { %2183 = vrot.lane.b32.xlu0 %v2150_v27, %s10027_s28 }
 0x5c9   :  { %2101 = vrot.lane.b32.xlu1 %v2092_v28, %s10027_s28 }
 0x5cc   :  { %2371 = vrot.lane.b32.xlu0 %v2338_v33, %s10027_s28  ;;  %v9886_v33 = vld [vmem:[#allocation2 + $0x210] sm:$0xff]  }
 0x5cd   :  { %2289 = vrot.lane.b32.xlu1 %v2280_v34, %s10027_s28  ;;  %9517 = vmatprep.subr.bf16.mxu0 %v9886_v33 }
 0x5ce   :  { %9518 = vmatpush3.bf16.msra.mxu0 %v9887_v48 }
 0x5d0   :  { %2185 = vrot.lane.b32.xlu0 %v10524_v24, %s10027_s28 }
 0x5d1   :  { %2103 = vrot.lane.b32.xlu1 %v2095_v37, %s10027_s28 }
 0x5d4   :  { %2373 = vrot.lane.b32.xlu0 %v10538_v30, %s10027_s28 }
 0x5d5   :  { %2291 = vrot.lane.b32.xlu1 %v2283_v39, %s10027_s28 }
 0x5d8   :  { %2187 = vrot.lane.b32.xlu0 %v10551_v35, %s10027_s28 }
 0x5dc   :  { %2375 = vrot.lane.b32.xlu0 %v10559_v38, %s10027_s28 }
 0x62f   :  { %v2370_v43 = vpop.permute.xlu1 %2369 }
 0x632   :  { %v9824_v47 = vpop.permute.xlu0 %9823 }
 0x633   :  { %v9826_v14 = vunpack.i.h.bf16 %v9824_v47  ;;  %v9825_v51 = vunpack.i.l.bf16 %v9824_v47  ;;  %v2100_v52 = vpop.permute.xlu1 %2099 }
 0x634   :  { %v2194_v60 = vsel %vm10218_vm7, %v10468_v58, %v2100_v52 }
 0x635   :  { %v2381_v54 = vsel %vm10218_vm7, %v10465_v57, %v9826_v14  ;;  %v2193_v56 = vsel %vm10218_vm7, %v10462_v55, %v9825_v51  ;;  %v2203_v7 = vsel %vm599_vm5, %v2194_v60, %v2114_v62 }
 0x636   :  { %v2387_v20 = vsel %vm599_vm5, %v2381_v54, %v2299_v4  ;;  %v2182_v21 = vpop.permute.xlu0 %2181  ;;  %v2199_v29 = vsel %vm599_vm5, %v2193_v56, %v2111_v53  ;;  %v9888_v54 = vld [vmem:[#allocation2 + $0x218] sm:$0xff]  }
 0x637   :  { %v2401_v63 = vsel %vm10264_vm14, %v2387_v20, %v2370_v43  ;;  %v2213_v57 = vsel %vm10264_vm14, %v2199_v29, %v2182_v21  ;;  %v2288_v1 = vpop.permute.xlu1 %2287  ;;  %v2305_v43 = vrot.slane %v2303_v10, 7  ;;  %v9889_v29 = vld [vmem:[#allocation2 + $0x1d8] sm:$0xff]   ;;  %9519 = vmatprep.subr.bf16.mxu0 %v9888_v54 }
 0x638   :  { %v2439_v55 = vshrl.u32 %v2213_v57, 16  ;;  %v2446_v42 = vshrl.u32 %v2401_v63, 16  ;;  %v2442_v61 = vshll.u32 %v2213_v57, 16  ;;  %v2382_v9 = vsel %vm10218_vm7, %v10471_v59, %v2288_v1  ;;  %9520 = vmatpush3.bf16.msra.mxu0 %v9889_v29 }
 0x639   :  { %v2449_v50 = vshll.u32 %v2401_v63, 16  ;;  %v2391_v59 = vsel %vm599_vm5, %v2382_v9, %v2302_v15  ;;  %v2120_v57 = vrot.slane %v2118_v44, 7  ;;  %v9890_v15 = vld [vmem:[#allocation2 + $0x220] sm:$0xff]  }
 0x63a   :  { %v2441_v58 = vrot.slane %v2439_v55, 7  ;;  %v2184_v12 = vpop.permute.xlu0 %2183  ;;  %v2448_v8 = vrot.slane %v2446_v42, 7  ;;  %9521 = vmatprep.subr.bf16.mxu0 %v9890_v15 }
 0x63b   :  { %v2214_v16 = vsel %vm10264_vm14, %v2203_v7, %v2184_v12  ;;  %v2102_v18 = vpop.permute.xlu1 %2101 }
 0x63c   :  { %v2444_v13 = vor.u32 %v2442_v61, %v2441_v58  ;;  %v2453_v22 = vshrl.u32 %v2214_v16, 16  ;;  %v2451_v25 = vor.u32 %v2449_v50, %v2448_v8  ;;  %v2456_v17 = vshll.u32 %v2214_v16, 16  ;;  %v9891_v50 = vld [vmem:[#allocation2 + $0x1e0] sm:$0xff]  }
 0x63d   :  { %v2195_v28 = vsel %vm10218_vm7, %v10492_v5, %v2102_v18  ;;  %9522 = vmatpush3.bf16.msra.mxu0 %v9891_v50 }
 0x63e   :  { %v2455_v27 = vrot.slane %v2453_v22, 7  ;;  %v2372_v24 = vpop.permute.xlu0 %2371  ;;  %v2502_v31 = vsel %vm10218_vm7, 0, %v2444_v13  ;;  %v2503_v37 = vsel %vm10218_vm7, 0, %v2451_v25  ;;  %v2207_v47 = vsel %vm599_vm5, %v2195_v28, %v2117_v36 }
 0x63f   :  { %v2402_v30 = vsel %vm10264_vm14, %v2391_v59, %v2372_v24  ;;  %v2290_v34 = vpop.permute.xlu1 %2289  ;;  %v10616_v39 = vsel %vm10600_vm3, %v2502_v31, 0  ;;  %v10625_v49 = vsel %vm10600_vm3, %v2503_v37, 0  ;;  %v2306_v59 = vshrl.u32 %v10559_v38, 16 }
 0x640   :  { %v2458_v40 = vor.u32 %v2456_v17, %v2455_v27  ;;  %v2460_v5 = vshrl.u32 %v2402_v30, 16  ;;  %v2383_v46 = vsel %vm10218_vm7, %v10514_v3, %v2290_v34  ;;  %v2524_v14 = vshll.u32 %v10616_v39, 16  ;;  %v9892_v34 = vld [vmem:[#allocation2 + $0x228] sm:$0xff]  }
 0x641   :  { %v2463_v52 = vshll.u32 %v2402_v30, 16  ;;  %v2531_v4 = vshll.u32 %v10625_v49, 16  ;;  %v2522_v20 = vshrl.u32 %v10616_v39, 16  ;;  %v2395_v63 = vsel %vm599_vm5, %v2383_v46, %v2305_v43  ;;  %9523 = vmatprep.subr.bf16.mxu0 %v9892_v34 }
 0x642   :  { %v2462_v51 = vrot.slane %v2460_v5, 7  ;;  %v2186_v53 = vpop.permute.xlu0 %2185  ;;  %v2504_v35 = vsel %vm10218_vm7, 0, %v2458_v40  ;;  %v2526_v60 = vrot.slane %v2524_v14, 1  ;;  %v2529_v55 = vshrl.u32 %v10625_v49, 16  ;;  %v9893_v5 = vld [vmem:[#allocation2 + $0x1e8] sm:$0xff]  }
 0x643   :  { %v2215_v3 = vsel %vm10264_vm14, %v2207_v47, %v2186_v53  ;;  %v2104_v56 = vpop.permute.xlu1 %2103  ;;  %v10636_v21 = vsel %vm10600_vm3, %v2504_v35, 0  ;;  %v2533_v42 = vrot.slane %v2531_v4, 1  ;;  %9524 = vmatpush3.bf16.msra.mxu0 %v9893_v5  ;;  %v9894_v35 = vld [vmem:[#allocation2 + $0x230] sm:$0xff]  }
 0x644   :  { %v2465_v62 = vor.u32 %v2463_v52, %v2462_v51  ;;  %v2467_v11 = vshrl.u32 %v2215_v3, 16  ;;  %v2196_v1 = vsel %vm10218_vm7, %v10530_v26, %v2104_v56  ;;  %v2527_v7 = vor.u32 %v2526_v60, %v2522_v20  ;;  %v9895_v60 = vld [vmem:[#allocation2 + $0x1f0] sm:$0xff]   ;;  %9525 = vmatprep.subr.bf16.mxu0 %v9894_v35 }
 0x645   :  { %v2470_v61 = vshll.u32 %v2215_v3, 16  ;;  %v2538_v12 = vshll.u32 %v10636_v21, 16  ;;  %v2534_v18 = vor.u32 %v2533_v42, %v2529_v55  ;;  %v2211_v10 = vsel %vm599_vm5, %v2196_v1, %v2120_v57  ;;  %v9896_v55 = vld [vmem:[#allocation2 + $0x238] sm:$0xff]  }
 0x646   :  { %v2469_v58 = vrot.slane %v2467_v11, 7  ;;  %v2374_v9 = vpop.permute.xlu0 %2373  ;;  %v2505_v8 = vsel %vm10218_vm7, 0, %v2465_v62  ;;  %2577 = vrot.lane.b32.xlu1 %v2527_v7, %s10027_s28  ;;  %v2536_v27 = vshrl.u32 %v10636_v21, 16 }
 0x647   :  { %v2403_v16 = vsel %vm10264_vm14, %v2395_v63, %v2374_v9  ;;  %v2292_v26 = vpop.permute.xlu1 %2291  ;;  %v10651_v19 = vsel %vm10600_vm3, %v2505_v8, 0  ;;  %2579 = vrot.lane.b32.xlu0 %v2534_v18, %s10027_s28  ;;  %v2540_v17 = vrot.slane %v2538_v12, 1  ;;  %9526 = vmatpush3.bf16.msra.mxu0 %v9895_v60 }
 0x648   :  { %v2472_v13 = vor.u32 %v2470_v61, %v2469_v58  ;;  %v2474_v22 = vshrl.u32 %v2403_v16, 16  ;;  %v2477_v25 = vshll.u32 %v2403_v16, 16  ;;  %v2545_v28 = vshll.u32 %v10651_v19, 16  ;;  %v9897_v61 = vld [vmem:[#allocation2 + $0x1f8] sm:$0xff]   ;;  %9527 = vmatprep.subr.bf16.mxu0 %v9896_v55 }
 0x649   :  { %v2384_v31 = vsel %vm10218_vm7, %v10544_v32, %v2292_v26  ;;  %v2543_v30 = vshrl.u32 %v10651_v19, 16  ;;  %v2541_v37 = vor.u32 %v2540_v17, %v2536_v27  ;;  %v2308_v32 = vrot.slane %v2306_v59, 7  ;;  %v9898_v26 = vld [vmem:[#allocation2 + $0x240] sm:$0xff]  }
 0x64a   :  { %v2476_v24 = vrot.slane %v2474_v22, 7  ;;  %v2188_v33 = vpop.permute.xlu0 %2187  ;;  %v2506_v38 = vsel %vm10218_vm7, 0, %v2472_v13  ;;  %v2547_v48 = vrot.slane %v2545_v28, 1  ;;  %v9899_v13 = vld [vmem:[#allocation2 + $0x200] sm:$0xff]  }
 0x64b   :  { %v2216_v36 = vsel %vm10264_vm14, %v2211_v10, %v2188_v33  ;;  %v10668_v40 = vsel %vm10600_vm3, %v2506_v38, 0  ;;  %2581 = vrot.lane.b32.xlu1 %v2541_v37, %s10027_s28  ;;  %v2399_v53 = vsel %vm599_vm5, %v2384_v31, %v2308_v32  ;;  %9528 = vmatpush3.bf16.msra.mxu0 %v9897_v61 }
 0x64c   :  { %v2479_v43 = vor.u32 %v2477_v25, %v2476_v24  ;;  %v2481_v44 = vshrl.u32 %v2216_v36, 16  ;;  %v2548_v46 = vor.u32 %v2547_v48, %v2543_v30  ;;  %v2552_v47 = vshll.u32 %v10668_v40, 16  ;;  %9529 = vmatprep.subr.bf16.mxu0 %v9898_v26 }
 0x64d   :  { %v2484_v51 = vshll.u32 %v2216_v36, 16  ;;  %v2550_v3 = vshrl.u32 %v10668_v40, 16 }
 0x64e   :  { %v2483_v14 = vrot.slane %v2481_v44, 7  ;;  %v2376_v52 = vpop.permute.xlu0 %2375  ;;  %v2507_v4 = vsel %vm10218_vm7, 0, %v2479_v43  ;;  %2583 = vrot.lane.b32.xlu0 %v2548_v46, %s10027_s28  ;;  %v2554_v56 = vrot.slane %v2552_v47, 1 }
 0x64f   :  { %v2404_v54 = vsel %vm10264_vm14, %v2399_v53, %v2376_v52  ;;  %v10681_v20 = vsel %vm10600_vm3, %v2507_v4, 0  ;;  %9530 = vmatpush3.bf16.msra.mxu0 %v9899_v13 }
 0x650   :  { %v2486_v29 = vor.u32 %v2484_v51, %v2483_v14  ;;  %v2488_v62 = vshrl.u32 %v2404_v54, 16  ;;  %v2555_v11 = vor.u32 %v2554_v56, %v2550_v3  ;;  %v2559_v63 = vshll.u32 %v10681_v20, 16 }
 0x651   :  { %v2491_v1 = vshll.u32 %v2404_v54, 16  ;;  %v2557_v42 = vshrl.u32 %v10681_v20, 16 }
 0x652   :  { %v2490_v57 = vrot.slane %v2488_v62, 7  ;;  %v2508_v45 = vsel %vm10218_vm7, 0, %v2486_v29  ;;  %2585 = vrot.lane.b32.xlu1 %v2555_v11, %s10027_s28  ;;  %v2561_v7 = vrot.slane %v2559_v63, 1 }
 0x653   :  { %v10690_v58 = vsel %vm10600_vm3, %v2508_v45, 0 }
 0x654   :  { %v2493_v9 = vor.u32 %v2491_v1, %v2490_v57  ;;  %v2566_v12 = vshll.u32 %v10690_v58, 16  ;;  %v2562_v8 = vor.u32 %v2561_v7, %v2557_v42  ;;  %v2564_v15 = vshrl.u32 %v10690_v58, 16 }
 0x656   :  { %v2568_v16 = vrot.slane %v2566_v12, 1  ;;  %v2509_v18 = vsel %vm10218_vm7, 0, %v2493_v9  ;;  %2587 = vrot.lane.b32.xlu0 %v2562_v8, %s10027_s28 }
 0x657   :  { %v10699_v50 = vsel %vm10600_vm3, %v2509_v18, 0 }
 0x658   :  { %v2569_v22 = vor.u32 %v2568_v16, %v2564_v15  ;;  %v2573_v10 = vshll.u32 %v10699_v50, 16  ;;  %v2571_v59 = vshrl.u32 %v10699_v50, 16 }
 0x65a   :  { %2589 = vrot.lane.b32.xlu1 %v2569_v22, %s10027_s28  ;;  %v2575_v25 = vrot.slane %v2573_v10, 1 }
 0x65c   :  { %v2576_v27 = vor.u32 %v2575_v25, %v2571_v59 }
 0x65e   :  { %2591 = vrot.lane.b32.xlu0 %v2576_v27, %s10027_s28 }
 0x6b8   :  { %v2578_v17 = vpop.permute.xlu1 %2577 }
 0x6b9   :  { %v2594_v28 = vsel %vm656_vm10, %v10616_v39, %v2578_v17  ;;  %v2580_v24 = vpop.permute.xlu0 %2579 }
 0x6ba   :  { %v2617_v31 = vcombine.low %v10375_v41, %v2594_v28  ;;  %v2596_v33 = vsel %vm656_vm10, %v10625_v49, %v2580_v24 }
 0x6bb   :  { %v2641_v38 = vcombine.low %v2594_v28, %v2596_v33 }
 0x6bc   :  { %v2624_v30 = vrot.slane %v2617_v31, %v10147_v2 }
 0x6bd   :  { %v2648_v37 = vrot.slane %v2641_v38, %v10147_v2  ;;  %v2582_v48 = vpop.permute.xlu1 %2581 }
 0x6be   :  { %v2625_v34 = vcombine.high %v2624_v30, %v2624_v30  ;;  %v2632_v36 = vrot.slane %v2624_v30, %v10147_v2  ;;  %v2598_v5 = vsel %vm656_vm10, %v10636_v21, %v2582_v48 }
 0x6bf   :  { %v2649_v44 = vcombine.high %v2648_v37, %v2648_v37  ;;  %v2656_v32 = vrot.slane %v2648_v37, %v10147_v2  ;;  %v2665_v49 = vcombine.low %v2596_v33, %v2598_v5 }
 0x6c0   :  { %v2639_v39 = vrot.slane %v2625_v34, %v10147_v2  ;;  %v2640_v43 = vcombine.high %v2632_v36, %v2632_v36  ;;  %v2584_v46 = vpop.permute.xlu0 %2583 }
 0x6c1   :  { %v2600_v47 = vsel %vm656_vm10, %v10651_v19, %v2584_v46  ;;  %v2663_v14 = vrot.slane %v2649_v44, %v10147_v2  ;;  %v2863_v51 = vunpack.i.h.s16 %v2656_v32  ;;  %v2672_v4 = vrot.slane %v2665_v49, %v10147_v2 }
 0x6c2   :  { %v9219_v52 = vpack.i.b16 %v2656_v32, %v2640_v43  ;;  %v2936_v53 = vcombine.low %v2632_v36, %v2639_v39  ;;  %v2689_v35 = vcombine.low %v2598_v5, %v2600_v47  ;;  %v2713_v21 = vcombine.low %v2600_v47, %v10375_v41 }
 0x6c3   :  { %v2664_v54 = vcombine.high %v2656_v32, %v2656_v32  ;;  %v2865_v3 = vunpack.i.h.s16 %v2663_v14  ;;  %v9220_v56 = vpack.i.b16 %v2663_v14, %v2863_v51  ;;  %v2673_v29 = vcombine.high %v2672_v4, %v2672_v4 }
 0x6c4   :  { %v2586_v60 = vpop.permute.xlu1 %2585  ;;  %v2680_v62 = vrot.slane %v2672_v4, %v10147_v2  ;;  %v2696_v11 = vrot.slane %v2689_v35, %v10147_v2  ;;  %v2720_v19 = vrot.slane %v2713_v21, %v10147_v2  ;;  %v10729_v7 = vrot.slane %v2936_v53, %v10147_v2 }
 0x6c5   :  { %v9221_v63 = vpack.i.b16 %v2664_v54, %v2865_v3  ;;  %v2602_v57 = vsel %vm656_vm10, %v10668_v40, %v2586_v60  ;;  %v2937_v1 = vcombine.low %v9219_v52, %v9220_v56  ;;  %v2687_v61 = vrot.slane %v2673_v29, %v10147_v2 }
 0x6c6   :  { %v2688_v45 = vcombine.high %v2680_v62, %v2680_v62  ;;  %v2697_v55 = vcombine.high %v2696_v11, %v2696_v11  ;;  %v2704_v42 = vrot.slane %v2696_v11, %v10147_v2  ;;  %v2721_v9 = vcombine.high %v2720_v19, %v2720_v19 }
 0x6c7   :  { %v10733_v12 = vrot.slane %v2720_v19, %v10147_v2  ;;  %v2737_v8 = vcombine.low %v10375_v41, %v2602_v57  ;;  %v2938_v16 = vcombine.low %v9221_v63, %v2680_v62  ;;  %v2953_v43 = vrot.slane %v2937_v1, %v10147_v2 }
 0x6c8   :  { %v2588_v15 = vpop.permute.xlu0 %2587  ;;  %v2711_v40 = vrot.slane %v2697_v55, %v10147_v2  ;;  %v2873_v18 = vunpack.i.h.s16 %v2704_v42  ;;  %v9222_v26 = vpack.i.b16 %v2704_v42, %v2688_v45  ;;  %v2712_v13 = vcombine.high %v2704_v42, %v2704_v42 }
 0x6c9   :  { %v10738_v22 = vrot.slane %v2721_v9, %v10147_v2  ;;  %v2744_v10 = vrot.slane %v2737_v8, %v10147_v2  ;;  %v2604_v59 = vsel %vm656_vm10, %v10681_v20, %v2588_v15  ;;  %v2736_v25 = vcombine.high %v10733_v12, %v10733_v12 }
 0x6ca   :  { %v2875_v27 = vunpack.i.h.s16 %v2711_v40  ;;  %v10745_v17 = vpack.i.b16 %v2711_v40, %v2873_v18  ;;  %v2761_v28 = vcombine.low %v2602_v57, %v2604_v59  ;;  %v2939_v38 = vcombine.low %v2687_v61, %v9222_v26 }
 0x6cb   :  { %v2745_v31 = vcombine.high %v2744_v10, %v2744_v10  ;;  %v2752_v33 = vrot.slane %v2744_v10, %v10147_v2  ;;  %v3003_v36 = vcombine.low %v10733_v12, %v10738_v22  ;;  %v2960_v51 = vrot.slane %v2938_v16, %v10147_v2 }
 0x6cc   :  { %v2590_v24 = vpop.permute.xlu1 %2589  ;;  %v9224_v34 = vpack.i.b16 %v2712_v13, %v2875_v27  ;;  %v2768_v20 = vrot.slane %v2761_v28, %v10147_v2  ;;  %v2967_v52 = vrot.slane %v2939_v38, %v10147_v2  ;;  %v2968_v61 = vcombine.low %v10729_v7, %v2953_v43 }
 0x6cd   :  { %v2606_v30 = vsel %vm656_vm10, %v10690_v58, %v2590_v24  ;;  %v2759_v48 = vrot.slane %v2745_v31, %v10147_v2  ;;  %v2760_v5 = vcombine.high %v2752_v33, %v2752_v33  ;;  %v2883_v39 = vunpack.i.h.s16 %v2752_v33 }
 0x6ce   :  { %v2785_v37 = vcombine.low %v2604_v59, %v2606_v30  ;;  %v9225_v44 = vpack.i.b16 %v2752_v33, %v2736_v25  ;;  %v2769_v32 = vcombine.high %v2768_v20, %v2768_v20  ;;  %v2776_v46 = vrot.slane %v2768_v20, %v10147_v2 }
 0x6cf   :  { %v2885_v47 = vunpack.i.h.s16 %v2759_v48  ;;  %v9226_v53 = vpack.i.b16 %v2759_v48, %v2883_v39  ;;  %v2971_v1 = vcombine.high %v2960_v51, %v2967_v52  ;;  %v2970_v26 = vcombine.low %v2960_v51, %v2967_v52 }
 0x6d0   :  { %v2792_v58 = vrot.slane %v2785_v37, %v10147_v2  ;;  %v2592_v49 = vpop.permute.xlu0 %2591  ;;  %v2783_v4 = vrot.slane %v2769_v32, %v10147_v2  ;;  %v2784_v54 = vcombine.high %v2776_v46, %v2776_v46  ;;  %v2978_v59 = vrot.slane %v2968_v61, %v10147_v2 }
 0x6d1   :  { %v2608_v14 = vsel %vm656_vm10, %v10699_v50, %v2592_v49  ;;  %v9227_v3 = vpack.i.b16 %v2760_v5, %v2885_v47  ;;  %v2969_v50 = vcombine.high %v10729_v7, %v2953_v43  ;;  %v2999_v18 = vrot.slane %v2971_v1, %v10147_v2 }
 0x6d2   :  { %v2793_v35 = vcombine.high %v2792_v58, %v2792_v58  ;;  %v2800_v21 = vrot.slane %v2792_v58, %v10147_v2  ;;  %v2809_v56 = vcombine.low %v2606_v30, %v2608_v14  ;;  %v2833_v60 = vcombine.low %v2608_v14, %v10375_v41 }
 0x6d3   :  { %v3005_v45 = vcombine.low %v9227_v3, %v2776_v46  ;;  %v2985_v40 = vrot.slane %v2969_v50, %v10147_v2  ;;  %v2992_v27 = vrot.slane %v2970_v26, %v10147_v2  ;;  %v3002_v28 = vcombine.low %v10745_v17, %v9224_v34 }
 0x6d4   :  { %v2807_v29 = vrot.slane %v2793_v35, %v10147_v2  ;;  %v2808_v62 = vcombine.high %v2800_v21, %v2800_v21  ;;  %v2893_v11 = vunpack.i.h.s16 %v2800_v21  ;;  %v9228_v19 = vpack.i.b16 %v2800_v21, %v2784_v54 }
 0x6d5   :  { %v2816_v63 = vrot.slane %v2809_v56, %v10147_v2  ;;  %v2840_v57 = vrot.slane %v2833_v60, %v10147_v2  ;;  %v3001_v25 = vcombine.low %v2985_v40, %v2999_v18  ;;  %v3004_v30 = vcombine.low %v9225_v44, %v9226_v53  ;;  %v10800_v40 = vld [vmem:[%s12123_s4 + $0x3] ss:$0 sm:$0xff] }
 0x6d6   :  { %v2895_v55 = vunpack.i.h.s16 %v2807_v29  ;;  %v9229_v42 = vpack.i.b16 %v2807_v29, %v2893_v11  ;;  %v3000_v20 = vcombine.low %v2978_v59, %v2992_v27  ;;  %v3012_v37 = vrot.slane %v3002_v28, %v10147_v2 }
 0x6d7   :  { %v2817_v9 = vcombine.high %v2816_v63, %v2816_v63  ;;  %v2824_v12 = vrot.slane %v2816_v63, %v10147_v2  ;;  %v2841_v8 = vcombine.high %v2840_v57, %v2840_v57  ;;  %v2848_v15 = vrot.slane %v2840_v57, %v10147_v2  ;;  %3292 = vmatprep.mubr.bf16.mxu0 %v3001_v25 }
 0x6d8   :  { %v9230_v16 = vpack.i.b16 %v2808_v62, %v2895_v55  ;;  %v3019_v48 = vrot.slane %v3003_v36, %v10147_v2  ;;  %v3026_v5 = vrot.slane %v3004_v30, %v10147_v2  ;;  %v3033_v39 = vrot.slane %v3005_v45, %v10147_v2  ;;  %3293 = vmatmul.mubr.bf16.vlgmr.msra.gmra.mrb[16].mxu0 %v3000_v20 }
 0x6d9   :  { %v2831_v13 = vrot.slane %v2817_v9, %v10147_v2  ;;  %v2832_v22 = vcombine.high %v2824_v12, %v2824_v12  ;;  %v2855_v10 = vrot.slane %v2841_v8, %v10147_v2  ;;  %v2903_v7 = vunpack.i.h.s16 %v2848_v15  ;;  %v9900_v9 = vld [vmem:[#allocation2 + $0x288] sm:$0xff]   ;;  %v9902_v8 = vld [vmem:[#allocation2 + $0x290] sm:$0xff]  }
 0x6da   :  { %v3068_v43 = vcombine.low %v2783_v4, %v9228_v19  ;;  %v3069_v32 = vcombine.low %v9229_v42, %v9230_v16  ;;  %v2856_v46 = vcombine.high %v2848_v15, %v2848_v15  ;;  %v3035_v17 = vcombine.high %v3012_v37, %v3019_v48  ;;  %9555 = vmatprep.subr.bf16.mxu1 %v9900_v9 }
 0x6db   :  { %v2905_v24 = vunpack.i.h.s16 %v2855_v10  ;;  %v9231_v31 = vpack.i.b16 %v2848_v15, %v2832_v22  ;;  %v3070_v33 = vcombine.low %v2824_v12, %v2831_v13  ;;  %v9232_v38 = vpack.i.b16 %v2855_v10, %v2903_v7  ;;  %v9901_v12 = vld [vmem:[#allocation2 + $0x248] sm:$0xff]   ;;  %v9903_v15 = vld [vmem:[#allocation2 + $0x250] sm:$0xff]  }
 0x6dc   :  { %v3034_v34 = vcombine.low %v3012_v37, %v3019_v48  ;;  %v3037_v49 = vcombine.high %v3026_v5, %v3033_v39  ;;  %v3036_v44 = vcombine.low %v3026_v5, %v3033_v39  ;;  %v3078_v47 = vrot.slane %v3068_v43, %v10147_v2  ;;  %9556 = vmatpush3.bf16.msra.mxu1 %v9901_v12  ;;  %v9904_v43 = vld [vmem:[#allocation2 + $0x298] sm:$0xff]  }
 0x6dd   :  { %v3071_v58 = vcombine.low %v9231_v31, %v9232_v38  ;;  %v3085_v14 = vrot.slane %v3069_v32, %v10147_v2  ;;  %v3051_v51 = vrot.slane %v3035_v17, %v10147_v2  ;;  %v3092_v52 = vrot.slane %v3070_v33, %v10147_v2  ;;  %9557 = vmatprep.subr.bf16.mxu1 %v9902_v8  ;;  %v9905_v32 = vld [vmem:[#allocation2 + $0x258] sm:$0xff]  }
 0x6de   :  { %v3044_v36 = vrot.slane %v3034_v34, %v10147_v2  ;;  %v3065_v4 = vrot.slane %v3037_v49, %v10147_v2  ;;  %v3058_v35 = vrot.slane %v3036_v44, %v10147_v2  ;;  %v9233_v54 = vpack.i.b16 %v2856_v46, %v2905_v24 }
 0x6df   :  { %v3099_v53 = vrot.slane %v3071_v58, %v10147_v2  ;;  %v3101_v21 = vcombine.high %v3078_v47, %v3085_v14  ;;  %v3100_v50 = vcombine.low %v3078_v47, %v3085_v14 }
 0x6e0   :  { %v3067_v60 = vcombine.low %v3051_v51, %v3065_v4  ;;  %v3066_v29 = vcombine.low %v3044_v36, %v3058_v35  ;;  %v3140_v19 = vrot.slane %v9233_v54, %v10147_v2  ;;  %9558 = vmatpush3.bf16.msra.mxu1 %v9903_v15 }
 0x6e1   :  { %v3103_v3 = vcombine.high %v3092_v52, %v3099_v53  ;;  %v3102_v56 = vcombine.low %v3092_v52, %v3099_v53  ;;  %v3117_v62 = vrot.slane %v3101_v21, %v10147_v2  ;;  %v3110_v1 = vrot.slane %v3100_v50, %v10147_v2  ;;  %9559 = vmatprep.subr.bf16.mxu1 %v9904_v43 }
 0x6e2   :  { %3300 = vmatprep.mubr.bf16.mxu0 %v3067_v60  ;;  %v3141_v45 = vcombine.high %v3140_v19, %v3140_v19  ;;  %v3148_v61 = vrot.slane %v3140_v19, %v10147_v2  ;;  %v9906_v60 = vld [vmem:[#allocation2 + $0x2a0] sm:$0xff]  }
 0x6e3   :  { %v3131_v11 = vrot.slane %v3103_v3, %v10147_v2  ;;  %3301 = vmatmul.mubr.bf16.gmra.mrb[20].mxu0 %v3066_v29  ;;  %v3124_v57 = vrot.slane %v3102_v56, %v10147_v2  ;;  %v9907_v29 = vld [vmem:[#allocation2 + $0x260] sm:$0xff]  }
 0x6e4   :  { %v3155_v42 = vrot.slane %v3141_v45, %v10147_v2  ;;  %9560 = vmatpush3.bf16.msra.mxu1 %v9905_v32 }
 0x6e5   :  { %v3133_v63 = vcombine.low %v3117_v62, %v3131_v11  ;;  %v3132_v55 = vcombine.low %v3110_v1, %v3124_v57  ;;  %9561 = vmatprep.subr.bf16.mxu1 %v9906_v60 }
 0x6e7   :  { %3308 = vmatprep.mubr.bf16.mxu0 %v3133_v63 }
 0x6e8   :  { %9562 = vmatpush3.bf16.msra.mxu1 %v9907_v29 }
 0x6eb   :  { %3309 = vmatmul.mubr.bf16.gmra.mrb[24].mxu0 %v3132_v55 }
 0x6ec   :  { %3316 = vmatprep.mubr.bf16.mxu0 %v3155_v42 }
 0x6f3   :  { %3317 = vmatmul.mubr.bf16.gmra.mrb[28].mxu0 %v3148_v61 }
 0x7ab   :  { %v9531_v16 = vpop.f32.mrb[16].mxu0 }
 0x7ac   :  { %v9532_v18 = vpop.f32.mrb[17].mxu0 }
 0x7ad   :  { %v9533_v26 = vadd.f32 %v9532_v18, %v9531_v16  ;;  %v9534_v13 = vpop.f32.mrb[18].mxu0 }
 0x7ae   :  { %v9535_v22 = vpop.f32.mrb[19].mxu0 }
 0x7af   :  { %v3295_v10 = vadd.f32 %v9533_v26, %v10800_v40  ;;  %v9536_v59 = vadd.f32 %v9535_v22, %v9534_v13 }
 0x7b1   :  { %v3298_v7 = vadd.f32 %v9536_v59, %v10800_v40  ;;  %v3324_v25 = vmax.f32 %v3295_v10, 0.0 }
 0x7b3   :  { %v3325_v27 = vmax.f32 %v3298_v7, 0.0 }
 0x7b5   :  { %v3331_v31 = vpack.c.bf16 %v3325_v27, %v3324_v25  ;;  %v9250_v33 = vpack.c.bf16 %v3325_v27, %v3325_v27 }
 0x7b6   :  { %v9537_v28 = vpop.f32.mrb[20].mxu0 }
 0x7b7   :  { %v9538_v24 = vpop.f32.mrb[21].mxu0  ;;  %v3346_v37 = vrot.slane %v3331_v31, %v10147_v2  ;;  %v3353_v48 = vrot.slane %v9250_v33, %v10147_v2 }
 0x7b8   :  { %v9539_v30 = vadd.f32 %v9538_v24, %v9537_v28  ;;  %v9540_v38 = vpop.f32.mrb[22].mxu0 }
 0x7b9   :  { %v9541_v20 = vpop.f32.mrb[23].mxu0  ;;  %v3354_v46 = vcombine.high %v3346_v37, %v3346_v37  ;;  %v3355_v17 = vcombine.high %v3353_v48, %v3353_v48  ;;  %v10808_v34 = vrot.slane %v3346_v37, %v10147_v2  ;;  %v10811_v58 = vrot.slane %v3353_v48, %v10147_v2 }
 0x7ba   :  { %v9542_v5 = vadd.f32 %v9541_v20, %v9540_v38  ;;  %v3303_v39 = vadd.f32 %v9539_v30, %v10800_v40 }
 0x7bb   :  { %v10815_v44 = vrot.slane %v3354_v46, %v10147_v2  ;;  %v3501_v14 = vunpack.i.h.s16 %v10808_v34  ;;  %v10819_v51 = vrot.slane %v3355_v17, %v10147_v2  ;;  %v10823_v4 = vcombine.high %v10808_v34, %v10808_v34 }
 0x7bc   :  { %v3306_v49 = vadd.f32 %v9542_v5, %v10800_v40  ;;  %v3326_v36 = vmax.f32 %v3303_v39, 0.0  ;;  %v10832_v56 = vcombine.high %v10811_v58, %v10811_v58 }
 0x7bd   :  { %v10827_v54 = vcombine.high %v10815_v44, %v10815_v44  ;;  %v3503_v3 = vunpack.i.h.s16 %v10815_v44  ;;  %v9261_v19 = vpack.i.b16 %v10815_v44, %v3501_v14  ;;  %v10843_v61 = vcombine.high %v10819_v51, %v10819_v51 }
 0x7be   :  { %v9543_v47 = vpop.f32.mrb[24].mxu0  ;;  %v3327_v52 = vmax.f32 %v3306_v49, 0.0  ;;  %v3511_v9 = vunpack.i.h.s16 %v10819_v51  ;;  %v3513_v16 = vunpack.i.h.s16 %v10832_v56  ;;  %v3505_v33 = vunpack.i.h.s16 %v10823_v4  ;;  %v9908_v49 = vld [vmem:[#allocation2 + $0x2a8] sm:$0xff]  }
 0x7bf   :  { %v9544_v53 = vpop.f32.mrb[25].mxu0  ;;  %v3749_v1 = vcombine.low %v10827_v54, %v10811_v58  ;;  %v9262_v45 = vpack.i.b16 %v10823_v4, %v3503_v3  ;;  %9563 = vmatprep.subr.bf16.mxu1 %v9908_v49 }
 0x7c0   :  { %v9545_v35 = vadd.f32 %v9544_v53, %v9543_v47  ;;  %v9546_v21 = vpop.f32.mrb[26].mxu0  ;;  %v3332_v62 = vpack.c.bf16 %v3327_v52, %v3326_v36  ;;  %v9251_v11 = vpack.c.bf16 %v3327_v52, %v3327_v52  ;;  %v9263_v30 = vpack.i.b16 %v10832_v56, %v3511_v9  ;;  %v9909_v47 = vld [vmem:[#allocation2 + $0x268] sm:$0xff]  }
 0x7c1   :  { %v9547_v50 = vpop.f32.mrb[27].mxu0  ;;  %v3756_v8 = vrot.slane %v3749_v1, %v10147_v2  ;;  %v3734_v15 = vcombine.low %v9261_v19, %v9262_v45  ;;  %v9264_v43 = vpack.i.b16 %v10843_v61, %v3513_v16  ;;  %9564 = vmatpush3.bf16.msra.mxu1 %v9909_v47 }
 0x7c2   :  { %v3311_v63 = vadd.f32 %v9545_v35, %v10800_v40  ;;  %v9548_v57 = vadd.f32 %v9547_v50, %v9546_v21  ;;  %v3395_v55 = vrot.slane %v3332_v62, %v10147_v2  ;;  %v3402_v42 = vrot.slane %v9251_v11, %v10147_v2 }
 0x7c3   :  { %v3763_v25 = vrot.slane %v3756_v8, %v10147_v2  ;;  %v3741_v27 = vrot.slane %v3734_v15, %v10147_v2  ;;  %v3764_v35 = vcombine.low %v9263_v30, %v9264_v43 }
 0x7c4   :  { %v3314_v12 = vadd.f32 %v9548_v57, %v10800_v40  ;;  %v3403_v18 = vcombine.high %v3395_v55, %v3395_v55  ;;  %v3404_v26 = vcombine.high %v3402_v42, %v3402_v42  ;;  %v10850_v13 = vrot.slane %v3402_v42, %v10147_v2 }
 0x7c5   :  { %v3328_v22 = vmax.f32 %v3311_v63, 0.0  ;;  %v10853_v10 = vrot.slane %v3395_v55, %v10147_v2  ;;  %3856 = vrot.lane.b32.xlu0 %v3763_v25, %s10027_s28  ;;  %v3748_v5 = vrot.slane %v3741_v27, %v10147_v2  ;;  %v3771_v19 = vrot.slane %v3764_v35, %v10147_v2  ;;  %v9913_v35 = vld [vmem:[#allocation2 + $0x278] sm:$0xff]  }
 0x7c6   :  { %v3329_v59 = vmax.f32 %v3314_v12, 0.0  ;;  %v9549_v7 = vpop.f32.mrb[28].mxu0  ;;  %v10858_v28 = vrot.slane %v3403_v18, %v10147_v2  ;;  %v10861_v24 = vrot.slane %v3404_v26, %v10147_v2  ;;  %v3434_v46 = vcombine.high %v10850_v13, %v10850_v13 }
 0x7c7   :  { %v9550_v31 = vpop.f32.mrb[29].mxu0  ;;  %3854 = vrot.lane.b32.xlu1 %v3748_v5, %s10027_s28  ;;  %v3433_v53 = vcombine.high %v10853_v10, %v10853_v10  ;;  %v3778_v12 = vrot.slane %v3771_v19, %v10147_v2  ;;  %v9912_v5 = vld [vmem:[#allocation2 + $0x2b8] sm:$0xff]   ;;  %v3515_v19 = vunpack.i.h.s16 %v10843_v61  ;;  %v9915_v61 = vld [vmem:[#allocation2 + $0x280] sm:$0xff]  }
 0x7c8   :  { %v3333_v38 = vpack.c.bf16 %v3329_v59, %v3328_v22  ;;  %v9252_v20 = vpack.c.bf16 %v3329_v59, %v3329_v59  ;;  %v9551_v37 = vadd.f32 %v9550_v31, %v9549_v7  ;;  %v9552_v48 = vpop.f32.mrb[30].mxu0  ;;  %v3779_v32 = vcombine.low %v10853_v10, %v10858_v28 }
 0x7c9   :  { %v9553_v39 = vpop.f32.mrb[31].mxu0  ;;  %v3527_v17 = vunpack.i.h.s16 %v10861_v24  ;;  %v3794_v60 = vcombine.low %v10861_v24, %v3434_v46  ;;  %v3435_v55 = vcombine.high %v10858_v28, %v10858_v28  ;;  %v3521_v42 = vunpack.i.h.s16 %v3433_v53  ;;  %v9911_v48 = vld [vmem:[#allocation2 + $0x270] sm:$0xff]  }
 0x7ca   :  { %v3444_v14 = vrot.slane %v3333_v38, %v10147_v2  ;;  %v3451_v36 = vrot.slane %v9252_v20, %v10147_v2  ;;  %v3319_v52 = vadd.f32 %v9551_v37, %v10800_v40  ;;  %v3786_v21 = vrot.slane %v3779_v32, %v10147_v2  ;;  %v9910_v37 = vld [vmem:[#allocation2 + $0x2b0] sm:$0xff]  }
 0x7cb   :  { %v10880_v3 = vpack.i.b16 %v3434_v46, %v3527_v17  ;;  %v3801_v57 = vrot.slane %v3794_v60, %v10147_v2  ;;  %v10905_v15 = vcombine.high %v10861_v24, %v10861_v24  ;;  %v3523_v16 = vunpack.i.h.s16 %v3435_v55  ;;  %3858 = vrot.lane.b32.xlu1 %v3778_v12, %s10027_s28  ;;  %9565 = vmatprep.subr.bf16.mxu1 %v9910_v37 }
 0x7cc   :  { %v3452_v29 = vcombine.high %v3444_v14, %v3444_v14  ;;  %v3453_v62 = vcombine.high %v3451_v36, %v3451_v36  ;;  %v10884_v11 = vrot.slane %v3444_v14, %v10147_v2  ;;  %v10887_v40 = vrot.slane %v3451_v36, %v10147_v2  ;;  %9566 = vmatpush3.bf16.msra.mxu1 %v9911_v48 }
 0x7cd   :  { %v3330_v50 = vmax.f32 %v3319_v52, 0.0  ;;  %v3793_v63 = vrot.slane %v3786_v21, %v10147_v2  ;;  %v3808_v8 = vrot.slane %v3801_v57, %v10147_v2  ;;  %v9273_v18 = vpack.i.b16 %v3435_v55, %v3521_v42  ;;  %9567 = vmatprep.subr.bf16.mxu1 %v9912_v5 }
 0x7ce   :  { %v10893_v1 = vrot.slane %v3452_v29, %v10147_v2  ;;  %v10896_v45 = vrot.slane %v3453_v62, %v10147_v2  ;;  %v3533_v22 = vunpack.i.h.s16 %v10884_v11  ;;  %v3531_v7 = vunpack.i.h.s16 %v10905_v15 }
 0x7cf   :  { %v3334_v9 = vpack.c.bf16 %v3330_v50, %v3330_v50  ;;  %3860 = vrot.lane.b32.xlu0 %v3793_v63, %s10027_s28  ;;  %v10919_v27 = vcombine.high %v10887_v40, %v10887_v40  ;;  %v9274_v31 = vpack.i.b16 %v10850_v13, %v3523_v16  ;;  %v3541_v20 = vunpack.i.h.s16 %v10887_v40 }
 0x7d0   :  { %v9269_v26 = vcombine.high %v10884_v11, %v10893_v1  ;;  %v10915_v25 = vcombine.high %v10896_v45, %v10896_v45  ;;  %v9266_v38 = vpack.i.b16 %v10893_v1, %v3533_v22  ;;  %v9265_v39 = vpack.i.b16 %v10884_v11, %v3531_v7  ;;  %9568 = vmatpush3.bf16.msra.mxu1 %v9913_v35 }
 0x7d1   :  { %v3492_v59 = vrot.slane %v3334_v9, %v10147_v2  ;;  %v3543_v46 = vunpack.i.h.s16 %v10896_v45  ;;  %v3908_v17 = vcombine.low %v9273_v18, %v9274_v31  ;;  %v9267_v47 = vpack.i.b16 %v10896_v45, %v3541_v20 }
 0x7d2   :  { %v3831_v30 = vrot.slane %v9269_v26, %v10147_v2  ;;  %v3547_v32 = vunpack.i.h.s16 %v10915_v25  ;;  %v3809_v14 = vcombine.low %v9265_v39, %v9266_v38  ;;  %v3507_v60 = vunpack.i.h.s16 %v10827_v54 }
 0x7d3   :  { %3862 = vrot.lane.b32.xlu0 %v3808_v8, %s10027_s28  ;;  %v3499_v43 = vrot.slane %v3492_v59, %v10147_v2  ;;  %v9268_v53 = vpack.i.b16 %v10919_v27, %v3543_v46  ;;  %v3915_v21 = vrot.slane %v3908_v17, %v10147_v2  ;;  %v9253_v29 = vpack.i.b16 %v10827_v54, %v3505_v33 }
 0x7d4   :  { %v3838_v49 = vrot.slane %v3831_v30, %v10147_v2  ;;  %v3598_v62 = vcombine.low %v10808_v34, %v10815_v44  ;;  %v3525_v50 = vunpack.i.h.s16 %v10850_v13  ;;  %v3816_v63 = vrot.slane %v3809_v14, %v10147_v2  ;;  %v9914_v34 = vld [vmem:[#allocation2 + $0x2c0] sm:$0xff]  }
 0x7d5   :  { %v10932_v36 = vpack.i.b16 %v3499_v43, %v3547_v32  ;;  %v3923_v52 = vcombine.low %v10915_v25, %v3499_v43  ;;  %v3922_v55 = vrot.slane %v3915_v21, %v10147_v2  ;;  %v3839_v42 = vcombine.low %v9267_v47, %v9268_v53  ;;  %9569 = vmatprep.subr.bf16.mxu1 %v9914_v34 }
 0x7d6   :  { %v9254_v4 = vpack.i.b16 %v10811_v58, %v3507_v60  ;;  %v3628_v54 = vcombine.low %v10819_v51, %v10832_v56  ;;  %v3517_v13 = vunpack.i.h.s16 %v10853_v10  ;;  %v3823_v33 = vrot.slane %v3816_v63, %v10147_v2  ;;  %9570 = vmatpush3.bf16.msra.mxu1 %v9915_v61 }
 0x7d7   :  { %3866 = vrot.lane.b32.xlu0 %v3838_v49, %s10027_s28  ;;  %v3930_v57 = vrot.slane %v3923_v52, %v10147_v2  ;;  %3938 = vrot.lane.b32.xlu1 %v3922_v55, %s10027_s28  ;;  %v3545_v9 = vunpack.i.h.s16 %v10919_v27  ;;  %v9255_v8 = vpack.i.b16 %v10853_v10, %v3515_v19  ;;  %v9257_v51 = vpack.i.b16 %v10861_v24, %v3525_v50 }
 0x7d8   :  { %v3613_v12 = vcombine.low %v9253_v29, %v9254_v4  ;;  %v9256_v58 = vpack.i.b16 %v10858_v28, %v3517_v13  ;;  %v9272_v56 = vcombine.high %v10853_v10, %v10858_v28  ;;  %v3846_v16 = vrot.slane %v3839_v42, %v10147_v2 }
 0x7d9   :  { %v3937_v44 = vrot.slane %v3930_v57, %v10147_v2  ;;  %v3482_v18 = vcombine.high %v10884_v11, %v10884_v11  ;;  %v3484_v26 = vcombine.high %v10893_v1, %v10893_v1  ;;  %v3658_v59 = vcombine.low %v9257_v51, %v10880_v3 }
 0x7da   :  { %v3643_v22 = vcombine.low %v9255_v8, %v9256_v58  ;;  %v3535_v7 = vunpack.i.h.s16 %v10893_v1  ;;  %v3673_v10 = vcombine.low %v10905_v15, %v10884_v11  ;;  %v9270_v28 = vpack.i.b16 %v10915_v25, %v3545_v9 }
 0x7db   :  { %3940 = vrot.lane.b32.xlu0 %v3937_v44, %s10027_s28  ;;  %3864 = vrot.lane.b32.xlu1 %v3823_v33, %s10027_s28  ;;  %v3537_v24 = vunpack.i.h.s16 %v3482_v18  ;;  %v3853_v31 = vrot.slane %v3846_v16, %v10147_v2  ;;  %v3703_v3 = vcombine.low %v10887_v40, %v10896_v45  ;;  %v3620_v20 = vrot.slane %v3613_v12, %v10147_v2 }
 0x7dc   :  { %v9259_v27 = vpack.i.b16 %v3482_v18, %v3535_v7  ;;  %v3889_v38 = vcombine.low %v9270_v28, %v10932_v36  ;;  %v3605_v37 = vrot.slane %v3598_v62, %v10147_v2  ;;  %v10039_v25 = vmov 1983009808  }
 0x7dd   :  { %v9260_v30 = vpack.i.b16 %v3484_v26, %v3537_v24  ;;  %v3627_v11 = vrot.slane %v3620_v20, %v10147_v2  ;;  %v3984_v5 = vunpack.c.l.s4 %v10039_v25  ;;  %v3650_v43 = vrot.slane %v3643_v22, %v10147_v2 }
 0x7de   :  { %v3612_v15 = vrot.slane %v3605_v37, %v10147_v2  ;;  %v3635_v46 = vrot.slane %v3628_v54, %v10147_v2  ;;  %v3881_v50 = vrot.slane %v9272_v56, %v10147_v2  ;;  %v3665_v57 = vrot.slane %v3658_v59, %v10147_v2 }
 0x7df   :  { %3868 = vrot.lane.b32.xlu1 %v3853_v31, %s10027_s28  ;;  %v3688_v1 = vcombine.low %v9259_v27, %v9260_v30  ;;  %v3985_v17 = vunpack.c.0.s8 %v3984_v5  ;;  %v3657_v49 = vrot.slane %v3650_v43, %v10147_v2  ;;  %v3680_v42 = vrot.slane %v3673_v10, %v10147_v2 }
 0x7e0   :  { %v3642_v14 = vrot.slane %v3635_v46, %v10147_v2  ;;  %v3888_v55 = vrot.slane %v3881_v50, %v10147_v2  ;;  %v3672_v44 = vrot.slane %v3665_v57, %v10147_v2  ;;  %v3896_v9 = vrot.slane %v3889_v38, %v10147_v2  ;;  %v9916_v46 = vld [vmem:[#allocation2 + $0x308] sm:$0xff]  }
 0x7e1   :  { %v10991_v52 = vsub.s32 %v3985_v17, %v10142_v0  ;;  %v3695_v0 = vrot.slane %v3688_v1, %v10147_v2  ;;  %v3687_v33 = vrot.slane %v3680_v42, %v10147_v2  ;;  %v3710_v12 = vrot.slane %v3703_v3, %v10147_v2  ;;  %v9917_v17 = vld [vmem:[#allocation2 + $0x2c8] sm:$0xff]   ;;  %9583 = vmatprep.subr.bf16.mxu0 %v9916_v46 }
 0x7e2   :  { %v3903_v24 = vrot.slane %v3896_v9, %v10147_v2  ;;  %9584 = vmatpush3.bf16.msra.mxu0 %v9917_v17 }
 0x7e3   :  { %v3702_v61 = vrot.slane %v3695_v0, %v10147_v2  ;;  %v3717_v10 = vrot.slane %v3710_v12, %v10147_v2 }
 0x837   :  { %v3857_v48 = vpop.permute.xlu0 %3856 }
 0x838   :  { %v3947_v32 = vsel %vm656_vm10, %v3627_v11, %v3857_v48 }
 0x839   :  { %v3855_v39 = vpop.permute.xlu1 %3854 }
 0x83a   :  { %v3944_v40 = vsel %vm656_vm10, %v3612_v15, %v3855_v39 }
 0x83b   :  { %v3982_v45 = vcombine.low %v3944_v40, %v3947_v32 }
 0x83d   :  { %v3859_v53 = vpop.permute.xlu1 %3858  ;;  %v3989_v29 = vrot.slane %v3982_v45, %v10991_v52 }
 0x83e   :  { %v3950_v35 = vsel %vm656_vm10, %v3642_v14, %v3859_v53 }
 0x83f   :  { %v3990_v21 = vcombine.low %v3947_v32, %v3950_v35 }
 0x841   :  { %v3861_v47 = vpop.permute.xlu0 %3860  ;;  %v3997_v62 = vrot.slane %v3990_v21, %v10991_v52 }
 0x842   :  { %v3953_v36 = vsel %vm656_vm10, %v3657_v49, %v3861_v47  ;;  %v9918_v49 = vld [vmem:[#allocation2 + $0x310] sm:$0xff]  }
 0x843   :  { %v3998_v60 = vcombine.low %v3950_v35, %v3953_v36  ;;  %v4046_v63 = vcombine.low %v3989_v29, %v3997_v62  ;;  %v9919_v47 = vld [vmem:[#allocation2 + $0x2d0] sm:$0xff]   ;;  %9585 = vmatprep.subr.bf16.mxu0 %v9918_v49 }
 0x844   :  { %9586 = vmatpush3.bf16.msra.mxu0 %v9919_v47 }
 0x845   :  { %v3863_v19 = vpop.permute.xlu0 %3862  ;;  %v4005_v8 = vrot.slane %v3998_v60, %v10991_v52  ;;  %v4054_v30 = vrot.slane %v4046_v63, %v10991_v52 }
 0x846   :  { %v3956_v56 = vsel %vm656_vm10, %v3672_v44, %v3863_v19 }
 0x849   :  { %v3939_v4 = vpop.permute.xlu1 %3938  ;;  %v3867_v54 = vpop.permute.xlu0 %3866 }
 0x84a   :  { %v3968_v34 = vsel %vm656_vm10, %v3888_v55, %v3939_v4  ;;  %v3962_v16 = vsel %vm656_vm10, %v3702_v61, %v3867_v54 }
 0x84b   :  { %v4006_v13 = vcombine.low %v3953_v36, %v3968_v34 }
 0x84d   :  { %v4013_v58 = vrot.slane %v4006_v13, %v10991_v52  ;;  %v3865_v51 = vpop.permute.xlu1 %3864  ;;  %v3941_v7 = vpop.permute.xlu0 %3940 }
 0x84e   :  { %v3959_v18 = vsel %vm656_vm10, %v3687_v33, %v3865_v51  ;;  %v3971_v3 = vsel %vm656_vm10, %v3903_v24, %v3941_v7 }
 0x84f   :  { %v4047_v26 = vcombine.low %v4005_v8, %v4013_v58  ;;  %v4014_v22 = vcombine.low %v3956_v56, %v3959_v18  ;;  %v4022_v59 = vcombine.low %v3959_v18, %v3962_v16 }
 0x851   :  { %v4021_v28 = vrot.slane %v4014_v22, %v10991_v52  ;;  %v4029_v27 = vrot.slane %v4022_v59, %v10991_v52  ;;  %v3869_v31 = vpop.permute.xlu1 %3868  ;;  %v4061_v38 = vrot.slane %v4047_v26, %v10991_v52 }
 0x852   :  { %v3965_v1 = vsel %vm656_vm10, %v3717_v10, %v3869_v31 }
 0x853   :  { %v4064_v20 = vcombine.low %v4021_v28, %v4029_v27  ;;  %v4030_v37 = vcombine.low %v3962_v16, %v3965_v1  ;;  %v4038_v48 = vcombine.low %v3965_v1, %v3971_v3  ;;  %v4063_v11 = vcombine.high %v4054_v30, %v4061_v38 }
 0x854   :  { %v4062_v15 = vcombine.low %v4054_v30, %v4061_v38 }
 0x855   :  { %v4037_v25 = vrot.slane %v4030_v37, %v10991_v52  ;;  %v4045_v5 = vrot.slane %v4038_v48, %v10991_v52  ;;  %4214 = vmatprep.mubr.bf16.mxu1 %v4063_v11  ;;  %v4072_v43 = vrot.slane %v4064_v20, %v10991_v52 }
 0x856   :  { %4215 = vmatmul.mubr.bf16.vlgmr.msra.gmra.mrb[12].mxu1 %v4062_v15 }
 0x857   :  { %v4065_v39 = vcombine.low %v4037_v25, %v4045_v5 }
 0x859   :  { %v4079_v32 = vrot.slane %v4065_v39, %v10991_v52 }
 0x85b   :  { %v4081_v40 = vcombine.high %v4072_v43, %v4079_v32  ;;  %v4080_v45 = vcombine.low %v4072_v43, %v4079_v32 }
 0x85d   :  { %4222 = vmatprep.mubr.bf16.mxu1 %v4081_v40 }
 0x85e   :  { %4223 = vmatmul.mubr.bf16.gmra.mrb[16].mxu1 %v4080_v45 }
 0x929   :  { %v9571_v14 = vpop.f32.mrb[12].mxu1 }
 0x92a   :  { %v9572_v36 = vpop.f32.mrb[13].mxu1 }
 0x92b   :  { %v9573_v53 = vadd.f32 %v9572_v36, %v9571_v14  ;;  %v9574_v35 = vpop.f32.mrb[14].mxu1 }
 0x92c   :  { %v9575_v21 = vpop.f32.mrb[15].mxu1 }
 0x92d   :  { %v4246_v60 = vmul.f32 %v9573_v53, %v9573_v53  ;;  %v9576_v29 = vadd.f32 %v9575_v21, %v9574_v35  ;;  %v4231_v62 = vsel %vm656_vm10, %v9573_v53, 0.0 }
 0x92f   :  { %v4232_v50 = vsel %vm656_vm10, %v9576_v29, 0.0  ;;  %v4247_v19 = vmul.f32 %v9576_v29, %v9576_v29  ;;  %v4250_v57 = vsel %vm656_vm10, %v4246_v60, 0.0 }
 0x930   :  { %v4233_v63 = vadd.f32 %v4232_v50, %v4231_v62 }
 0x931   :  { %v4251_v55 = vsel %vm656_vm10, %v4247_v19, 0.0  ;;  %v9577_v0 = vpop.f32.mrb[16].mxu1 }
 0x932   :  { %v4252_v42 = vadd.f32 %v4251_v55, %v4250_v57  ;;  %v9578_v4 = vpop.f32.mrb[17].mxu1 }
 0x933   :  { %v9579_v54 = vadd.f32 %v9578_v4, %v9577_v0  ;;  %v9580_v34 = vpop.f32.mrb[18].mxu1 }
 0x934   :  { %v9581_v44 = vpop.f32.mrb[19].mxu1 }
 0x935   :  { %v4234_v13 = vsel %vm656_vm10, %v9579_v54, 0.0  ;;  %v4248_v61 = vmul.f32 %v9579_v54, %v9579_v54  ;;  %v9582_v33 = vadd.f32 %v9581_v44, %v9580_v34 }
 0x936   :  { %v4235_v9 = vadd.f32 %v4234_v13, %v4233_v63 }
 0x937   :  { %v4253_v12 = vsel %vm656_vm10, %v4248_v61, 0.0  ;;  %v4236_v8 = vsel %vm656_vm10, %v9582_v33, 0.0  ;;  %v4249_v58 = vmul.f32 %v9582_v33, %v9582_v33 }
 0x938   :  { %v4254_v51 = vadd.f32 %v4253_v12, %v4252_v42  ;;  %v4237_v56 = vadd.f32 %v4236_v8, %v4235_v9 }
 0x939   :  { %v4255_v16 = vsel %vm656_vm10, %v4249_v58, 0.0 }
 0x93a   :  { %v4238_v18 = vrot.slane %v4237_v56, 4  ;;  %v4256_v26 = vadd.f32 %v4255_v16, %v4254_v51 }
 0x93c   :  { %v4239_v22 = vadd.f32 %v4238_v18, %v4237_v56  ;;  %v4257_v59 = vrot.slane %v4256_v26, 4 }
 0x93e   :  { %v4240_v7 = vrot.slane %v4239_v22, 2  ;;  %v4258_v24 = vadd.f32 %v4257_v59, %v4256_v26 }
 0x940   :  { %v4241_v10 = vadd.f32 %v4240_v7, %v4239_v22  ;;  %v4259_v28 = vrot.slane %v4258_v24, 2 }
 0x942   :  { %v4242_v27 = vrot.slane %v4241_v10, 1  ;;  %v4260_v31 = vadd.f32 %v4259_v28, %v4258_v24 }
 0x944   :  { %v4243_v30 = vadd.f32 %v4242_v27, %v4241_v10  ;;  %v4261_v38 = vrot.slane %v4260_v31, 1 }
 0x946   :  { %v4245_v3 = vmul.f32 0.03125, %v4243_v30  ;;  %v4262_v1 = vadd.f32 %v4261_v38, %v4260_v31 }
 0x948   :  { %v4263_v20 = vmul.f32 0.03125, %v4262_v1  ;;  %v4264_v37 = vmul.f32 %v4245_v3, %v4245_v3  ;;  %v4269_v48 = vsub.f32 %v9579_v54, %v4245_v3  ;;  %v4270_v11 = vsub.f32 %v9582_v33, %v4245_v3 }
 0x949   :  { %v4267_v15 = vsub.f32 %v9573_v53, %v4245_v3  ;;  %v4268_v25 = vsub.f32 %v9576_v29, %v4245_v3 }
 0x94a   :  { %v4265_v5 = vsub.f32 %v4263_v20, %v4264_v37 }
 0x94c   :  { %v4266_v39 = vmax.f32 %v4265_v5, 0.0 }
 0x94e   :  { %v4271_v43 = vadd.f32 1e-05, %v4266_v39 }
 0x950   :  { %9982 = vrsqrt.f32 %v4271_v43 }
 0x95a   :  { %v9983_v32 = vpop.eup %9982 }
 0x95b   :  { %v4275_v40 = vmul.f32 %v9983_v32, %v4269_v48  ;;  %v4276_v45 = vmul.f32 %v9983_v32, %v4270_v11  ;;  %v4273_v46 = vmul.f32 %v9983_v32, %v4267_v15  ;;  %v4274_v17 = vmul.f32 %v9983_v32, %v4268_v25 }
 0x95d   :  { %v4279_v49 = vmax.f32 %v4275_v40, 0.0  ;;  %v4280_v47 = vmax.f32 %v4276_v45, 0.0  ;;  %v4277_v14 = vmax.f32 %v4273_v46, 0.0  ;;  %v4278_v36 = vmax.f32 %v4274_v17, 0.0 }
 0x95f   :  { %v4282_v35 = vpack.c.bf16 %v4280_v47, %v4279_v49  ;;  %v9292_v21 = vpack.c.bf16 %v4280_v47, %v4280_v47  ;;  %v4281_v60 = vpack.c.bf16 %v4278_v36, %v4277_v14  ;;  %v9291_v62 = vpack.c.bf16 %v4278_v36, %v4278_v36  ;;  %v9920_v47 = vld [vmem:[#allocation2 + $0x318] sm:$0xff]  }
 0x960   :  { %9587 = vmatprep.subr.bf16.mxu0 %v9920_v47 }
 0x961   :  { %v4309_v53 = vrot.slane %v4282_v35, %v10991_v52  ;;  %v11034_v29 = vrot.slane %v9292_v21, %v10991_v52  ;;  %v4292_v50 = vrot.slane %v4281_v60, %v10991_v52  ;;  %v4299_v19 = vrot.slane %v9291_v62, %v10991_v52 }
 0x963   :  { %v4317_v63 = vcombine.high %v4309_v53, %v4309_v53  ;;  %v4358_v57 = vrot.slane %v4292_v50, %v10991_v52  ;;  %v4300_v55 = vcombine.high %v4292_v50, %v4292_v50  ;;  %v4372_v0 = vrot.slane %v4299_v19, %v10991_v52  ;;  %v9921_v50 = vld [vmem:[#allocation2 + $0x2d8] sm:$0xff]  }
 0x964   :  { %v4301_v42 = vcombine.high %v4299_v19, %v4299_v19  ;;  %v4386_v4 = vrot.slane %v4309_v53, %v10991_v52  ;;  %v11044_v44 = vrot.slane %v11034_v29, %v10991_v52  ;;  %v4318_v30 = vcombine.high %v11034_v29, %v11034_v29  ;;  %9588 = vmatpush3.bf16.msra.mxu0 %v9921_v50 }
 0x965   :  { %v4409_v54 = vshrl.u32 %v4358_v57, 16  ;;  %v4365_v34 = vrot.slane %v4300_v55, %v10991_v52  ;;  %v4423_v13 = vshrl.u32 %v4372_v0, 16  ;;  %v4393_v9 = vrot.slane %v4317_v63, %v10991_v52 }
 0x966   :  { %v4379_v61 = vrot.slane %v4301_v42, %v10991_v52  ;;  %v4437_v33 = vshrl.u32 %v4386_v4, 16  ;;  %v4412_v8 = vshll.u32 %v4358_v57, 16  ;;  %v4426_v51 = vshll.u32 %v4372_v0, 16 }
 0x967   :  { %v4411_v12 = vrot.slane %v4409_v54, 7  ;;  %v4416_v58 = vshrl.u32 %v4365_v34, 16  ;;  %v4425_v56 = vrot.slane %v4423_v13, 7  ;;  %v4440_v26 = vshll.u32 %v4386_v4, 16 }
 0x968   :  { %v4430_v16 = vshrl.u32 %v4379_v61, 16  ;;  %v4439_v18 = vrot.slane %v4437_v33, 7  ;;  %v4419_v7 = vshll.u32 %v4365_v34, 16  ;;  %v4433_v24 = vshll.u32 %v4379_v61, 16 }
 0x969   :  { %v4414_v22 = vor.u32 %v4412_v8, %v4411_v12  ;;  %v4418_v59 = vrot.slane %v4416_v58, 7  ;;  %v4428_v10 = vor.u32 %v4426_v51, %v4425_v56  ;;  %v4444_v31 = vshrl.u32 %v4393_v9, 16  ;;  %v9922_v12 = vld [vmem:[#allocation2 + $0x320] sm:$0xff]  }
 0x96a   :  { %v4432_v28 = vrot.slane %v4430_v16, 7  ;;  %v4442_v27 = vor.u32 %v4440_v26, %v4439_v18  ;;  %v4451_v48 = vshrl.u32 %v11044_v44, 16  ;;  %v4447_v21 = vshll.u32 %v4393_v9, 16  ;;  %9589 = vmatprep.subr.bf16.mxu0 %v9922_v12 }
 0x96b   :  { %v4472_v38 = vsel %vm10218_vm7, 0, %v4414_v22  ;;  %v4421_v3 = vor.u32 %v4419_v7, %v4418_v59  ;;  %v4474_v20 = vsel %vm10218_vm7, 0, %v4428_v10  ;;  %v4446_v40 = vrot.slane %v4444_v31, 7  ;;  %v9923_v7 = vld [vmem:[#allocation2 + $0x2e0] sm:$0xff]   ;;  %v9924_v31 = vld [vmem:[#allocation2 + $0x328] sm:$0xff]  }
 0x96c   :  { %v11054_v1 = vsel %vm10600_vm3, %v4472_v38, 0  ;;  %v4435_v37 = vor.u32 %v4433_v24, %v4432_v28  ;;  %v11064_v25 = vsel %vm10600_vm3, %v4474_v20, 0  ;;  %v4476_v5 = vsel %vm10218_vm7, 0, %v4442_v27  ;;  %9590 = vmatpush3.bf16.msra.mxu0 %v9923_v7 }
 0x96d   :  { %v4491_v11 = vshll.u32 %v11054_v1, 16  ;;  %v4473_v15 = vsel %vm10218_vm7, 0, %v4421_v3  ;;  %v4505_v43 = vshll.u32 %v11064_v25, 16  ;;  %v4489_v45 = vshrl.u32 %v11054_v1, 16  ;;  %9591 = vmatprep.subr.bf16.mxu0 %v9924_v31 }
 0x96e   :  { %v11070_v39 = vsel %vm10600_vm3, %v4473_v15, 0  ;;  %v4475_v32 = vsel %vm10218_vm7, 0, %v4435_v37  ;;  %v11085_v35 = vsel %vm10600_vm3, %v4476_v5, 0  ;;  %v4449_v19 = vor.u32 %v4447_v21, %v4446_v40  ;;  %v9928_v40 = vld [vmem:[#allocation2 + $0x338] sm:$0xff]  }
 0x96f   :  { %v4493_v46 = vrot.slane %v4491_v11, 1  ;;  %v4498_v17 = vshll.u32 %v11070_v39, 16  ;;  %v11079_v49 = vsel %vm10600_vm3, %v4475_v32, 0  ;;  %v4496_v14 = vshrl.u32 %v11070_v39, 16  ;;  %v9925_v11 = vld [vmem:[#allocation2 + $0x2e8] sm:$0xff]   ;;  %v9926_v32 = vld [vmem:[#allocation2 + $0x330] sm:$0xff]  }
 0x970   :  { %v4512_v36 = vshll.u32 %v11079_v49, 16  ;;  %v4507_v53 = vrot.slane %v4505_v43, 1  ;;  %v4519_v29 = vshll.u32 %v11085_v35, 16  ;;  %v4453_v63 = vrot.slane %v4451_v48, 7  ;;  %9592 = vmatpush3.bf16.msra.mxu0 %v9925_v11 }
 0x971   :  { %v4494_v60 = vor.u32 %v4493_v46, %v4489_v45  ;;  %v4500_v62 = vrot.slane %v4498_v17, 1  ;;  %v4454_v57 = vshll.u32 %v11044_v44, 16  ;;  %v4503_v0 = vshrl.u32 %v11064_v25, 16  ;;  %9593 = vmatprep.subr.bf16.mxu0 %v9926_v32  ;;  %v9929_v45 = vld [vmem:[#allocation2 + $0x2f8] sm:$0xff]   ;;  %v9930_v46 = vld [vmem:[#allocation2 + $0x340] sm:$0xff]  }
 0x972   :  { %v4514_v42 = vrot.slane %v4512_v36, 1  ;;  %v4407_v4 = vrot.slane %v4318_v30, %v10991_v52  ;;  %v4510_v54 = vshrl.u32 %v11079_v49, 16  ;;  %v4477_v34 = vsel %vm10218_vm7, 0, %v4449_v19  ;;  %v9931_v17 = vld [vmem:[#allocation2 + $0x300] sm:$0xff]  }
 0x973   :  { %4544 = vrot.lane.b32.xlu1 %v4494_v60, %s10027_s28  ;;  %v4501_v55 = vor.u32 %v4500_v62, %v4496_v14  ;;  %v4456_v13 = vor.u32 %v4454_v57, %v4453_v63  ;;  %v4508_v61 = vor.u32 %v4507_v53, %v4503_v0  ;;  %v4521_v33 = vrot.slane %v4519_v29, 1 }
 0x974   :  { %v11098_v44 = vsel %vm10600_vm3, %v4477_v34, 0  ;;  %v4458_v9 = vshrl.u32 %v4407_v4, 16  ;;  %v4517_v8 = vshrl.u32 %v11085_v35, 16  ;;  %v4515_v56 = vor.u32 %v4514_v42, %v4510_v54  ;;  %9594 = vmatpush3.bf16.msra.mxu0 %v9927_v23 }
 0x975   :  { %4546 = vrot.lane.b32.xlu0 %v4501_v55, %s10027_s28  ;;  %v4526_v58 = vshll.u32 %v11098_v44, 16  ;;  %v4478_v51 = vsel %vm10218_vm7, 0, %v4456_v13  ;;  %v4461_v26 = vshll.u32 %v4407_v4, 16  ;;  %v4524_v10 = vshrl.u32 %v11098_v44, 16  ;;  %9595 = vmatprep.subr.bf16.mxu0 %v9928_v40 }
 0x976   :  { %v11107_v16 = vsel %vm10600_vm3, %v4478_v51, 0  ;;  %v4460_v18 = vrot.slane %v4458_v9, 7  ;;  %v4522_v24 = vor.u32 %v4521_v33, %v4517_v8 }
 0x977   :  { %4548 = vrot.lane.b32.xlu1 %v4508_v61, %s10027_s28  ;;  %v4528_v22 = vrot.slane %v4526_v58, 1  ;;  %v4533_v59 = vshll.u32 %v11107_v16, 16  ;;  %v4531_v38 = vshrl.u32 %v11107_v16, 16 }
 0x978   :  { %v4463_v28 = vor.u32 %v4461_v26, %v4460_v18  ;;  %9596 = vmatpush3.bf16.msra.mxu0 %v9929_v45 }
 0x979   :  { %4550 = vrot.lane.b32.xlu0 %v4515_v56, %s10027_s28  ;;  %v4535_v27 = vrot.slane %v4533_v59, 1  ;;  %v4529_v30 = vor.u32 %v4528_v22, %v4524_v10  ;;  %9597 = vmatprep.subr.bf16.mxu0 %v9930_v46 }
 0x97a   :  { %v4479_v3 = vsel %vm10218_vm7, 0, %v4463_v28 }
 0x97b   :  { %4552 = vrot.lane.b32.xlu1 %v4522_v24, %s10027_s28  ;;  %v11118_v20 = vsel %vm10600_vm3, %v4479_v3, 0  ;;  %v4536_v37 = vor.u32 %v4535_v27, %v4531_v38 }
 0x97c   :  { %v4540_v48 = vshll.u32 %v11118_v20, 16  ;;  %v4538_v15 = vshrl.u32 %v11118_v20, 16  ;;  %9598 = vmatpush3.bf16.msra.mxu0 %v9931_v17 }
 0x97d   :  { %4554 = vrot.lane.b32.xlu0 %v4529_v30, %s10027_s28 }
 0x97e   :  { %v4542_v5 = vrot.slane %v4540_v48, 1 }
 0x97f   :  { %4556 = vrot.lane.b32.xlu1 %v4536_v37, %s10027_s28 }
 0x980   :  { %v4543_v43 = vor.u32 %v4542_v5, %v4538_v15 }
 0x982   :  { %4558 = vrot.lane.b32.xlu0 %v4543_v43, %s10027_s28 }
 0x9e5   :  { %v4545_v47 = vpop.permute.xlu1 %4544 }
 0x9e6   :  { %v4561_v14 = vsel %vm656_vm10, %v11054_v1, %v4545_v47 }
 0x9e7   :  { %v4584_v36 = vcombine.low %v10375_v41, %v4561_v14  ;;  %v4547_v21 = vpop.permute.xlu0 %4546 }
 0x9e8   :  { %v4563_v60 = vsel %vm656_vm10, %v11070_v39, %v4547_v21 }
 0x9e9   :  { %v4591_v62 = vrot.slane %v4584_v36, %v10147_v2  ;;  %v4608_v53 = vcombine.low %v4561_v14, %v4563_v60  ;;  %v4549_v29 = vpop.permute.xlu1 %4548 }
 0x9ea   :  { %v4565_v50 = vsel %vm656_vm10, %v11064_v25, %v4549_v29 }
 0x9eb   :  { %v4592_v19 = vcombine.high %v4591_v62, %v4591_v62  ;;  %v11134_v63 = vrot.slane %v4591_v62, %v10147_v2  ;;  %v4615_v57 = vrot.slane %v4608_v53, %v10147_v2  ;;  %v4632_v1 = vcombine.low %v4563_v60, %v4565_v50  ;;  %v4551_v55 = vpop.permute.xlu0 %4550 }
 0x9ec   :  { %v4567_v0 = vsel %vm656_vm10, %v11079_v49, %v4551_v55 }
 0x9ed   :  { %v11140_v39 = vrot.slane %v4592_v19, %v10147_v2  ;;  %v4607_v42 = vcombine.high %v11134_v63, %v11134_v63  ;;  %v4616_v4 = vcombine.high %v4615_v57, %v4615_v57  ;;  %v4623_v25 = vrot.slane %v4615_v57, %v10147_v2  ;;  %v4553_v54 = vpop.permute.xlu1 %4552 }
 0x9ee   :  { %v4639_v34 = vrot.slane %v4632_v1, %v10147_v2  ;;  %v4656_v13 = vcombine.low %v4565_v50, %v4567_v0  ;;  %v4680_v61 = vcombine.low %v4567_v0, %v10375_v41  ;;  %v4569_v33 = vsel %vm656_vm10, %v11085_v35, %v4553_v54 }
 0x9ef   :  { %v4903_v49 = vcombine.low %v11134_v63, %v11140_v39  ;;  %v4630_v9 = vrot.slane %v4616_v4, %v10147_v2  ;;  %v4830_v12 = vunpack.i.h.s16 %v4623_v25  ;;  %v4555_v56 = vpop.permute.xlu0 %4554  ;;  %v4631_v18 = vcombine.high %v4623_v25, %v4623_v25 }
 0x9f0   :  { %v4640_v8 = vcombine.high %v4639_v34, %v4639_v34  ;;  %v11153_v58 = vrot.slane %v4639_v34, %v10147_v2  ;;  %v4663_v51 = vrot.slane %v4656_v13, %v10147_v2  ;;  %v4687_v22 = vrot.slane %v4680_v61, %v10147_v2 }
 0x9f1   :  { %v4832_v26 = vunpack.i.h.s16 %v4630_v9  ;;  %v4704_v59 = vcombine.low %v10375_v41, %v4569_v33  ;;  %v9294_v35 = vpack.i.b16 %v4623_v25, %v4607_v42  ;;  %v9295_v38 = vpack.i.b16 %v4630_v9, %v4830_v12  ;;  %v4557_v11 = vpop.permute.xlu1 %4556 }
 0x9f2   :  { %v4655_v7 = vcombine.high %v11153_v58, %v11153_v58  ;;  %v4664_v24 = vcombine.high %v4663_v51, %v4663_v51  ;;  %v4671_v10 = vrot.slane %v4663_v51, %v10147_v2  ;;  %v4688_v27 = vcombine.high %v4687_v22, %v4687_v22 }
 0x9f3   :  { %v9296_v28 = vpack.i.b16 %v4631_v18, %v4832_v26  ;;  %v11162_v31 = vrot.slane %v4687_v22, %v10147_v2  ;;  %v4711_v30 = vrot.slane %v4704_v59, %v10147_v2  ;;  %v4654_v3 = vrot.slane %v4640_v8, %v10147_v2 }
 0x9f4   :  { %v4678_v37 = vrot.slane %v4664_v24, %v10147_v2  ;;  %v4840_v48 = vunpack.i.h.s16 %v4671_v10  ;;  %v4679_v15 = vcombine.high %v4671_v10, %v4671_v10  ;;  %v11168_v5 = vrot.slane %v4688_v27, %v10147_v2  ;;  %v4559_v17 = vpop.permute.xlu0 %4558 }
 0x9f5   :  { %v9297_v43 = vpack.i.b16 %v4671_v10, %v4655_v7  ;;  %v4712_v32 = vcombine.high %v4711_v30, %v4711_v30  ;;  %v4703_v23 = vcombine.high %v11162_v31, %v11162_v31  ;;  %v4719_v45 = vrot.slane %v4711_v30, %v10147_v2 }
 0x9f6   :  { %v4842_v40 = vunpack.i.h.s16 %v4678_v37  ;;  %v4571_v46 = vsel %vm656_vm10, %v11098_v44, %v4555_v56  ;;  %v4905_v47 = vcombine.low %v9296_v28, %v11153_v58  ;;  %v4573_v21 = vsel %vm656_vm10, %v11107_v16, %v4557_v11 }
 0x9f7   :  { %v4726_v14 = vrot.slane %v4712_v32, %v10147_v2  ;;  %v4728_v36 = vcombine.low %v4569_v33, %v4571_v46  ;;  %v9298_v60 = vpack.i.b16 %v4678_v37, %v4840_v48  ;;  %v4970_v53 = vcombine.low %v11162_v31, %v11168_v5 }
 0x9f8   :  { %v9299_v62 = vpack.i.b16 %v4679_v15, %v4842_v40  ;;  %v4850_v29 = vunpack.i.h.s16 %v4719_v45  ;;  %v4752_v63 = vcombine.low %v4571_v46, %v4573_v21  ;;  %v4575_v44 = vsel %vm656_vm10, %v11118_v20, %v4559_v17 }
 0x9f9   :  { %v4852_v50 = vunpack.i.h.s16 %v4726_v14  ;;  %v4735_v19 = vrot.slane %v4728_v36, %v10147_v2  ;;  %v4727_v57 = vcombine.high %v4719_v45, %v4719_v45  ;;  %v9300_v1 = vpack.i.b16 %v4719_v45, %v4703_v23 }
 0x9fa   :  { %v4776_v55 = vcombine.low %v4573_v21, %v4575_v44  ;;  %v4800_v0 = vcombine.low %v4575_v44, %v10375_v41  ;;  %v4759_v42 = vrot.slane %v4752_v63, %v10147_v2  ;;  %v4904_v4 = vcombine.low %v9294_v35, %v9295_v38 }
 0x9fb   :  { %v4736_v39 = vcombine.high %v4735_v19, %v4735_v19  ;;  %v4743_v16 = vrot.slane %v4735_v19, %v10147_v2  ;;  %v9301_v25 = vpack.i.b16 %v4726_v14, %v4850_v29  ;;  %v9302_v54 = vpack.i.b16 %v4727_v57, %v4852_v50 }
 0x9fc   :  { %v4783_v34 = vrot.slane %v4776_v55, %v10147_v2  ;;  %v4807_v13 = vrot.slane %v4800_v0, %v10147_v2  ;;  %v4760_v33 = vcombine.high %v4759_v42, %v4759_v42  ;;  %v4906_v20 = vcombine.low %v4654_v3, %v9297_v43 }
 0x9fd   :  { %v4751_v61 = vcombine.high %v4743_v16, %v4743_v16  ;;  %v4913_v9 = vrot.slane %v4903_v49, %v10147_v2  ;;  %v4767_v12 = vrot.slane %v4759_v42, %v10147_v2  ;;  %v4750_v56 = vrot.slane %v4736_v39, %v10147_v2 }
 0x9fe   :  { %v4784_v8 = vcombine.high %v4783_v34, %v4783_v34  ;;  %v4791_v58 = vrot.slane %v4783_v34, %v10147_v2  ;;  %v4808_v51 = vcombine.high %v4807_v13, %v4807_v13  ;;  %v4774_v18 = vrot.slane %v4760_v33, %v10147_v2 }
 0x9ff   :  { %v4815_v26 = vrot.slane %v4807_v13, %v10147_v2  ;;  %v4920_v22 = vrot.slane %v4904_v4, %v10147_v2  ;;  %v4972_v59 = vcombine.low %v9302_v54, %v4743_v16  ;;  %v4860_v35 = vunpack.i.h.s16 %v4767_v12 }
 0xa00   :  { %v4798_v7 = vrot.slane %v4784_v8, %v10147_v2  ;;  %v4927_v49 = vrot.slane %v4905_v47, %v10147_v2  ;;  %v4775_v24 = vcombine.high %v4767_v12, %v4767_v12  ;;  %v4862_v10 = vunpack.i.h.s16 %v4774_v18 }
 0xa01   :  { %v4799_v28 = vcombine.high %v4791_v58, %v4791_v58  ;;  %v4822_v27 = vrot.slane %v4808_v51, %v10147_v2  ;;  %v9303_v31 = vpack.i.b16 %v4767_v12, %v4751_v61  ;;  %v9304_v30 = vpack.i.b16 %v4774_v18, %v4860_v35 }
 0xa02   :  { %v4870_v38 = vunpack.i.h.s16 %v4815_v26  ;;  %v4934_v3 = vrot.slane %v4906_v20, %v10147_v2  ;;  %v9305_v37 = vpack.i.b16 %v4775_v24, %v4862_v10  ;;  %v5037_v11 = vcombine.low %v4791_v58, %v4798_v7 }
 0xa03   :  { %v9306_v48 = vpack.i.b16 %v4815_v26, %v4799_v28  ;;  %v4935_v15 = vcombine.low %v4913_v9, %v4920_v22  ;;  %v4936_v43 = vcombine.high %v4913_v9, %v4920_v22  ;;  %v4969_v45 = vcombine.low %v9298_v60, %v9299_v62  ;;  %v9932_v28 = vld [vmem:[#allocation2 + $0x388] sm:$0xff]  }
 0xa04   :  { %v9307_v5 = vpack.i.b16 %v4822_v27, %v4870_v38  ;;  %v4937_v32 = vcombine.low %v4927_v49, %v4934_v3  ;;  %v4938_v23 = vcombine.high %v4927_v49, %v4934_v3  ;;  %v4971_v46 = vcombine.low %v9300_v1, %v9301_v25  ;;  %9623 = vmatprep.subr.bf16.mxu1 %v9932_v28  ;;  %v11226_v3 = vld [vmem:[%s12123_s4 + $0x4] ss:$0 sm:$0xff] }
 0xa05   :  { %v4945_v40 = vrot.slane %v4935_v15, %v10147_v2  ;;  %v4986_v17 = vrot.slane %v4970_v53, %v10147_v2  ;;  %v4952_v47 = vrot.slane %v4936_v43, %v10147_v2  ;;  %v5000_v21 = vrot.slane %v4972_v59, %v10147_v2 }
 0xa06   :  { %v4966_v14 = vrot.slane %v4938_v23, %v10147_v2  ;;  %v4959_v36 = vrot.slane %v4937_v32, %v10147_v2  ;;  %v4979_v29 = vrot.slane %v4969_v45, %v10147_v2  ;;  %v4993_v50 = vrot.slane %v4971_v46, %v10147_v2 }
 0xa07   :  { %v5035_v19 = vcombine.low %v4750_v56, %v9303_v31  ;;  %v5036_v63 = vcombine.low %v9304_v30, %v9305_v37  ;;  %v5038_v60 = vcombine.low %v9306_v48, %v9307_v5  ;;  %v4872_v62 = vunpack.i.h.s16 %v4822_v27  ;;  %v9933_v27 = vld [vmem:[#allocation2 + $0x348] sm:$0xff]   ;;  %v9934_v31 = vld [vmem:[#allocation2 + $0x390] sm:$0xff]  }
 0xa08   :  { %v4968_v44 = vcombine.low %v4952_v47, %v4966_v14  ;;  %v4967_v57 = vcombine.low %v4945_v40, %v4959_v36  ;;  %v5002_v1 = vcombine.high %v4979_v29, %v4986_v17  ;;  %v5004_v53 = vcombine.high %v4993_v50, %v5000_v21  ;;  %9624 = vmatpush3.bf16.msra.mxu1 %v9933_v27  ;;  %v9935_v30 = vld [vmem:[#allocation2 + $0x350] sm:$0xff]  }
 0xa09   :  { %v5003_v55 = vcombine.low %v4993_v50, %v5000_v21  ;;  %v5045_v0 = vrot.slane %v5035_v19, %v10147_v2  ;;  %v5052_v39 = vrot.slane %v5036_v63, %v10147_v2  ;;  %v5059_v16 = vrot.slane %v5037_v11, %v10147_v2  ;;  %9625 = vmatprep.subr.bf16.mxu1 %v9934_v31 }
 0xa0a   :  { %5259 = vmatprep.mubr.bf16.mxu0 %v4968_v44  ;;  %v5066_v42 = vrot.slane %v5038_v60, %v10147_v2  ;;  %v5018_v4 = vrot.slane %v5002_v1, %v10147_v2  ;;  %v5032_v25 = vrot.slane %v5004_v53, %v10147_v2  ;;  %v5001_v54 = vcombine.low %v4979_v29, %v4986_v17 }
 0xa0b   :  { %5260 = vmatmul.mubr.bf16.vlgmr.msra.gmra.mrb[32].mxu0 %v4967_v57  ;;  %v4823_v34 = vcombine.high %v4815_v26, %v4815_v26  ;;  %v5068_v13 = vcombine.high %v5045_v0, %v5052_v39  ;;  %v5025_v20 = vrot.slane %v5003_v55, %v10147_v2  ;;  %v5067_v18 = vcombine.low %v5045_v0, %v5052_v39 }
 0xa0c   :  { %v5070_v61 = vcombine.high %v5059_v16, %v5066_v42  ;;  %v5034_v33 = vcombine.low %v5018_v4, %v5032_v25  ;;  %v5011_v58 = vrot.slane %v5001_v54, %v10147_v2  ;;  %v5069_v22 = vcombine.low %v5059_v16, %v5066_v42  ;;  %9626 = vmatpush3.bf16.msra.mxu1 %v9935_v30 }
 0xa0d   :  { %v5084_v9 = vrot.slane %v5068_v13, %v10147_v2  ;;  %v9308_v8 = vpack.i.b16 %v4823_v34, %v4872_v62  ;;  %v5077_v26 = vrot.slane %v5067_v18, %v10147_v2 }
 0xa0e   :  { %v5098_v12 = vrot.slane %v5070_v61, %v10147_v2  ;;  %5267 = vmatprep.mubr.bf16.mxu0 %v5034_v33  ;;  %v5033_v56 = vcombine.low %v5011_v58, %v5025_v20  ;;  %v5091_v35 = vrot.slane %v5069_v22, %v10147_v2 }
 0xa0f   :  { %v5107_v59 = vrot.slane %v9308_v8, %v10147_v2 }
 0xa10   :  { %v5100_v51 = vcombine.low %v5084_v9, %v5098_v12  ;;  %v5099_v49 = vcombine.low %v5077_v26, %v5091_v35 }
 0xa11   :  { %v5108_v7 = vcombine.high %v5107_v59, %v5107_v59  ;;  %v5115_v10 = vrot.slane %v5107_v59, %v10147_v2 }
 0xa13   :  { %5268 = vmatmul.mubr.bf16.gmra.mrb[36].mxu0 %v5033_v56  ;;  %v5122_v24 = vrot.slane %v5108_v7, %v10147_v2 }
 0xa14   :  { %5275 = vmatprep.mubr.bf16.mxu0 %v5100_v51 }
 0xa1b   :  { %5276 = vmatmul.mubr.bf16.gmra.mrb[40].mxu0 %v5099_v49 }
 0xa1c   :  { %5283 = vmatprep.mubr.bf16.mxu0 %v5122_v24 }
 0xa23   :  { %5284 = vmatmul.mubr.bf16.gmra.mrb[44].mxu0 %v5115_v10 }
 0xade   :  { %v9599_v38 = vpop.f32.mrb[32].mxu0 }
 0xadf   :  { %v9600_v37 = vpop.f32.mrb[33].mxu0 }
 0xae0   :  { %v9601_v48 = vadd.f32 %v9600_v37, %v9599_v38  ;;  %v9602_v11 = vpop.f32.mrb[34].mxu0 }
 0xae1   :  { %v9603_v15 = vpop.f32.mrb[35].mxu0 }
 0xae2   :  { %v5262_v5 = vadd.f32 %v9601_v48, %v11226_v3  ;;  %v9604_v43 = vadd.f32 %v9603_v15, %v9602_v11 }
 0xae4   :  { %v5265_v32 = vadd.f32 %v9604_v43, %v11226_v3  ;;  %v5291_v23 = vmax.f32 %v5262_v5, 0.0 }
 0xae6   :  { %v5292_v40 = vmax.f32 %v5265_v32, 0.0  ;;  %v9605_v45 = vpop.f32.mrb[36].mxu0 }
 0xae7   :  { %v9606_v46 = vpop.f32.mrb[37].mxu0 }
 0xae8   :  { %v5298_v17 = vpack.c.bf16 %v5292_v40, %v5291_v23  ;;  %v9325_v47 = vpack.c.bf16 %v5292_v40, %v5292_v40  ;;  %v9607_v14 = vadd.f32 %v9606_v46, %v9605_v45  ;;  %v9608_v36 = vpop.f32.mrb[38].mxu0 }
 0xae9   :  { %v9609_v21 = vpop.f32.mrb[39].mxu0 }
 0xaea   :  { %v5313_v29 = vrot.slane %v5298_v17, %v10147_v2  ;;  %v5320_v50 = vrot.slane %v9325_v47, %v10147_v2  ;;  %v9610_v19 = vadd.f32 %v9609_v21, %v9608_v36  ;;  %v5270_v63 = vadd.f32 %v9607_v14, %v11226_v3 }
 0xaec   :  { %v5321_v44 = vcombine.high %v5313_v29, %v5313_v29  ;;  %v5322_v57 = vcombine.high %v5320_v50, %v5320_v50  ;;  %v5329_v60 = vrot.slane %v5313_v29, %v10147_v2  ;;  %v11235_v62 = vrot.slane %v5320_v50, %v10147_v2 }
 0xaed   :  { %v5273_v1 = vadd.f32 %v9610_v19, %v11226_v3  ;;  %v5293_v25 = vmax.f32 %v5270_v63, 0.0 }
 0xaee   :  { %v5343_v53 = vrot.slane %v5321_v44, %v10147_v2  ;;  %v11240_v55 = vrot.slane %v5322_v57, %v10147_v2  ;;  %v5351_v0 = vcombine.high %v5329_v60, %v5329_v60  ;;  %v11244_v39 = vcombine.high %v11235_v62, %v11235_v62  ;;  %v9611_v16 = vpop.f32.mrb[40].mxu0 }
 0xaef   :  { %v5468_v42 = vunpack.i.h.s16 %v5329_v60  ;;  %v9328_v4 = vpack.i.b16 %v5329_v60, %v5329_v60  ;;  %v5294_v54 = vmax.f32 %v5273_v1, 0.0  ;;  %v9612_v34 = vpop.f32.mrb[41].mxu0  ;;  %v5617_v20 = vrot.slane %v11235_v62, %v10147_v2 }
 0xaf0   :  { %v5470_v13 = vunpack.i.h.s16 %v5343_v53  ;;  %v5472_v61 = vunpack.i.h.s16 %v5351_v0  ;;  %v5478_v33 = vunpack.i.h.s16 %v11240_v55  ;;  %v9614_v9 = vpop.f32.mrb[42].mxu0  ;;  %v5353_v12 = vcombine.high %v5343_v53, %v5343_v53 }
 0xaf1   :  { %v5480_v8 = vunpack.i.h.s16 %v11244_v39  ;;  %v9329_v58 = vpack.i.b16 %v5343_v53, %v5468_v42  ;;  %v5299_v51 = vpack.c.bf16 %v5294_v54, %v5293_v25  ;;  %v9615_v56 = vpop.f32.mrb[43].mxu0  ;;  %v9331_v22 = vpack.i.b16 %v11240_v55, %v11240_v55 }
 0xaf2   :  { %v5553_v18 = vpack.i.b16 %v5472_v61, %v5472_v61  ;;  %v11254_v59 = vcombine.high %v11240_v55, %v11240_v55  ;;  %v9326_v26 = vpack.c.bf16 %v5294_v54, %v5294_v54  ;;  %v11257_v35 = vpack.i.b16 %v11244_v39, %v5478_v33 }
 0xaf3   :  { %v5362_v7 = vrot.slane %v5299_v51, %v10147_v2  ;;  %v9613_v49 = vadd.f32 %v9612_v34, %v9611_v16  ;;  %v9616_v24 = vadd.f32 %v9615_v56, %v9614_v9  ;;  %v9330_v27 = vpack.i.b16 %v5351_v0, %v5470_v13 }
 0xaf4   :  { %v5369_v10 = vrot.slane %v9326_v26, %v10147_v2  ;;  %v5482_v28 = vunpack.i.h.s16 %v11254_v59  ;;  %v5580_v31 = vcombine.low %v9328_v4, %v9329_v58  ;;  %v5603_v32 = vcombine.low %v5553_v18, %v5353_v12 }
 0xaf5   :  { %v5370_v30 = vcombine.high %v5362_v7, %v5362_v7  ;;  %v11263_v38 = vrot.slane %v5362_v7, %v10147_v2  ;;  %v5278_v37 = vadd.f32 %v9613_v49, %v11226_v3  ;;  %v5281_v48 = vadd.f32 %v9616_v24, %v11226_v3 }
 0xaf6   :  { %v5371_v11 = vcombine.high %v5369_v10, %v5369_v10  ;;  %v11268_v15 = vrot.slane %v5369_v10, %v10147_v2  ;;  %v11270_v5 = vpack.i.b16 %v5482_v28, %v5482_v28  ;;  %v9617_v43 = vpop.f32.mrb[44].mxu0  ;;  %v5587_v29 = vrot.slane %v5580_v31, %v10147_v2 }
 0xaf7   :  { %v11273_v23 = vrot.slane %v5370_v30, %v10147_v2  ;;  %v11277_v40 = vcombine.high %v11263_v38, %v11263_v38  ;;  %v5295_v45 = vmax.f32 %v5278_v37, 0.0  ;;  %v5296_v46 = vmax.f32 %v5281_v48, 0.0  ;;  %v9618_v17 = vpop.f32.mrb[45].mxu0 }
 0xaf8   :  { %v11280_v47 = vrot.slane %v5371_v11, %v10147_v2  ;;  %v5492_v14 = vunpack.i.h.s16 %v11268_v15  ;;  %v5649_v36 = vcombine.low %v11270_v5, %v11263_v38  ;;  %v9620_v21 = vpop.f32.mrb[46].mxu0  ;;  %v5401_v50 = vcombine.high %v11268_v15, %v11268_v15 }
 0xaf9   :  { %v5402_v19 = vcombine.high %v11273_v23, %v11273_v23  ;;  %v5488_v63 = vunpack.i.h.s16 %v11277_v40  ;;  %v5300_v44 = vpack.c.bf16 %v5296_v46, %v5295_v45  ;;  %v9621_v57 = vpop.f32.mrb[47].mxu0  ;;  %v9334_v1 = vpack.i.b16 %v11277_v40, %v11277_v40 }
 0xafa   :  { %v11293_v60 = vcombine.high %v11280_v47, %v11280_v47  ;;  %v9327_v53 = vpack.c.bf16 %v5296_v46, %v5296_v46  ;;  %v9619_v0 = vadd.f32 %v9618_v17, %v9617_v43  ;;  %v5565_v42 = vpack.i.b16 %v5492_v14, %v5492_v14 }
 0xafb   :  { %v5490_v16 = vunpack.i.h.s16 %v5402_v19  ;;  %v5411_v4 = vrot.slane %v5300_v44, %v10147_v2  ;;  %v5594_v25 = vrot.slane %v9330_v27, %v10147_v2  ;;  %v9335_v34 = vpack.i.b16 %v5402_v19, %v5488_v63 }
 0xafc   :  { %v5498_v54 = vunpack.i.h.s16 %v11293_v60  ;;  %v9337_v13 = vpack.i.b16 %v11293_v60, %v11293_v60  ;;  %v5418_v61 = vrot.slane %v9327_v53, %v10147_v2  ;;  %v5286_v58 = vadd.f32 %v9619_v0, %v11226_v3 }
 0xafd   :  { %v11304_v33 = vpack.i.b16 %v11268_v15, %v5490_v16  ;;  %v5419_v9 = vcombine.high %v5411_v4, %v5411_v4  ;;  %v11307_v12 = vrot.slane %v5411_v4, %v10147_v2  ;;  %v5595_v18 = vcombine.low %v5587_v29, %v5594_v25  ;;  %v9937_v4 = vld [vmem:[#allocation2 + $0x358] sm:$0xff]  }
 0xafe   :  { %v5420_v51 = vcombine.high %v5418_v61, %v5418_v61  ;;  %v11311_v56 = vrot.slane %v5418_v61, %v10147_v2  ;;  %v5610_v26 = vrot.slane %v5603_v32, %v10147_v2  ;;  %v5695_v7 = vcombine.low %v5565_v42, %v11280_v47  ;;  %v9936_v42 = vld [vmem:[#allocation2 + $0x398] sm:$0xff]  }
 0xaff   :  { %v11316_v49 = vrot.slane %v5419_v9, %v10147_v2  ;;  %v5449_v24 = vcombine.high %v11307_v12, %v11307_v12  ;;  %v11321_v10 = vpack.i.b16 %v11307_v12, %v5498_v54  ;;  %v5500_v27 = vunpack.i.h.s16 %v11307_v12  ;;  %9627 = vmatprep.subr.bf16.mxu1 %v9936_v42 }
 0xb00   :  { %v11324_v3 = vrot.slane %v5420_v51, %v10147_v2  ;;  %v11328_v28 = vcombine.high %v11311_v56, %v11311_v56  ;;  %v5508_v31 = vunpack.i.h.s16 %v11311_v56  ;;  %v9340_v30 = vpack.i.b16 %v11311_v56, %v11311_v56  ;;  %9628 = vmatpush3.bf16.msra.mxu1 %v9937_v4 }
 0xb01   :  { %v5297_v37 = vmax.f32 %v5286_v58, 0.0  ;;  %v5602_v48 = vrot.slane %v5595_v18, %v10147_v2  ;;  %v5618_v11 = vcombine.low %v5610_v26, %v5617_v20  ;;  %v5502_v32 = vunpack.i.h.s16 %v11316_v49 }
 0xb02   :  { %v5452_v43 = vcombine.high %v11324_v3, %v11324_v3  ;;  %v5510_v45 = vunpack.i.h.s16 %v11324_v3  ;;  %v5512_v46 = vunpack.i.h.s16 %v11328_v28  ;;  %v9341_v17 = vpack.i.b16 %v11324_v3, %v5508_v31 }
 0xb03   :  { %v5301_v47 = vpack.c.bf16 %v5297_v37, %v5297_v37  ;;  %v5820_v14 = vsel %vm10218_vm7, 0, %v5602_v48  ;;  %v5625_v21 = vrot.slane %v5618_v11, %v10147_v2  ;;  %v9333_v20 = vpack.i.b16 %v11254_v59, %v5480_v8  ;;  %v9938_v48 = vld [vmem:[#allocation2 + $0x3a0] sm:$0xff]  }
 0xb04   :  { %v5577_v29 = vpack.i.b16 %v5512_v46, %v5512_v46  ;;  %v11348_v62 = vsel %vm2510_vm0, %v5820_v14, 0  ;;  %v5626_v19 = vcombine.low %v9331_v22, %v11257_v35  ;;  %v5656_v61 = vrot.slane %v5649_v36, %v10147_v2  ;;  %9629 = vmatprep.subr.bf16.mxu1 %v9938_v48  ;;  %v9945_v48 = vld [vmem:[#allocation2 + $0x378] sm:$0xff]  }
 0xb05   :  { %v5459_v63 = vrot.slane %v5301_v47, %v10147_v2  ;;  %v5851_v44 = vshrl.u32 %v11348_v62, 16  ;;  %v5853_v57 = vshll.u32 %v11348_v62, 16  ;;  %v5821_v53 = vsel %vm10218_vm7, 0, %v5625_v21 }
 0xb06   :  { %v5787_v0 = vcombine.low %v5577_v29, %v5452_v43  ;;  %v11363_v16 = vsel %vm2510_vm0, %v5821_v53, 0  ;;  %v5633_v39 = vrot.slane %v5626_v19, %v10147_v2  ;;  %v5640_v8 = vrot.slane %v9333_v20, %v10147_v2 }
 0xb07   :  { %v5466_v55 = vrot.slane %v5459_v63, %v10147_v2  ;;  %v5855_v22 = vrot.slane %v5853_v57, 1  ;;  %v5857_v59 = vshrl.u32 %v11363_v16, 16  ;;  %v5859_v35 = vshll.u32 %v11363_v16, 16 }
 0xb08   :  { %v5794_v25 = vrot.slane %v5787_v0, %v10147_v2  ;;  %v5641_v54 = vcombine.low %v5633_v39, %v5640_v8  ;;  %v5663_v9 = vrot.slane %v11273_v23, %v10147_v2  ;;  %v5702_v26 = vrot.slane %v5695_v7, %v10147_v2 }
 0xb09   :  { %v5801_v58 = vrot.slane %v5466_v55, %v10147_v2  ;;  %v5856_v51 = vor.u32 %v5855_v22, %v5851_v44  ;;  %v5861_v18 = vrot.slane %v5859_v35, 1  ;;  %v5709_v37 = vrot.slane %v5401_v50, %v10147_v2  ;;  %v9942_v35 = vld [vmem:[#allocation2 + $0x3b0] sm:$0xff]  }
 0xb0a   :  { %v5648_v3 = vrot.slane %v5641_v54, %v10147_v2  ;;  %v5664_v31 = vcombine.low %v5656_v61, %v5663_v9  ;;  %v5672_v38 = vcombine.low %v9334_v1, %v9335_v34  ;;  %v5686_v36 = vrot.slane %v11304_v33, %v10147_v2  ;;  %v9939_v1 = vld [vmem:[#allocation2 + $0x360] sm:$0xff]   ;;  %v9943_v61 = vld [vmem:[#allocation2 + $0x370] sm:$0xff]  }
 0xb0b   :  { %v11387_v5 = vcombine.low %v5794_v25, %v5801_v58  ;;  %5911 = vrot.lane.b32.xlu1 %v5856_v51, %s10027_s28  ;;  %v5862_v23 = vor.u32 %v5861_v18, %v5857_v59  ;;  %v9339_v7 = vpack.i.b16 %v11316_v49, %v5500_v27  ;;  %v5710_v11 = vcombine.low %v5702_v26, %v5709_v37 }
 0xb0c   :  { %v5822_v15 = vsel %vm10218_vm7, 0, %v5648_v3  ;;  %v5671_v50 = vrot.slane %v5664_v31, %v10147_v2  ;;  %v5679_v40 = vrot.slane %v5672_v38, %v10147_v2  ;;  %v5571_v34 = vpack.i.b16 %v5502_v32, %v5502_v32  ;;  %9630 = vmatpush3.bf16.msra.mxu1 %v9939_v1  ;;  %v9944_v38 = vld [vmem:[#allocation2 + $0x3b8] sm:$0xff]  }
 0xb0d   :  { %5913 = vrot.lane.b32.xlu0 %v5862_v23, %s10027_s28  ;;  %v11399_v43 = vsel %vm2510_vm0, %v5822_v15, 0  ;;  %v5718_v33 = vcombine.low %v9337_v13, %v11321_v10  ;;  %v5732_v27 = vrot.slane %v9339_v7, %v10147_v2  ;;  %v5717_v32 = vrot.slane %v5710_v11, %v10147_v2  ;;  %v9940_v10 = vld [vmem:[#allocation2 + $0x3a8] sm:$0xff]  }
 0xb0e   :  { %v5865_v46 = vshll.u32 %v11399_v43, 16  ;;  %v5823_v47 = vsel %vm10218_vm7, 0, %v5671_v50  ;;  %v9342_v14 = vpack.i.b16 %v11328_v28, %v5510_v45  ;;  %v5687_v29 = vcombine.low %v5679_v40, %v5686_v36  ;;  %v9941_v45 = vld [vmem:[#allocation2 + $0x368] sm:$0xff]   ;;  %9631 = vmatprep.subr.bf16.mxu1 %v9940_v10 }
 0xb0f   :  { %v11412_v21 = vsel %vm2510_vm0, %v5823_v47, 0  ;;  %v5725_v60 = vrot.slane %v5718_v33, %v10147_v2  ;;  %v5764_v13 = vcombine.low %v9340_v30, %v9341_v17  ;;  %v5863_v20 = vshrl.u32 %v11399_v43, 16  ;;  %v9946_v47 = vld [vmem:[#allocation2 + $0x3c0] sm:$0xff]  }
 0xb10   :  { %v5867_v19 = vrot.slane %v5865_v46, 1  ;;  %v5871_v63 = vshll.u32 %v11412_v21, 16  ;;  %v5825_v28 = vsel %vm10218_vm7, 0, %v5717_v32  ;;  %v5694_v57 = vrot.slane %v5687_v29, %v10147_v2  ;;  %9632 = vmatpush3.bf16.msra.mxu1 %v9941_v45 }
 0xb11   :  { %v11423_v44 = vsel %vm2510_vm0, %v5825_v28, 0  ;;  %v5733_v53 = vcombine.low %v5725_v60, %v5732_v27  ;;  %v5771_v0 = vrot.slane %v5764_v13, %v10147_v2  ;;  %v5869_v30 = vshrl.u32 %v11412_v21, 16  ;;  %9633 = vmatprep.subr.bf16.mxu1 %v9942_v35 }
 0xb12   :  { %v5868_v56 = vor.u32 %v5867_v19, %v5863_v20  ;;  %v5873_v17 = vrot.slane %v5871_v63, 1  ;;  %v5883_v39 = vshll.u32 %v11423_v44, 16  ;;  %v5824_v8 = vsel %vm10218_vm7, 0, %v5694_v57 }
 0xb13   :  { %v5740_v55 = vrot.slane %v5733_v53, %v10147_v2  ;;  %v5778_v22 = vrot.slane %v9342_v14, %v10147_v2  ;;  %v5451_v59 = vcombine.high %v11316_v49, %v11316_v49  ;;  %v11437_v25 = vsel %vm2510_vm0, %v5824_v8, 0  ;;  %v9947_v14 = vld [vmem:[#allocation2 + $0x380] sm:$0xff]  }
 0xb14   :  { %5915 = vrot.lane.b32.xlu1 %v5868_v56, %s10027_s28  ;;  %v5874_v42 = vor.u32 %v5873_v17, %v5869_v30  ;;  %v5885_v4 = vrot.slane %v5883_v39, 1  ;;  %v5741_v54 = vcombine.low %v5571_v34, %v5449_v24  ;;  %v5877_v9 = vshll.u32 %v11437_v25, 16  ;;  %9634 = vmatpush3.bf16.msra.mxu1 %v9943_v61 }
 0xb15   :  { %v5826_v58 = vsel %vm10218_vm7, 0, %v5740_v55  ;;  %v5779_v51 = vcombine.low %v5771_v0, %v5778_v22  ;;  %v5881_v49 = vshrl.u32 %v11423_v44, 16  ;;  %v5755_v12 = vrot.slane %v5451_v59, %v10147_v2  ;;  %9635 = vmatprep.subr.bf16.mxu1 %v9944_v38 }
 0xb16   :  { %5917 = vrot.lane.b32.xlu0 %v5874_v42, %s10027_s28  ;;  %v11448_v18 = vsel %vm2510_vm0, %v5826_v58, 0  ;;  %v5748_v26 = vrot.slane %v5741_v54, %v10147_v2  ;;  %v5875_v24 = vshrl.u32 %v11437_v25, 16  ;;  %v5879_v3 = vrot.slane %v5877_v9, 1 }
 0xb17   :  { %v5889_v31 = vshll.u32 %v11448_v18, 16  ;;  %v5786_v37 = vrot.slane %v5779_v51, %v10147_v2  ;;  %v5886_v23 = vor.u32 %v5885_v4, %v5881_v49  ;;  %v5809_v7 = vrot.slane %v11387_v5, %v10147_v2 }
 0xb18   :  { %v5756_v36 = vcombine.low %v5748_v26, %v5755_v12  ;;  %v5880_v15 = vor.u32 %v5879_v3, %v5875_v24  ;;  %v5887_v50 = vshrl.u32 %v11448_v18, 16  ;;  %9636 = vmatpush3.bf16.msra.mxu1 %v9945_v48 }
 0xb19   :  { %v5891_v11 = vrot.slane %v5889_v31, 1  ;;  %v5828_v40 = vsel %vm10218_vm7, 0, %v5786_v37  ;;  %v5829_v33 = vsel %vm10218_vm7, 0, %v5809_v7  ;;  %9637 = vmatprep.subr.bf16.mxu1 %v9946_v47 }
 0xb1a   :  { %5921 = vrot.lane.b32.xlu0 %v5886_v23, %s10027_s28  ;;  %v11462_v1 = vsel %vm2510_vm0, %v5828_v40, 0  ;;  %v5763_v34 = vrot.slane %v5756_v36, %v10147_v2  ;;  %5919 = vrot.lane.b32.xlu1 %v5880_v15, %s10027_s28  ;;  %v11470_v46 = vsel %vm2510_vm0, %v5829_v33, 0 }
 0xb1b   :  { %v5892_v5 = vor.u32 %v5891_v11, %v5887_v50  ;;  %v5901_v27 = vshll.u32 %v11462_v1, 16  ;;  %v5907_v10 = vshll.u32 %v11470_v46, 16  ;;  %v5899_v20 = vshrl.u32 %v11462_v1, 16 }
 0xb1c   :  { %v5827_v32 = vsel %vm10218_vm7, 0, %v5763_v34  ;;  %9638 = vmatpush3.bf16.msra.mxu1 %v9947_v14  ;;  %v5905_v57 = vshrl.u32 %v11470_v46, 16 }
 0xb1d   :  { %v5903_v29 = vrot.slane %v5901_v27, 1  ;;  %v11475_v60 = vsel %vm2510_vm0, %v5827_v32, 0  ;;  %v5909_v45 = vrot.slane %v5907_v10, 1 }
 0xb1e   :  { %v5895_v13 = vshll.u32 %v11475_v60, 16  ;;  %5923 = vrot.lane.b32.xlu1 %v5892_v5, %s10027_s28  ;;  %v5893_v19 = vshrl.u32 %v11475_v60, 16 }
 0xb1f   :  { %v5904_v6 = vor.u32 %v5903_v29, %v5899_v20  ;;  %v5910_v53 = vor.u32 %v5909_v45, %v5905_v57 }
 0xb20   :  { %v5897_v63 = vrot.slane %v5895_v13, 1 }
 0xb22   :  { %v5898_v28 = vor.u32 %v5897_v63, %v5893_v19  ;;  %5927 = vrot.lane.b32.xlu1 %v5904_v6, %s10027_s28 }
 0xb24   :  { %5925 = vrot.lane.b32.xlu0 %v5898_v28, %s10027_s28 }
 0xb28   :  { %5929 = vrot.lane.b32.xlu0 %v5910_v53, %s10027_s28 }
 0xb7d   :  { %v5912_v0 = vpop.permute.xlu1 %5911 }
 0xb7e   :  { %v5932_v56 = vsel %vm656_vm10, %v11348_v62, %v5912_v0 }
 0xb7f   :  { %v5961_v30 = vcombine.low %v10375_v41, %v5932_v56  ;;  %v5914_v17 = vpop.permute.xlu0 %5913 }
 0xb80   :  { %v5934_v39 = vsel %vm656_vm10, %v11363_v16, %v5914_v17 }
 0xb81   :  { %v5968_v8 = vrot.slane %v5961_v30, %v10147_v2  ;;  %v5985_v55 = vcombine.low %v5932_v56, %v5934_v39 }
 0xb83   :  { %v5969_v22 = vcombine.high %v5968_v8, %v5968_v8  ;;  %v5976_v59 = vrot.slane %v5968_v8, %v10147_v2  ;;  %v5992_v35 = vrot.slane %v5985_v55, %v10147_v2 }
 0xb85   :  { %v5983_v42 = vrot.slane %v5969_v22, %v10147_v2  ;;  %v5984_v4 = vcombine.high %v5976_v59, %v5976_v59  ;;  %v5993_v54 = vcombine.high %v5992_v35, %v5992_v35  ;;  %v6000_v62 = vrot.slane %v5992_v35, %v10147_v2 }
 0xb86   :  { %v5916_v61 = vpop.permute.xlu1 %5915 }
 0xb87   :  { %v6253_v9 = vcombine.low %v5976_v59, %v5983_v42  ;;  %v6254_v58 = vcombine.low %v5984_v4, %v6000_v62  ;;  %v5936_v16 = vsel %vm656_vm10, %v11399_v43, %v5916_v61  ;;  %v6007_v49 = vrot.slane %v5993_v54, %v10147_v2 }
 0xb88   :  { %v5918_v51 = vpop.permute.xlu0 %5917  ;;  %v6008_v26 = vcombine.high %v6000_v62, %v6000_v62  ;;  %v6009_v12 = vcombine.low %v5934_v39, %v5936_v16 }
 0xb89   :  { %v5938_v24 = vsel %vm656_vm10, %v11412_v21, %v5918_v51  ;;  %v6263_v23 = vrot.slane %v6253_v9, %v10147_v2  ;;  %v6270_v36 = vrot.slane %v6254_v58, %v10147_v2 }
 0xb8a   :  { %v6033_v3 = vcombine.low %v5936_v16, %v5938_v24  ;;  %v6016_v31 = vrot.slane %v6009_v12, %v10147_v2  ;;  %v6255_v7 = vcombine.low %v6007_v49, %v6008_v26 }
 0xb8b   :  { %v6286_v29 = vcombine.high %v6263_v23, %v6270_v36  ;;  %v6285_v17 = vcombine.low %v6263_v23, %v6270_v36 }
 0xb8c   :  { %v6040_v37 = vrot.slane %v6033_v3, %v10147_v2  ;;  %v5922_v38 = vpop.permute.xlu0 %5921  ;;  %v6017_v43 = vcombine.high %v6016_v31, %v6016_v31  ;;  %v6024_v48 = vrot.slane %v6016_v31, %v10147_v2  ;;  %v5920_v15 = vpop.permute.xlu1 %5919  ;;  %v6277_v28 = vrot.slane %v6255_v7, %v10147_v2 }
 0xb8d   :  { %v5942_v50 = vsel %vm656_vm10, %v11423_v44, %v5922_v38  ;;  %v5940_v40 = vsel %vm656_vm10, %v11437_v25, %v5920_v15  ;;  %v6302_v39 = vrot.slane %v6286_v29, %v10147_v2 }
 0xb8e   :  { %v6041_v11 = vcombine.high %v6040_v37, %v6040_v37  ;;  %v6048_v21 = vrot.slane %v6040_v37, %v10147_v2  ;;  %v6105_v34 = vcombine.low %v10375_v41, %v5942_v50  ;;  %v6031_v33 = vrot.slane %v6017_v43, %v10147_v2 }
 0xb8f   :  { %v6057_v5 = vcombine.low %v5938_v24, %v5940_v40  ;;  %v6081_v27 = vcombine.low %v5940_v40, %v10375_v41  ;;  %v6032_v47 = vcombine.high %v6024_v48, %v6024_v48 }
 0xb90   :  { %v6055_v32 = vrot.slane %v6041_v11, %v10147_v2  ;;  %v6112_v14 = vrot.slane %v6105_v34, %v10147_v2  ;;  %v6256_v44 = vcombine.low %v6024_v48, %v6031_v33  ;;  %v6056_v13 = vcombine.high %v6048_v21, %v6048_v21  ;;  %v5924_v25 = vpop.permute.xlu1 %5923 }
 0xb91   :  { %v6064_v10 = vrot.slane %v6057_v5, %v10147_v2  ;;  %v6088_v20 = vrot.slane %v6081_v27, %v10147_v2  ;;  %v5944_v6 = vsel %vm656_vm10, %v11448_v18, %v5924_v25  ;;  %v6319_v8 = vcombine.low %v6032_v47, %v6048_v21 }
 0xb92   :  { %v6113_v19 = vcombine.high %v6112_v14, %v6112_v14  ;;  %v11519_v63 = vrot.slane %v6112_v14, %v10147_v2  ;;  %v6129_v56 = vcombine.low %v5942_v50, %v5944_v6  ;;  %v6284_v30 = vrot.slane %v6256_v44, %v10147_v2 }
 0xb93   :  { %v6065_v45 = vcombine.high %v6064_v10, %v6064_v10  ;;  %v6072_v57 = vrot.slane %v6064_v10, %v10147_v2  ;;  %v6089_v53 = vcombine.high %v6088_v20, %v6088_v20  ;;  %v6096_v0 = vrot.slane %v6088_v20, %v10147_v2 }
 0xb94   :  { %v6320_v55 = vcombine.low %v6055_v32, %v6056_v13  ;;  %v11530_v18 = vrot.slane %v6113_v19, %v10147_v2  ;;  %v5928_v59 = vpop.permute.xlu1 %5927  ;;  %v6136_v42 = vrot.slane %v6129_v56, %v10147_v2  ;;  %v6287_v62 = vcombine.low %v6277_v28, %v6284_v30 }
 0xb95   :  { %v6079_v22 = vrot.slane %v6065_v45, %v10147_v2  ;;  %v6080_v35 = vcombine.high %v6072_v57, %v6072_v57  ;;  %v5948_v4 = vsel %vm656_vm10, %v11462_v1, %v5928_v59  ;;  %v6103_v61 = vrot.slane %v6089_v53, %v10147_v2 }
 0xb96   :  { %v5926_v54 = vpop.permute.xlu0 %5925  ;;  %v6104_v9 = vcombine.high %v6096_v0, %v6096_v0  ;;  %v6128_v58 = vcombine.high %v11519_v63, %v11519_v63  ;;  %v6137_v51 = vcombine.high %v6136_v42, %v6136_v42  ;;  %v6144_v49 = vrot.slane %v6136_v42, %v10147_v2 }
 0xb97   :  { %v5946_v16 = vsel %vm656_vm10, %v11475_v60, %v5926_v54  ;;  %v6321_v24 = vcombine.low %v6072_v57, %v6079_v22  ;;  %v6386_v1 = vcombine.low %v11519_v63, %v11530_v18  ;;  %v6288_v3 = vcombine.high %v6277_v28, %v6284_v30 }
 0xb98   :  { %v6153_v26 = vcombine.low %v5944_v6, %v5946_v16  ;;  %v6177_v12 = vcombine.low %v5946_v16, %v5948_v4  ;;  %v6309_v31 = vrot.slane %v6287_v62, %v10147_v2  ;;  %v6322_v37 = vcombine.low %v6080_v35, %v6096_v0 }
 0xb99   :  { %v6151_v38 = vrot.slane %v6137_v51, %v10147_v2  ;;  %v6295_v60 = vrot.slane %v6285_v17, %v10147_v2  ;;  %v6152_v7 = vcombine.high %v6144_v49, %v6144_v49  ;;  %v6316_v15 = vrot.slane %v6288_v3, %v10147_v2 }
 0xb9a   :  { %v6160_v23 = vrot.slane %v6153_v26, %v10147_v2  ;;  %v5930_v36 = vpop.permute.xlu0 %5929  ;;  %v6184_v43 = vrot.slane %v6177_v12, %v10147_v2  ;;  %v6343_v10 = vrot.slane %v6321_v24, %v10147_v2  ;;  %v6385_v20 = vcombine.low %v6103_v61, %v6104_v9 }
 0xb9b   :  { %v5950_v48 = vsel %vm656_vm10, %v11470_v46, %v5930_v36  ;;  %v6317_v40 = vcombine.low %v6295_v60, %v6309_v31  ;;  %v6318_v27 = vcombine.low %v6302_v39, %v6316_v15  ;;  %v6336_v46 = vrot.slane %v6320_v55, %v10147_v2 }
 0xb9c   :  { %v6161_v50 = vcombine.high %v6160_v23, %v6160_v23  ;;  %v6168_v11 = vrot.slane %v6160_v23, %v10147_v2  ;;  %v6201_v21 = vcombine.low %v5948_v4, %v5950_v48  ;;  %v6185_v34 = vcombine.high %v6184_v43, %v6184_v43 }
 0xb9d   :  { %v6192_v33 = vrot.slane %v6184_v43, %v10147_v2  ;;  %v6225_v5 = vcombine.low %v5950_v48, %v10375_v41  ;;  %6687 = vmatprep.mubr.bf16.mxu1 %v6318_v27  ;;  %v6387_v25 = vcombine.low %v6128_v58, %v6144_v49  ;;  %v6329_v41 = vrot.slane %v6319_v8, %v10147_v2 }
 0xb9e   :  { %v6175_v47 = vrot.slane %v6161_v50, %v10147_v2  ;;  %v6176_v32 = vcombine.high %v6168_v11, %v6168_v11  ;;  %v6208_v14 = vrot.slane %v6201_v21, %v10147_v2  ;;  %v6199_v29 = vrot.slane %v6185_v34, %v10147_v2  ;;  %6688 = vmatmul.mubr.bf16.vlgmr.msra.gmra.mrb[20].mxu1 %v6317_v40 }
 0xb9f   :  { %v6200_v44 = vcombine.high %v6192_v33, %v6192_v33  ;;  %v6232_v13 = vrot.slane %v6225_v5, %v10147_v2  ;;  %v6388_v63 = vcombine.low %v6151_v38, %v6152_v7  ;;  %v6350_v45 = vrot.slane %v6322_v37, %v10147_v2 }
 0xba0   :  { %v6209_v19 = vcombine.high %v6208_v14, %v6208_v14  ;;  %v6451_v6 = vcombine.low %v6168_v11, %v6175_v47  ;;  %v6452_v28 = vcombine.low %v6176_v32, %v6192_v33  ;;  %v6216_v57 = vrot.slane %v6208_v14, %v10147_v2 }
 0xba1   :  { %v6352_v0 = vcombine.high %v6329_v41, %v6336_v46  ;;  %v6351_v56 = vcombine.low %v6329_v41, %v6336_v46  ;;  %v6453_v30 = vcombine.low %v6199_v29, %v6200_v44  ;;  %v6233_v17 = vcombine.high %v6232_v13, %v6232_v13 }
 0xba2   :  { %v6223_v53 = vrot.slane %v6209_v19, %v10147_v2  ;;  %v6354_v39 = vcombine.high %v6343_v10, %v6350_v45  ;;  %v6353_v55 = vcombine.low %v6343_v10, %v6350_v45  ;;  %v6240_v22 = vrot.slane %v6232_v13, %v10147_v2  ;;  %v9949_v19 = vld [vmem:[#allocation2 + $0x3c8] sm:$0xff]  }
 0xba3   :  { %v6368_v8 = vrot.slane %v6352_v0, %v10147_v2  ;;  %v6361_v59 = vrot.slane %v6351_v56, %v10147_v2  ;;  %v6395_v4 = vrot.slane %v6385_v20, %v10147_v2  ;;  %v6402_v54 = vrot.slane %v6386_v1, %v10147_v2 }
 0xba4   :  { %v6454_v18 = vcombine.low %v6216_v57, %v6223_v53  ;;  %v6382_v35 = vrot.slane %v6354_v39, %v10147_v2  ;;  %v6375_v42 = vrot.slane %v6353_v55, %v10147_v2  ;;  %v6409_v62 = vrot.slane %v6387_v25, %v10147_v2  ;;  %v9948_v25 = vld [vmem:[#allocation2 + $0x408] sm:$0xff]  }
 0xba5   :  { %v6416_v61 = vrot.slane %v6388_v63, %v10147_v2  ;;  %v6461_v9 = vrot.slane %v6451_v6, %v10147_v2  ;;  %v6468_v58 = vrot.slane %v6452_v28, %v10147_v2  ;;  %v6418_v49 = vcombine.high %v6395_v4, %v6402_v54  ;;  %9669 = vmatprep.subr.bf16.mxu0 %v9948_v25  ;;  %v11593_v63 = vld [vmem:[%s12123_s4 + $0x5] ss:$0 sm:$0xff] }
 0xba6   :  { %v6384_v16 = vcombine.low %v6368_v8, %v6382_v35  ;;  %v6383_v51 = vcombine.low %v6361_v59, %v6375_v42  ;;  %v6475_v24 = vrot.slane %v6453_v30, %v10147_v2  ;;  %v6482_v3 = vrot.slane %v6454_v18, %v10147_v2  ;;  %9670 = vmatpush3.bf16.msra.mxu0 %v9949_v19 }
 0xba7   :  { %v6420_v26 = vcombine.high %v6409_v62, %v6416_v61  ;;  %v6419_v12 = vcombine.low %v6409_v62, %v6416_v61  ;;  %v6224_v31 = vcombine.high %v6216_v57, %v6216_v57  ;;  %v6247_v1 = vrot.slane %v6233_v17, %v10147_v2 }
 0xba8   :  { %v6248_v37 = vcombine.high %v6240_v22, %v6240_v22  ;;  %6695 = vmatprep.mubr.bf16.mxu1 %v6384_v16  ;;  %v6484_v38 = vcombine.high %v6461_v9, %v6468_v58  ;;  %v6434_v23 = vrot.slane %v6418_v49, %v10147_v2  ;;  %v6417_v60 = vcombine.low %v6395_v4, %v6402_v54 }
 0xba9   :  { %6696 = vmatmul.mubr.bf16.gmra.mrb[24].mxu1 %v6383_v51  ;;  %v6448_v36 = vrot.slane %v6420_v26, %v10147_v2  ;;  %v6486_v7 = vcombine.high %v6475_v24, %v6482_v3  ;;  %v6441_v48 = vrot.slane %v6419_v12, %v10147_v2  ;;  %v6517_v50 = vcombine.low %v6224_v31, %v6240_v22 }
 0xbaa   :  { %v6500_v11 = vrot.slane %v6484_v38, %v10147_v2  ;;  %v6518_v21 = vcombine.low %v6247_v1, %v6248_v37  ;;  %v6427_v40 = vrot.slane %v6417_v60, %v10147_v2  ;;  %v6485_v5 = vcombine.low %v6475_v24, %v6482_v3 }
 0xbab   :  { %v6450_v43 = vcombine.low %v6434_v23, %v6448_v36  ;;  %v6514_v15 = vrot.slane %v6486_v7, %v10147_v2  ;;  %v6525_v27 = vrot.slane %v6517_v50, %v10147_v2  ;;  %v6483_v32 = vcombine.low %v6461_v9, %v6468_v58 }
 0xbac   :  { %v6449_v33 = vcombine.low %v6427_v40, %v6441_v48  ;;  %v6532_v47 = vrot.slane %v6518_v21, %v10147_v2  ;;  %v6507_v14 = vrot.slane %v6485_v5, %v10147_v2 }
 0xbad   :  { %6703 = vmatprep.mubr.bf16.mxu1 %v6450_v43  ;;  %v6516_v34 = vcombine.low %v6500_v11, %v6514_v15  ;;  %v6493_v29 = vrot.slane %v6483_v32, %v10147_v2 }
 0xbae   :  { %v6534_v46 = vcombine.high %v6525_v27, %v6532_v47  ;;  %v6533_v10 = vcombine.low %v6525_v27, %v6532_v47  ;;  %v9950_v27 = vld [vmem:[#allocation2 + $0x410] sm:$0xff]  }
 0xbaf   :  { %v6515_v44 = vcombine.low %v6493_v29, %v6507_v14  ;;  %v9951_v47 = vld [vmem:[#allocation2 + $0x3d0] sm:$0xff]   ;;  %9671 = vmatprep.subr.bf16.mxu0 %v9950_v27 }
 0xbb0   :  { %v6548_v13 = vrot.slane %v6534_v46, %v10147_v2  ;;  %v6541_v20 = vrot.slane %v6533_v10, %v10147_v2  ;;  %9672 = vmatpush3.bf16.msra.mxu0 %v9951_v47 }
 0xbb1   :  { %6704 = vmatmul.mubr.bf16.gmra.mrb[28].mxu1 %v6449_v33 }
 0xbb2   :  { %6711 = vmatprep.mubr.bf16.mxu1 %v6516_v34 }
 0xbb9   :  { %6712 = vmatmul.mubr.bf16.gmra.mrb[32].mxu1 %v6515_v44 }
 0xbba   :  { %6719 = vmatprep.mubr.bf16.mxu1 %v6548_v13 }
 0xbc1   :  { %6720 = vmatmul.mubr.bf16.gmra.mrb[36].mxu1 %v6541_v20 }
 0xc71   :  { %v9639_v41 = vpop.f32.mrb[20].mxu1 }
 0xc72   :  { %v9640_v6 = vpop.f32.mrb[21].mxu1 }
 0xc73   :  { %v9641_v28 = vadd.f32 %v9640_v6, %v9639_v41  ;;  %v9642_v45 = vpop.f32.mrb[22].mxu1 }
 0xc74   :  { %v9643_v57 = vpop.f32.mrb[23].mxu1 }
 0xc75   :  { %v6690_v53 = vadd.f32 %v9641_v28, %v11593_v63  ;;  %v9644_v0 = vadd.f32 %v9643_v57, %v9642_v45 }
 0xc77   :  { %v6693_v56 = vadd.f32 %v9644_v0, %v11593_v63  ;;  %v6727_v30 = vmax.f32 %v6690_v53, 0.0 }
 0xc79   :  { %v6728_v17 = vmax.f32 %v6693_v56, 0.0 }
 0xc7b   :  { %v6736_v39 = vpack.c.bf16 %v6728_v17, %v6727_v30  ;;  %v9360_v55 = vpack.c.bf16 %v6728_v17, %v6728_v17 }
 0xc7c   :  { %v9645_v22 = vpop.f32.mrb[24].mxu1 }
 0xc7d   :  { %v9646_v18 = vpop.f32.mrb[25].mxu1  ;;  %v6753_v8 = vrot.slane %v6736_v39, %v10147_v2  ;;  %v6760_v59 = vrot.slane %v9360_v55, %v10147_v2 }
 0xc7e   :  { %v9647_v35 = vadd.f32 %v9646_v18, %v9645_v22  ;;  %v9648_v42 = vpop.f32.mrb[26].mxu1 }
 0xc7f   :  { %v9649_v4 = vpop.f32.mrb[27].mxu1  ;;  %v6761_v54 = vcombine.high %v6753_v8, %v6753_v8  ;;  %v6762_v62 = vcombine.high %v6760_v59, %v6760_v59  ;;  %v6769_v61 = vrot.slane %v6753_v8, %v10147_v2  ;;  %v6776_v12 = vrot.slane %v6760_v59, %v10147_v2 }
 0xc80   :  { %v6698_v9 = vadd.f32 %v9647_v35, %v11593_v63  ;;  %v9650_v58 = vadd.f32 %v9649_v4, %v9648_v42 }
 0xc81   :  { %v6783_v16 = vrot.slane %v6761_v54, %v10147_v2  ;;  %v6790_v51 = vrot.slane %v6762_v62, %v10147_v2  ;;  %v6791_v49 = vcombine.high %v6769_v61, %v6769_v61 }
 0xc82   :  { %v6701_v26 = vadd.f32 %v9650_v58, %v11593_v63  ;;  %v6729_v37 = vmax.f32 %v6698_v9, 0.0 }
 0xc83   :  { %v6793_v24 = vcombine.high %v6783_v16, %v6783_v16  ;;  %v6998_v3 = vcombine.low %v6769_v61, %v6783_v16  ;;  %v7012_v1 = vrot.slane %v6791_v49, %v10147_v2  ;;  %v9364_v7 = vcombine.high %v6776_v12, %v6790_v51 }
 0xc84   :  { %v9651_v31 = vpop.f32.mrb[28].mxu1  ;;  %v6730_v38 = vmax.f32 %v6701_v26, 0.0  ;;  %v7035_v15 = vrot.slane %v6790_v51, %v10147_v2 }
 0xc85   :  { %v9652_v23 = vpop.f32.mrb[29].mxu1  ;;  %v7005_v36 = vrot.slane %v6998_v3, %v10147_v2  ;;  %v7021_v60 = vcombine.low %v6793_v24, %v6776_v12  ;;  %v7051_v46 = vrot.slane %v9364_v7, %v10147_v2 }
 0xc86   :  { %v9653_v43 = vadd.f32 %v9652_v23, %v9651_v31  ;;  %v9654_v48 = vpop.f32.mrb[30].mxu1  ;;  %v6737_v50 = vpack.c.bf16 %v6730_v38, %v6729_v37  ;;  %v9361_v11 = vpack.c.bf16 %v6730_v38, %v6730_v38 }
 0xc87   :  { %v9655_v21 = vpop.f32.mrb[31].mxu1  ;;  %v7028_v40 = vrot.slane %v7021_v60, %v10147_v2  ;;  %v7013_v5 = vcombine.low %v7005_v36, %v7012_v1 }
 0xc88   :  { %v6706_v34 = vadd.f32 %v9653_v43, %v11593_v63  ;;  %v9656_v33 = vadd.f32 %v9655_v21, %v9654_v48  ;;  %v6802_v32 = vrot.slane %v6737_v50, %v10147_v2  ;;  %v6809_v14 = vrot.slane %v9361_v11, %v10147_v2 }
 0xc89   :  { %v11615_v44 = vrot.slane %v7013_v5, %v10147_v2  ;;  %v7036_v13 = vcombine.low %v7028_v40, %v7035_v15 }
 0xc8a   :  { %v6709_v29 = vadd.f32 %v9656_v33, %v11593_v63  ;;  %v6810_v10 = vcombine.high %v6802_v32, %v6802_v32  ;;  %v6811_v20 = vcombine.high %v6809_v14, %v6809_v14  ;;  %v6818_v25 = vrot.slane %v6802_v32, %v10147_v2 }
 0xc8b   :  { %v6825_v19 = vrot.slane %v6809_v14, %v10147_v2  ;;  %v6731_v41 = vmax.f32 %v6706_v34, 0.0  ;;  %v7229_v45 = vshrl.u32 %v11615_v44, 16  ;;  %v7231_v57 = vshll.u32 %v11615_v44, 16 }
 0xc8c   :  { %v6732_v6 = vmax.f32 %v6709_v29, 0.0  ;;  %v9657_v28 = vpop.f32.mrb[32].mxu1  ;;  %v11622_v53 = vrot.slane %v6810_v10, %v10147_v2  ;;  %v6839_v0 = vrot.slane %v6811_v20, %v10147_v2  ;;  %v6840_v56 = vcombine.high %v6818_v25, %v6818_v25 }
 0xc8d   :  { %v6841_v30 = vcombine.high %v6825_v19, %v6825_v19  ;;  %v9658_v17 = vpop.f32.mrb[33].mxu1  ;;  %v11626_v8 = vrot.slane %v7036_v13, %v10147_v2  ;;  %v7058_v35 = vrot.slane %v6818_v25, %v10147_v2  ;;  %v7233_v26 = vrot.slane %v7231_v57, 1 }
 0xc8e   :  { %v6738_v39 = vpack.c.bf16 %v6732_v6, %v6731_v41  ;;  %v9362_v55 = vpack.c.bf16 %v6732_v6, %v6732_v6  ;;  %v9659_v22 = vadd.f32 %v9658_v17, %v9657_v28  ;;  %v9660_v18 = vpop.f32.mrb[34].mxu1  ;;  %v6842_v59 = vcombine.high %v11622_v53, %v11622_v53  ;;  %v9952_v41 = vld [vmem:[#allocation2 + $0x418] sm:$0xff]  }
 0xc8f   :  { %v11632_v42 = vcombine.low %v11622_v53, %v6840_v56  ;;  %v7090_v4 = vcombine.low %v6825_v19, %v6839_v0  ;;  %v9661_v54 = vpop.f32.mrb[35].mxu1  ;;  %v7104_v62 = vrot.slane %v6841_v30, %v10147_v2  ;;  %v6843_v51 = vcombine.high %v6839_v0, %v6839_v0  ;;  %v9953_v53 = vld [vmem:[#allocation2 + $0x3d8] sm:$0xff]   ;;  %9673 = vmatprep.subr.bf16.mxu0 %v9952_v41 }
 0xc90   :  { %v6851_v61 = vrot.slane %v6738_v39, %v10147_v2  ;;  %v6858_v9 = vrot.slane %v9362_v55, %v10147_v2  ;;  %v6714_v58 = vadd.f32 %v9659_v22, %v11593_v63  ;;  %v9662_v49 = vadd.f32 %v9661_v54, %v9660_v18  ;;  %9674 = vmatpush3.bf16.msra.mxu0 %v9953_v53 }
 0xc91   :  { %v7097_v16 = vrot.slane %v7090_v4, %v10147_v2  ;;  %v7234_v37 = vor.u32 %v7233_v26, %v7229_v45  ;;  %v7236_v38 = vshrl.u32 %v11626_v8, 16  ;;  %v7238_v23 = vshll.u32 %v11626_v8, 16  ;;  %v9955_v26 = vld [vmem:[#allocation2 + $0x3e0] sm:$0xff]  }
 0xc92   :  { %v6859_v12 = vcombine.high %v6851_v61, %v6851_v61  ;;  %v6860_v24 = vcombine.high %v6858_v9, %v6858_v9  ;;  %v6867_v3 = vrot.slane %v6851_v61, %v10147_v2  ;;  %v11641_v31 = vrot.slane %v6858_v9, %v10147_v2  ;;  %v9954_v9 = vld [vmem:[#allocation2 + $0x420] sm:$0xff]  }
 0xc93   :  { %v6717_v1 = vadd.f32 %v9662_v49, %v11593_v63  ;;  %v6733_v43 = vmax.f32 %v6714_v58, 0.0  ;;  %7298 = vrot.lane.b32.xlu1 %v7234_v37, %s10027_s28  ;;  %v7240_v21 = vrot.slane %v7238_v23, 1  ;;  %v7059_v40 = vcombine.low %v7051_v46, %v7058_v35  ;;  %9675 = vmatprep.subr.bf16.mxu0 %v9954_v9  ;;  %v9961_v9 = vld [vmem:[#allocation2 + $0x3f8] sm:$0xff]  }
 0xc94   :  { %v11647_v36 = vrot.slane %v6859_v12, %v10147_v2  ;;  %v11650_v60 = vrot.slane %v6860_v24, %v10147_v2  ;;  %v6890_v7 = vcombine.high %v11641_v31, %v11641_v31  ;;  %v9663_v48 = vpop.f32.mrb[36].mxu1  ;;  %v11654_v15 = vcombine.low %v6843_v51, %v6867_v3  ;;  %9676 = vmatpush3.bf16.msra.mxu0 %v9955_v26 }
 0xc95   :  { %v6734_v50 = vmax.f32 %v6717_v1, 0.0  ;;  %v9664_v11 = vpop.f32.mrb[37].mxu1  ;;  %v7127_v5 = vrot.slane %v11641_v31, %v10147_v2  ;;  %v7241_v20 = vor.u32 %v7240_v21, %v7236_v38  ;;  %v11670_v25 = vrot.slane %v7059_v40, %v10147_v2 }
 0xc96   :  { %v6892_v34 = vcombine.high %v11650_v60, %v11650_v60  ;;  %v9365_v33 = vcombine.high %v6867_v3, %v11647_v36  ;;  %v11663_v27 = vcombine.low %v11650_v60, %v6890_v7  ;;  %v9666_v47 = vpop.f32.mrb[38].mxu1  ;;  %v7332_v32 = vrot.slane %v11647_v36, %v10147_v2  ;;  %v9959_v36 = vld [vmem:[#allocation2 + $0x3f0] sm:$0xff]  }
 0xc97   :  { %v6739_v14 = vpack.c.bf16 %v6734_v50, %v6733_v43  ;;  %v9363_v29 = vpack.c.bf16 %v6734_v50, %v6734_v50  ;;  %v9665_v13 = vadd.f32 %v9664_v11, %v9663_v48  ;;  %v9667_v10 = vpop.f32.mrb[39].mxu1  ;;  %v7325_v46 = vrot.slane %v11654_v15, %v10147_v2  ;;  %7300 = vrot.lane.b32.xlu1 %v7241_v20, %s10027_s28  ;;  %v9956_v50 = vld [vmem:[#allocation2 + $0x428] sm:$0xff]  }
 0xc98   :  { %v7105_v19 = vcombine.low %v7097_v16, %v7104_v62  ;;  %v7074_v57 = vrot.slane %v11632_v42, %v10147_v2  ;;  %v7120_v0 = vrot.slane %v9365_v33, %v10147_v2  ;;  %v7245_v56 = vshll.u32 %v11670_v25, 16  ;;  %9677 = vmatprep.subr.bf16.mxu0 %v9956_v50 }
 0xc99   :  { %v6900_v6 = vrot.slane %v6739_v14, %v10147_v2  ;;  %v6907_v28 = vrot.slane %v9363_v29, %v10147_v2  ;;  %v6722_v45 = vadd.f32 %v9665_v13, %v11593_v63  ;;  %v7081_v17 = vrot.slane %v6842_v59, %v10147_v2 }
 0xc9a   :  { %v11681_v30 = vrot.slane %v7105_v19, %v10147_v2  ;;  %v7243_v22 = vshrl.u32 %v11670_v25, 16  ;;  %v7247_v42 = vrot.slane %v7245_v56, 1  ;;  %v7143_v31 = vrot.slane %v11663_v27, %v10147_v2  ;;  %v9957_v27 = vld [vmem:[#allocation2 + $0x3e8] sm:$0xff]  }
 0xc9b   :  { %v6908_v39 = vcombine.high %v6900_v6, %v6900_v6  ;;  %v6909_v55 = vcombine.high %v6907_v28, %v6907_v28  ;;  %v6916_v63 = vrot.slane %v6900_v6, %v10147_v2  ;;  %v6923_v18 = vrot.slane %v6907_v28, %v10147_v2  ;;  %9678 = vmatpush3.bf16.msra.mxu0 %v9957_v27 }
 0xc9c   :  { %v6735_v35 = vmax.f32 %v6722_v45, 0.0  ;;  %v7259_v4 = vshll.u32 %v11681_v30, 16  ;;  %v7082_v61 = vcombine.low %v7074_v57, %v7081_v17  ;;  %v7248_v16 = vor.u32 %v7247_v42, %v7243_v22  ;;  %v9958_v45 = vld [vmem:[#allocation2 + $0x430] sm:$0xff]  }
 0xc9d   :  { %v6930_v54 = vrot.slane %v6908_v39, %v10147_v2  ;;  %v11690_v62 = vrot.slane %v6909_v55, %v10147_v2  ;;  %v6938_v59 = vcombine.high %v6916_v63, %v6916_v63  ;;  %v7257_v51 = vshrl.u32 %v11681_v30, 16  ;;  %9679 = vmatprep.subr.bf16.mxu0 %v9958_v45 }
 0xc9e   :  { %v6740_v58 = vpack.c.bf16 %v6735_v35, %v6735_v35  ;;  %v7261_v49 = vrot.slane %v7259_v4, 1  ;;  %7302 = vrot.lane.b32.xlu0 %v7248_v16, %s10027_s28  ;;  %v11700_v23 = vrot.slane %v7082_v61, %v10147_v2  ;;  %v7150_v43 = vrot.slane %v6892_v34, %v10147_v2 }
 0xc9f   :  { %v6940_v12 = vcombine.high %v6930_v54, %v6930_v54  ;;  %v7159_v24 = vcombine.low %v6916_v63, %v6930_v54  ;;  %v7173_v3 = vrot.slane %v6938_v59, %v10147_v2  ;;  %v9366_v1 = vcombine.high %v6923_v18, %v11690_v62  ;;  %9680 = vmatpush3.bf16.msra.mxu0 %v9959_v36  ;;  %v9960_v54 = vld [vmem:[#allocation2 + $0x438] sm:$0xff]  }
 0xca0   :  { %v6948_v37 = vrot.slane %v6740_v58, %v10147_v2  ;;  %v7262_v38 = vor.u32 %v7261_v49, %v7257_v51  ;;  %v7196_v7 = vrot.slane %v11690_v62, %v10147_v2  ;;  %v7128_v48 = vcombine.low %v7120_v0, %v7127_v5  ;;  %9681 = vmatprep.subr.bf16.mxu0 %v9960_v54 }
 0xca1   :  { %v7182_v60 = vcombine.low %v6940_v12, %v6923_v18  ;;  %v7166_v11 = vrot.slane %v7159_v24, %v10147_v2  ;;  %v7212_v21 = vrot.slane %v9366_v1, %v10147_v2  ;;  %v7250_v47 = vshrl.u32 %v11700_v23, 16 }
 0xca2   :  { %v6949_v40 = vcombine.high %v6948_v37, %v6948_v37  ;;  %v6956_v33 = vrot.slane %v6948_v37, %v10147_v2  ;;  %7306 = vrot.lane.b32.xlu1 %v7262_v38, %s10027_s28  ;;  %v7252_v14 = vshll.u32 %v11700_v23, 16  ;;  %v7151_v29 = vcombine.low %v7143_v31, %v7150_v43  ;;  %v9962_v31 = vld [vmem:[#allocation2 + $0x440] sm:$0xff]  }
 0xca3   :  { %v11712_v34 = vrot.slane %v7128_v48, %v10147_v2  ;;  %v7333_v20 = vcombine.low %v7325_v46, %v7332_v32  ;;  %v7189_v19 = vrot.slane %v7182_v60, %v10147_v2  ;;  %v7174_v42 = vcombine.low %v7166_v11, %v7173_v3  ;;  %9682 = vmatpush3.bf16.msra.mxu0 %v9961_v9  ;;  %v9963_v38 = vld [vmem:[#allocation2 + $0x400] sm:$0xff]  }
 0xca4   :  { %v6963_v5 = vrot.slane %v6949_v40, %v10147_v2  ;;  %v6964_v13 = vcombine.high %v6956_v33, %v6956_v33  ;;  %v7219_v10 = vrot.slane %v6956_v33, %v10147_v2  ;;  %v7254_v41 = vrot.slane %v7252_v14, 1  ;;  %9683 = vmatprep.subr.bf16.mxu0 %v9962_v31 }
 0xca5   :  { %v11724_v6 = vrot.slane %v7151_v29, %v10147_v2  ;;  %v7266_v28 = vshll.u32 %v11712_v34, 16  ;;  %v11728_v56 = vrot.slane %v7333_v20, %v10147_v2  ;;  %v7264_v32 = vshrl.u32 %v11712_v34, 16 }
 0xca6   :  { %v6965_v57 = vcombine.high %v6963_v5, %v6963_v5  ;;  %v7220_v53 = vcombine.low %v7212_v21, %v7219_v10  ;;  %v7341_v0 = vcombine.low %v6963_v5, %v6964_v13  ;;  %v7255_v17 = vor.u32 %v7254_v41, %v7250_v47 }
 0xca7   :  { %v7273_v15 = vshll.u32 %v11724_v6, 16  ;;  %v7268_v46 = vrot.slane %v7266_v28, 1  ;;  %v7271_v63 = vshrl.u32 %v11724_v6, 16  ;;  %v7367_v22 = vshll.u32 %v11728_v56, 16  ;;  %9684 = vmatpush3.bf16.msra.mxu0 %v9963_v38 }
 0xca8   :  { %v7348_v39 = vrot.slane %v7341_v0, %v10147_v2  ;;  %v7355_v55 = vrot.slane %v6965_v57, %v10147_v2  ;;  %7304 = vrot.lane.b32.xlu0 %v7255_v17, %s10027_s28  ;;  %v7197_v4 = vcombine.low %v7189_v19, %v7196_v7  ;;  %v11738_v59 = vrot.slane %v7220_v53, %v10147_v2 }
 0xca9   :  { %v7275_v18 = vrot.slane %v7273_v15, 1  ;;  %v7269_v35 = vor.u32 %v7268_v46, %v7264_v32  ;;  %v7369_v62 = vrot.slane %v7367_v22, 1  ;;  %v11741_v16 = vrot.slane %v7174_v42, %v10147_v2 }
 0xcaa   :  { %v7356_v61 = vcombine.low %v7348_v39, %v7355_v55  ;;  %v11744_v51 = vrot.slane %v7197_v4, %v10147_v2  ;;  %v7365_v49 = vshrl.u32 %v11728_v56, 16  ;;  %v7294_v3 = vshll.u32 %v11738_v59, 16 }
 0xcab   :  { %v7276_v58 = vor.u32 %v7275_v18, %v7271_v63  ;;  %v7280_v12 = vshll.u32 %v11741_v16, 16  ;;  %v7278_v60 = vshrl.u32 %v11741_v16, 16  ;;  %v7292_v33 = vshrl.u32 %v11738_v59, 16 }
 0xcac   :  { %v11748_v26 = vrot.slane %v7356_v61, %v10147_v2  ;;  %7308 = vrot.lane.b32.xlu0 %v7269_v35, %s10027_s28  ;;  %v7287_v24 = vshll.u32 %v11744_v51, 16  ;;  %v7370_v1 = vor.u32 %v7369_v62, %v7365_v49  ;;  %v7285_v43 = vshrl.u32 %v11744_v51, 16 }
 0xcad   :  { %7310 = vrot.lane.b32.xlu1 %v7276_v58, %s10027_s28  ;;  %v7282_v7 = vrot.slane %v7280_v12, 1  ;;  %v7296_v21 = vrot.slane %v7294_v3, 1 }
 0xcae   :  { %v7374_v37 = vshll.u32 %v11748_v26, 16  ;;  %v7289_v48 = vrot.slane %v7287_v24, 1  ;;  %v7372_v27 = vshrl.u32 %v11748_v26, 16 }
 0xcaf   :  { %v7283_v50 = vor.u32 %v7282_v7, %v7278_v60  ;;  %v7297_v47 = vor.u32 %v7296_v21, %v7292_v33 }
 0xcb0   :  { %7378 = vrot.lane.b32.xlu0 %v7370_v1, %s10027_s28  ;;  %v7290_v11 = vor.u32 %v7289_v48, %v7285_v43  ;;  %v7376_v40 = vrot.slane %v7374_v37, 1 }
 0xcb1   :  { %7312 = vrot.lane.b32.xlu1 %v7283_v50, %s10027_s28 }
 0xcb2   :  { %v7377_v14 = vor.u32 %v7376_v40, %v7372_v27 }
 0xcb4   :  { %7314 = vrot.lane.b32.xlu0 %v7290_v11, %s10027_s28 }
 0xcb5   :  { %7316 = vrot.lane.b32.xlu1 %v7297_v47, %s10027_s28 }
 0xcb8   :  { %7380 = vrot.lane.b32.xlu0 %v7377_v14, %s10027_s28 }
 0xd05   :  { %v7299_v29 = vpop.permute.xlu1 %7298 }
 0xd06   :  { %v7383_v13 = vsel %vm656_vm10, %v11615_v44, %v7299_v29 }
 0xd09   :  { %v7301_v5 = vpop.permute.xlu1 %7300 }
 0xd0a   :  { %v7385_v10 = vsel %vm656_vm10, %v11626_v8, %v7301_v5 }
 0xd0b   :  { %v7418_v20 = vcombine.low %v7383_v13, %v7385_v10 }
 0xd0d   :  { %v7425_v19 = vrot.slane %v7418_v20, %v10147_v2 }
 0xd0f   :  { %v7433_v41 = vrot.slane %v7425_v19, %v10147_v2  ;;  %v7426_v45 = vcombine.high %v7425_v19, %v7425_v19 }
 0xd10   :  { %v7303_v28 = vpop.permute.xlu0 %7302 }
 0xd11   :  { %v7387_v57 = vsel %vm656_vm10, %v11670_v25, %v7303_v28  ;;  %v7441_v0 = vcombine.high %v7433_v41, %v7433_v41  ;;  %v7440_v17 = vrot.slane %v7426_v45, %v10147_v2 }
 0xd12   :  { %v7442_v53 = vcombine.low %v7385_v10, %v7387_v57 }
 0xd13   :  { %v7733_v63 = vcombine.low %v7433_v41, %v7440_v17 }
 0xd14   :  { %v7449_v36 = vrot.slane %v7442_v53, %v10147_v2  ;;  %v7307_v44 = vpop.permute.xlu1 %7306 }
 0xd15   :  { %v7391_v55 = vsel %vm656_vm10, %v11681_v30, %v7307_v44  ;;  %v11784_v12 = vrot.slane %v7733_v63, %v10147_v2 }
 0xd16   :  { %v7450_v15 = vcombine.high %v7449_v36, %v7449_v36  ;;  %v7457_v8 = vrot.slane %v7449_v36, %v10147_v2 }
 0xd18   :  { %v7464_v32 = vrot.slane %v7450_v15, %v10147_v2  ;;  %v7664_v46 = vunpack.i.h.s16 %v7457_v8  ;;  %v9367_v39 = vpack.i.b16 %v7457_v8, %v7441_v0  ;;  %v7465_v54 = vcombine.high %v7457_v8, %v7457_v8 }
 0xd1a   :  { %v7305_v22 = vpop.permute.xlu0 %7304  ;;  %v7666_v25 = vunpack.i.h.s16 %v7464_v32  ;;  %v9368_v18 = vpack.i.b16 %v7464_v32, %v7664_v46 }
 0xd1b   :  { %v7389_v35 = vsel %vm656_vm10, %v11700_v23, %v7305_v22 }
 0xd1c   :  { %v7466_v42 = vcombine.low %v7387_v57, %v7389_v35  ;;  %v7490_v4 = vcombine.low %v7389_v35, %v7391_v55  ;;  %v7734_v62 = vcombine.low %v9367_v39, %v9368_v18  ;;  %v9369_v30 = vpack.i.b16 %v7465_v54, %v7666_v25 }
 0xd1e   :  { %v7473_v61 = vrot.slane %v7466_v42, %v10147_v2  ;;  %v7497_v9 = vrot.slane %v7490_v4, %v10147_v2  ;;  %v7309_v49 = vpop.permute.xlu0 %7308  ;;  %v11791_v3 = vrot.slane %v7734_v62, %v10147_v2 }
 0xd1f   :  { %v7311_v58 = vpop.permute.xlu1 %7310  ;;  %v7393_v23 = vsel %vm656_vm10, %v11712_v34, %v7309_v49 }
 0xd20   :  { %v7395_v24 = vsel %vm656_vm10, %v11724_v6, %v7311_v58  ;;  %v7474_v31 = vcombine.high %v7473_v61, %v7473_v61  ;;  %v7481_v1 = vrot.slane %v7473_v61, %v10147_v2  ;;  %v7498_v37 = vcombine.high %v7497_v9, %v7497_v9 }
 0xd21   :  { %v7505_v38 = vrot.slane %v7497_v9, %v10147_v2  ;;  %v7538_v60 = vcombine.low %v7393_v23, %v7395_v24  ;;  %v7766_v7 = vcombine.high %v11784_v12, %v11791_v3  ;;  %v7765_v34 = vcombine.low %v11784_v12, %v11791_v3 }
 0xd22   :  { %v7488_v43 = vrot.slane %v7474_v31, %v10147_v2  ;;  %v7489_v48 = vcombine.high %v7481_v1, %v7481_v1  ;;  %v7512_v6 = vrot.slane %v7498_v37, %v10147_v2  ;;  %v7379_v50 = vpop.permute.xlu0 %7378  ;;  %v7735_v14 = vcombine.low %v9369_v30, %v7481_v1 }
 0xd23   :  { %v7513_v11 = vcombine.high %v7505_v38, %v7505_v38  ;;  %v7674_v21 = vunpack.i.h.s16 %v7505_v38  ;;  %v7545_v40 = vrot.slane %v7538_v60, %v10147_v2  ;;  %v7403_v33 = vsel %vm656_vm10, %v11728_v56, %v7379_v50  ;;  %v7313_v5 = vpop.permute.xlu1 %7312 }
 0xd24   :  { %v7676_v27 = vunpack.i.h.s16 %v7512_v6  ;;  %v9370_v47 = vpack.i.b16 %v7505_v38, %v7489_v48  ;;  %v7514_v29 = vcombine.low %v7391_v55, %v7403_v33  ;;  %v7397_v20 = vsel %vm656_vm10, %v11741_v16, %v7313_v5 }
 0xd25   :  { %v7546_v13 = vcombine.high %v7545_v40, %v7545_v40  ;;  %v7553_v10 = vrot.slane %v7545_v40, %v10147_v2  ;;  %v7782_v19 = vrot.slane %v7766_v7, %v10147_v2  ;;  %v11808_v41 = vpack.i.b16 %v7512_v6, %v7674_v21 }
 0xd26   :  { %v9372_v28 = vpack.i.b16 %v7513_v11, %v7676_v27  ;;  %v7521_v45 = vrot.slane %v7514_v29, %v10147_v2  ;;  %v7562_v57 = vcombine.low %v7395_v24, %v7397_v20  ;;  %v7315_v56 = vpop.permute.xlu0 %7314  ;;  %v7736_v53 = vcombine.low %v7488_v43, %v9370_v47 }
 0xd27   :  { %v7560_v0 = vrot.slane %v7546_v13, %v10147_v2  ;;  %v7684_v36 = vunpack.i.h.s16 %v7553_v10  ;;  %v7399_v17 = vsel %vm656_vm10, %v11744_v51, %v7315_v56  ;;  %v7317_v32 = vpop.permute.xlu1 %7316  ;;  %v7561_v46 = vcombine.high %v7553_v10, %v7553_v10 }
 0xd28   :  { %v7522_v44 = vcombine.high %v7521_v45, %v7521_v45  ;;  %v7529_v15 = vrot.slane %v7521_v45, %v10147_v2  ;;  %v7569_v16 = vrot.slane %v7562_v57, %v10147_v2  ;;  %v7586_v8 = vcombine.low %v7397_v20, %v7399_v17 }
 0xd29   :  { %v7686_v39 = vunpack.i.h.s16 %v7560_v0  ;;  %v9374_v55 = vpack.i.b16 %v7560_v0, %v7684_v36  ;;  %v7401_v63 = vsel %vm656_vm10, %v11738_v59, %v7317_v32  ;;  %v7757_v4 = vrot.slane %v7735_v14, %v10147_v2 }
 0xd2a   :  { %v7536_v22 = vrot.slane %v7522_v44, %v10147_v2  ;;  %v7537_v25 = vcombine.high %v7529_v15, %v7529_v15  ;;  %v7570_v18 = vcombine.high %v7569_v16, %v7569_v16  ;;  %v7577_v35 = vrot.slane %v7569_v16, %v10147_v2  ;;  %v7381_v62 = vpop.permute.xlu0 %7380 }
 0xd2b   :  { %v7593_v51 = vrot.slane %v7586_v8, %v10147_v2  ;;  %v7610_v42 = vcombine.low %v7399_v17, %v7401_v63  ;;  %v7764_v54 = vrot.slane %v7736_v53, %v10147_v2  ;;  %v9375_v49 = vpack.i.b16 %v7561_v46, %v7686_v39 }
 0xd2c   :  { %v9373_v61 = vpack.i.b16 %v7553_v10, %v7537_v25  ;;  %v7800_v9 = vcombine.low %v7529_v15, %v7536_v22  ;;  %v7584_v58 = vrot.slane %v7570_v18, %v10147_v2  ;;  %v7585_v59 = vcombine.high %v7577_v35, %v7577_v35 }
 0xd2d   :  { %v7594_v12 = vcombine.high %v7593_v51, %v7593_v51  ;;  %v7601_v30 = vrot.slane %v7593_v51, %v10147_v2  ;;  %v7617_v24 = vrot.slane %v7610_v42, %v10147_v2  ;;  %v7802_v23 = vcombine.low %v9375_v49, %v7577_v35 }
 0xd2e   :  { %v7767_v3 = vcombine.low %v7757_v4, %v7764_v54  ;;  %v7768_v31 = vcombine.high %v7757_v4, %v7764_v54  ;;  %v7405_v1 = vsel %vm656_vm10, %v11748_v26, %v7381_v62  ;;  %v7775_v7 = vrot.slane %v7765_v34, %v10147_v2 }
 0xd2f   :  { %v7608_v37 = vrot.slane %v7594_v12, %v10147_v2  ;;  %v7609_v38 = vcombine.high %v7601_v30, %v7601_v30  ;;  %v7694_v60 = vunpack.i.h.s16 %v7601_v30  ;;  %v7618_v43 = vcombine.high %v7617_v24, %v7617_v24 }
 0xd30   :  { %v7625_v48 = vrot.slane %v7617_v24, %v10147_v2  ;;  %v7796_v6 = vrot.slane %v7768_v31, %v10147_v2  ;;  %v7634_v50 = vcombine.low %v7401_v63, %v7405_v1  ;;  %v9376_v21 = vpack.i.b16 %v7601_v30, %v7585_v59 }
 0xd31   :  { %v7696_v11 = vunpack.i.h.s16 %v7608_v37  ;;  %v7789_v40 = vrot.slane %v7767_v3, %v10147_v2  ;;  %v7799_v33 = vcombine.low %v11808_v41, %v9372_v28  ;;  %v9377_v27 = vpack.i.b16 %v7608_v37, %v7694_v60 }
 0xd32   :  { %v7632_v26 = vrot.slane %v7618_v43, %v10147_v2  ;;  %v7798_v47 = vcombine.low %v7782_v19, %v7796_v6  ;;  %v7641_v14 = vrot.slane %v7634_v50, %v10147_v2  ;;  %v7633_v34 = vcombine.high %v7625_v48, %v7625_v48  ;;  %v9965_v43 = vld [vmem:[#allocation2 + $0x448] sm:$0xff]   ;;  %v9967_v6 = vld [vmem:[#allocation2 + $0x450] sm:$0xff]   ;;  %v9968_v50 = vld [vmem:[#allocation2 + $0x498] sm:$0xff]  }
 0xd33   :  { %v9378_v29 = vpack.i.b16 %v7609_v38, %v7696_v11  ;;  %v7797_v5 = vcombine.low %v7775_v7, %v7789_v40  ;;  %v7801_v13 = vcombine.low %v9373_v61, %v9374_v55  ;;  %v7809_v45 = vrot.slane %v7799_v33, %v10147_v2  ;;  %v9964_v7 = vld [vmem:[#allocation2 + $0x488] sm:$0xff]   ;;  %v9969_v11 = vld [vmem:[#allocation2 + $0x458] sm:$0xff]   ;;  %v9971_v40 = vld [vmem:[#allocation2 + $0x460] sm:$0xff]  }
 0xd34   :  { %8089 = vmatprep.mubr.bf16.mxu0 %v7798_v47  ;;  %v7642_v10 = vcombine.high %v7641_v14, %v7641_v14  ;;  %v7649_v20 = vrot.slane %v7641_v14, %v10147_v2  ;;  %v7816_v57 = vrot.slane %v7800_v9, %v10147_v2  ;;  %v7867_v56 = vcombine.low %v7625_v48, %v7632_v26  ;;  %v9966_v48 = vld [vmem:[#allocation2 + $0x490] sm:$0xff]  }
 0xd35   :  { %8090 = vmatmul.mubr.bf16.vlgmr.msra.gmra.mrb[48].mxu0 %v7797_v5  ;;  %v7823_v41 = vrot.slane %v7801_v13, %v10147_v2  ;;  %v7830_v19 = vrot.slane %v7802_v23, %v10147_v2  ;;  %v7866_v28 = vcombine.low %v9377_v27, %v9378_v29  ;;  %v7865_v17 = vcombine.low %v7584_v58, %v9376_v21  ;;  %v9970_v21 = vld [vmem:[#allocation2 + $0x4a0] sm:$0xff]  }
 0xd36   :  { %v7656_v53 = vrot.slane %v7642_v10, %v10147_v2  ;;  %v7657_v0 = vcombine.high %v7649_v20, %v7649_v20  ;;  %v7704_v36 = vunpack.i.h.s16 %v7649_v20  ;;  %v7832_v44 = vcombine.high %v7809_v45, %v7816_v57  ;;  %9709 = vmatprep.subr.bf16.mxu1 %v9964_v7 }
 0xd37   :  { %v7834_v15 = vcombine.high %v7823_v41, %v7830_v19  ;;  %v7831_v16 = vcombine.low %v7809_v45, %v7816_v57  ;;  %v7833_v8 = vcombine.low %v7823_v41, %v7830_v19  ;;  %v9379_v46 = vpack.i.b16 %v7649_v20, %v7633_v34  ;;  %9710 = vmatpush3.bf16.msra.mxu1 %v9965_v43 }
 0xd38   :  { %v7706_v32 = vunpack.i.h.s16 %v7656_v53  ;;  %v9380_v39 = vpack.i.b16 %v7656_v53, %v7704_v36  ;;  %v7882_v55 = vrot.slane %v7866_v28, %v10147_v2  ;;  %v7848_v63 = vrot.slane %v7832_v44, %v10147_v2  ;;  %9711 = vmatprep.subr.bf16.mxu1 %v9966_v48 }
 0xd39   :  { %v7862_v22 = vrot.slane %v7834_v15, %v10147_v2  ;;  %v7841_v25 = vrot.slane %v7831_v16, %v10147_v2  ;;  %v7855_v18 = vrot.slane %v7833_v8, %v10147_v2  ;;  %v7875_v51 = vrot.slane %v7865_v17, %v10147_v2 }
 0xd3a   :  { %v7868_v35 = vcombine.low %v9379_v46, %v9380_v39  ;;  %v9381_v54 = vpack.i.b16 %v7657_v0, %v7706_v32  ;;  %v7889_v62 = vrot.slane %v7867_v56, %v10147_v2 }
 0xd3b   :  { %v7864_v42 = vcombine.low %v7848_v63, %v7862_v22  ;;  %v7863_v4 = vcombine.low %v7841_v25, %v7855_v18  ;;  %v7898_v9 = vcombine.high %v7875_v51, %v7882_v55  ;;  %v7897_v58 = vcombine.low %v7875_v51, %v7882_v55  ;;  %9712 = vmatpush3.bf16.msra.mxu1 %v9967_v6 }
 0xd3c   :  { %v7896_v61 = vrot.slane %v7868_v35, %v10147_v2  ;;  %v7937_v49 = vrot.slane %v9381_v54, %v10147_v2  ;;  %9713 = vmatprep.subr.bf16.mxu1 %v9968_v50 }
 0xd3d   :  { %8097 = vmatprep.mubr.bf16.mxu0 %v7864_v42  ;;  %v7914_v30 = vrot.slane %v7898_v9, %v10147_v2  ;;  %v7907_v23 = vrot.slane %v7897_v58, %v10147_v2 }
 0xd3e   :  { %8098 = vmatmul.mubr.bf16.gmra.mrb[52].mxu0 %v7863_v4  ;;  %v7900_v59 = vcombine.high %v7889_v62, %v7896_v61  ;;  %v7899_v12 = vcombine.low %v7889_v62, %v7896_v61  ;;  %v7938_v31 = vcombine.high %v7937_v49, %v7937_v49  ;;  %v7945_v60 = vrot.slane %v7937_v49, %v10147_v2 }
 0xd3f   :  { %9714 = vmatpush3.bf16.msra.mxu1 %v9969_v11 }
 0xd40   :  { %v7928_v24 = vrot.slane %v7900_v59, %v10147_v2  ;;  %v7921_v3 = vrot.slane %v7899_v12, %v10147_v2  ;;  %v7952_v38 = vrot.slane %v7938_v31, %v10147_v2  ;;  %9715 = vmatprep.subr.bf16.mxu1 %v9970_v21 }
 0xd42   :  { %v7930_v1 = vcombine.low %v7914_v30, %v7928_v24  ;;  %v7929_v37 = vcombine.low %v7907_v23, %v7921_v3 }
 0xd43   :  { %9716 = vmatpush3.bf16.msra.mxu1 %v9971_v40 }
 0xd44   :  { %8105 = vmatprep.mubr.bf16.mxu0 %v7930_v1 }
 0xd46   :  { %8106 = vmatmul.mubr.bf16.gmra.mrb[56].mxu0 %v7929_v37 }
 0xd47   :  { %8113 = vmatprep.mubr.bf16.mxu0 %v7952_v38 }
 0xd4e   :  { %8114 = vmatmul.mubr.bf16.gmra.mrb[60].mxu0 %v7945_v60 }
 0xe08   :  { %v9685_v33 = vpop.f32.mrb[48].mxu0 }
 0xe09   :  { %v9686_v27 = vpop.f32.mrb[49].mxu0 }
 0xe0a   :  { %v11857_v26 = vadd.f32 %v9686_v27, %v9685_v33  ;;  %v9688_v47 = vpop.f32.mrb[50].mxu0 }
 0xe0b   :  { %v9689_v14 = vpop.f32.mrb[51].mxu0 }
 0xe0c   :  { %v8143_v29 = vmul.f32 %v11857_v26, %v11857_v26  ;;  %v11861_v34 = vadd.f32 %v9689_v14, %v9688_v47  ;;  %v8121_v5 = vsel %vm656_vm10, %v11857_v26, 0.0 }
 0xe0e   :  { %v8122_v13 = vsel %vm656_vm10, %v11861_v34, 0.0  ;;  %v8144_v10 = vmul.f32 %v11861_v34, %v11861_v34  ;;  %v8150_v45 = vsel %vm656_vm10, %v8143_v29, 0.0 }
 0xe0f   :  { %v8123_v20 = vadd.f32 %v8122_v13, %v8121_v5 }
 0xe10   :  { %v8151_v57 = vsel %vm656_vm10, %v8144_v10, 0.0 }
 0xe11   :  { %v8152_v56 = vadd.f32 %v8151_v57, %v8150_v45  ;;  %v9691_v41 = vpop.f32.mrb[52].mxu0 }
 0xe12   :  { %v9692_v19 = vpop.f32.mrb[53].mxu0 }
 0xe13   :  { %v11871_v28 = vadd.f32 %v9692_v19, %v9691_v41  ;;  %v9694_v53 = vpop.f32.mrb[54].mxu0 }
 0xe14   :  { %v9695_v0 = vpop.f32.mrb[55].mxu0 }
 0xe15   :  { %v8124_v36 = vsel %vm656_vm10, %v11871_v28, 0.0  ;;  %v8145_v17 = vmul.f32 %v11871_v28, %v11871_v28  ;;  %v11877_v44 = vadd.f32 %v9695_v0, %v9694_v53 }
 0xe16   :  { %v8125_v15 = vadd.f32 %v8124_v36, %v8123_v20 }
 0xe17   :  { %v8153_v16 = vsel %vm656_vm10, %v8145_v17, 0.0  ;;  %v8126_v8 = vsel %vm656_vm10, %v11877_v44, 0.0  ;;  %v8146_v32 = vmul.f32 %v11877_v44, %v11877_v44 }
 0xe18   :  { %v8154_v46 = vadd.f32 %v8153_v16, %v8152_v56  ;;  %v8127_v39 = vadd.f32 %v8126_v8, %v8125_v15 }
 0xe19   :  { %v8155_v55 = vsel %vm656_vm10, %v8146_v32, 0.0  ;;  %v9697_v63 = vpop.f32.mrb[56].mxu0 }
 0xe1a   :  { %v8156_v22 = vadd.f32 %v8155_v55, %v8154_v46  ;;  %v9698_v25 = vpop.f32.mrb[57].mxu0 }
 0xe1b   :  { %v9699_v18 = vadd.f32 %v9698_v25, %v9697_v63  ;;  %v9700_v35 = vpop.f32.mrb[58].mxu0 }
 0xe1c   :  { %v9701_v51 = vpop.f32.mrb[59].mxu0 }
 0xe1d   :  { %v8128_v42 = vsel %vm656_vm10, %v9699_v18, 0.0  ;;  %v8147_v4 = vmul.f32 %v9699_v18, %v9699_v18  ;;  %v9702_v54 = vadd.f32 %v9701_v51, %v9700_v35 }
 0xe1e   :  { %v8129_v62 = vadd.f32 %v8128_v42, %v8127_v39 }
 0xe1f   :  { %v8157_v61 = vsel %vm656_vm10, %v8147_v4, 0.0  ;;  %v8130_v9 = vsel %vm656_vm10, %v9702_v54, 0.0  ;;  %v8148_v58 = vmul.f32 %v9702_v54, %v9702_v54 }
 0xe20   :  { %v8158_v49 = vadd.f32 %v8157_v61, %v8156_v22  ;;  %v8131_v59 = vadd.f32 %v8130_v9, %v8129_v62  ;;  %v9972_v9 = vld [vmem:[#allocation2 + $0x4a8] sm:$0xff]  }
 0xe21   :  { %v8159_v12 = vsel %vm656_vm10, %v8148_v58, 0.0  ;;  %v9703_v30 = vpop.f32.mrb[60].mxu0  ;;  %9717 = vmatprep.subr.bf16.mxu1 %v9972_v9  ;;  %v9975_v9 = vld [vmem:[#allocation2 + $0x470] sm:$0xff]  }
 0xe22   :  { %v8160_v24 = vadd.f32 %v8159_v12, %v8158_v49  ;;  %v9704_v23 = vpop.f32.mrb[61].mxu0 }
 0xe23   :  { %v9705_v3 = vadd.f32 %v9704_v23, %v9703_v30  ;;  %v9706_v31 = vpop.f32.mrb[62].mxu0 }
 0xe24   :  { %v9707_v1 = vpop.f32.mrb[63].mxu0 }
 0xe25   :  { %v8133_v37 = vsel %vm8132_vm4, %v9705_v3, 0.0  ;;  %v8149_v38 = vmul.f32 %v9705_v3, %v9705_v3 }
 0xe26   :  { %v8134_v60 = vadd.f32 %v8133_v37, %v8131_v59 }
 0xe27   :  { %v8161_v7 = vsel %vm8132_vm4, %v8149_v38, 0.0 }
 0xe28   :  { %v8135_v43 = vrot.slane %v8134_v60, 4  ;;  %v8162_v48 = vadd.f32 %v8161_v7, %v8160_v24 }
 0xe2a   :  { %v8136_v6 = vadd.f32 %v8135_v43, %v8134_v60  ;;  %v8163_v50 = vrot.slane %v8162_v48, 4 }
 0xe2c   :  { %v8137_v11 = vrot.slane %v8136_v6, 2  ;;  %v8164_v21 = vadd.f32 %v8163_v50, %v8162_v48 }
 0xe2e   :  { %v8138_v40 = vadd.f32 %v8137_v11, %v8136_v6  ;;  %v8165_v33 = vrot.slane %v8164_v21, 2  ;;  %v9973_v11 = vld [vmem:[#allocation2 + $0x468] sm:$0xff]  }
 0xe2f   :  { %9718 = vmatpush3.bf16.msra.mxu1 %v9973_v11 }
 0xe30   :  { %v8139_v27 = vrot.slane %v8138_v40, 1  ;;  %v8166_v47 = vadd.f32 %v8165_v33, %v8164_v21 }
 0xe32   :  { %v8140_v14 = vadd.f32 %v8139_v27, %v8138_v40  ;;  %v8167_v29 = vrot.slane %v8166_v47, 1 }
 0xe34   :  { %v8142_v5 = vmul.f32 0.02, %v8140_v14  ;;  %v8168_v13 = vadd.f32 %v8167_v29, %v8166_v47 }
 0xe36   :  { %v8169_v10 = vmul.f32 0.02, %v8168_v13  ;;  %v8170_v20 = vmul.f32 %v8142_v5, %v8142_v5  ;;  %v8179_v45 = vsub.f32 %v9705_v3, %v8142_v5  ;;  %v8175_v57 = vsub.f32 %v11871_v28, %v8142_v5 }
 0xe37   :  { %v8176_v56 = vsub.f32 %v11877_v44, %v8142_v5  ;;  %v8173_v41 = vsub.f32 %v11857_v26, %v8142_v5  ;;  %v8174_v19 = vsub.f32 %v11861_v34, %v8142_v5  ;;  %v8177_v53 = vsub.f32 %v9699_v18, %v8142_v5 }
 0xe38   :  { %v8171_v0 = vsub.f32 %v8169_v10, %v8170_v20  ;;  %v8178_v36 = vsub.f32 %v9702_v54, %v8142_v5 }
 0xe3a   :  { %v8172_v17 = vmax.f32 %v8171_v0, 0.0 }
 0xe3c   :  { %v8180_v15 = vadd.f32 1e-05, %v8172_v17 }
 0xe3e   :  { %9984 = vrsqrt.f32 %v8180_v15 }
 0xe48   :  { %v9985_v16 = vpop.eup %9984 }
 0xe49   :  { %v8188_v8 = vmul.f32 %v9985_v16, %v8179_v45  ;;  %v8184_v32 = vmul.f32 %v9985_v16, %v8175_v57  ;;  %v8185_v46 = vmul.f32 %v9985_v16, %v8176_v56  ;;  %v8182_v39 = vmul.f32 %v9985_v16, %v8173_v41 }
 0xe4a   :  { %v8183_v55 = vmul.f32 %v9985_v16, %v8174_v19  ;;  %v8186_v63 = vmul.f32 %v9985_v16, %v8177_v53  ;;  %v8187_v28 = vmul.f32 %v9985_v16, %v8178_v36 }
 0xe4b   :  { %v8195_v22 = vmax.f32 %v8188_v8, 0.0  ;;  %v8191_v44 = vmax.f32 %v8184_v32, 0.0  ;;  %v8192_v25 = vmax.f32 %v8185_v46, 0.0  ;;  %v8189_v26 = vmax.f32 %v8182_v39, 0.0 }
 0xe4c   :  { %v8190_v35 = vmax.f32 %v8183_v55, 0.0  ;;  %v8193_v34 = vmax.f32 %v8186_v63, 0.0  ;;  %v8194_v18 = vmax.f32 %v8187_v28, 0.0 }
 0xe4d   :  { %v11893_v51 = vpack.c.bf16 %v8195_v22, %v8195_v22  ;;  %v8197_v42 = vpack.c.bf16 %v8192_v25, %v8191_v44  ;;  %v9399_v4 = vpack.c.bf16 %v8192_v25, %v8192_v25 }
 0xe4e   :  { %v8196_v54 = vpack.c.bf16 %v8190_v35, %v8189_v26  ;;  %v9398_v62 = vpack.c.bf16 %v8190_v35, %v8190_v35  ;;  %v8198_v61 = vpack.c.bf16 %v8194_v18, %v8193_v34  ;;  %v9400_v24 = vpack.c.bf16 %v8194_v18, %v8194_v18 }
 0xe4f   :  { %v8260_v58 = vrot.slane %v8197_v42, %v10147_v2  ;;  %v8267_v49 = vrot.slane %v9399_v4, %v10147_v2  ;;  %v8357_v59 = vrot.slane %v11893_v51, %v10147_v2  ;;  %v9974_v42 = vld [vmem:[#allocation2 + $0x4b0] sm:$0xff]  }
 0xe50   :  { %v8211_v12 = vrot.slane %v8196_v54, %v10147_v2  ;;  %v8218_v30 = vrot.slane %v9398_v62, %v10147_v2  ;;  %v8309_v50 = vrot.slane %v8198_v61, %v10147_v2  ;;  %v8316_v27 = vrot.slane %v9400_v24, %v10147_v2  ;;  %9719 = vmatprep.subr.bf16.mxu1 %v9974_v42 }
 0xe51   :  { %v8268_v23 = vcombine.high %v8260_v58, %v8260_v58  ;;  %v11902_v3 = vrot.slane %v8260_v58, %v10147_v2  ;;  %v8269_v31 = vcombine.high %v8267_v49, %v8267_v49  ;;  %v11905_v1 = vrot.slane %v8267_v49, %v10147_v2  ;;  %9720 = vmatpush3.bf16.msra.mxu1 %v9975_v9 }
 0xe52   :  { %v8219_v37 = vcombine.high %v8211_v12, %v8211_v12  ;;  %v11908_v38 = vrot.slane %v8211_v12, %v10147_v2  ;;  %v8220_v60 = vcombine.high %v8218_v30, %v8218_v30  ;;  %v11911_v7 = vrot.slane %v8218_v30, %v10147_v2 }
 0xe53   :  { %v11914_v43 = vrot.slane %v8268_v23, %v10147_v2  ;;  %v11917_v48 = vrot.slane %v8269_v31, %v10147_v2  ;;  %v8299_v6 = vcombine.high %v11905_v1, %v11905_v1  ;;  %v8298_v45 = vcombine.high %v11902_v3, %v11902_v3 }
 0xe54   :  { %v11923_v21 = vrot.slane %v8219_v37, %v10147_v2  ;;  %v8366_v40 = vunpack.i.h.s16 %v11908_v38  ;;  %v11927_v33 = vrot.slane %v8220_v60, %v10147_v2  ;;  %v11936_v5 = vcombine.high %v11911_v7, %v11911_v7 }
 0xe55   :  { %v8645_v47 = vcombine.low %v11902_v3, %v11914_v43  ;;  %v8392_v14 = vunpack.i.h.s16 %v11917_v48  ;;  %v8660_v29 = vcombine.low %v11917_v48, %v8299_v6  ;;  %v11940_v13 = vcombine.high %v11908_v38, %v11908_v38 }
 0xe56   :  { %v8368_v10 = vunpack.i.h.s16 %v11923_v21  ;;  %v11945_v20 = vcombine.high %v11927_v33, %v11927_v33  ;;  %v8376_v19 = vunpack.i.h.s16 %v11927_v33  ;;  %v9409_v53 = vpack.i.b16 %v11923_v21, %v8366_v40  ;;  %v9976_v40 = vld [vmem:[#allocation2 + $0x4b8] sm:$0xff]  }
 0xe57   :  { %v8652_v57 = vrot.slane %v8645_v47, %v10147_v2  ;;  %v11950_v56 = vpack.i.b16 %v8299_v6, %v8392_v14  ;;  %v8667_v41 = vrot.slane %v8660_v29, %v10147_v2  ;;  %v8378_v36 = vunpack.i.h.s16 %v11936_v5  ;;  %9721 = vmatprep.subr.bf16.mxu1 %v9976_v40 }
 0xe58   :  { %v9410_v0 = vpack.i.b16 %v11940_v13, %v8368_v10  ;;  %v11959_v17 = vcombine.high %v11923_v21, %v11923_v21  ;;  %v9411_v8 = vpack.i.b16 %v11936_v5, %v8376_v19  ;;  %v8300_v32 = vcombine.high %v11914_v43, %v11914_v43 }
 0xe59   :  { %v8659_v15 = vrot.slane %v8652_v57, %v10147_v2  ;;  %v8674_v16 = vrot.slane %v8667_v41, %v10147_v2  ;;  %v9412_v39 = vpack.i.b16 %v11945_v20, %v8378_v36  ;;  %v8386_v63 = vunpack.i.h.s16 %v8298_v45 }
 0xe5a   :  { %v8600_v46 = vcombine.low %v9409_v53, %v9410_v0  ;;  %v8615_v55 = vcombine.low %v11959_v17, %v11911_v7  ;;  %v8388_v28 = vunpack.i.h.s16 %v8300_v32  ;;  %v8317_v22 = vcombine.high %v8309_v50, %v8309_v50 }
 0xe5b   :  { %8726 = vrot.lane.b32.xlu0 %v8659_v15, %s10027_s28  ;;  %v11971_v44 = vrot.slane %v8309_v50, %v10147_v2  ;;  %v11975_v25 = vcombine.high %v11917_v48, %v11917_v48  ;;  %v8630_v35 = vcombine.low %v9411_v8, %v9412_v39  ;;  %v9421_v18 = vpack.i.b16 %v8300_v32, %v8386_v63  ;;  %v9978_v8 = vld [vmem:[#allocation2 + $0x4c0] sm:$0xff]  }
 0xe5c   :  { %v8607_v26 = vrot.slane %v8600_v46, %v10147_v2  ;;  %v8622_v34 = vrot.slane %v8615_v55, %v10147_v2  ;;  %v9422_v4 = vpack.i.b16 %v11905_v1, %v8388_v28  ;;  %v11981_v54 = vrot.slane %v8317_v22, %v10147_v2  ;;  %v9979_v55 = vld [vmem:[#allocation2 + $0x480] sm:$0xff]  }
 0xe5d   :  { %v8396_v62 = vunpack.i.h.s16 %v11975_v25  ;;  %v8398_v61 = vunpack.i.h.s16 %v11971_v44  ;;  %v8380_v49 = vunpack.i.h.s16 %v11945_v20  ;;  %v8637_v12 = vrot.slane %v8630_v35, %v10147_v2  ;;  %v9977_v20 = vld [vmem:[#allocation2 + $0x478] sm:$0xff]  }
 0xe5e   :  { %v8614_v58 = vrot.slane %v8607_v26, %v10147_v2  ;;  %v8318_v30 = vcombine.high %v8316_v27, %v8316_v27  ;;  %v8774_v24 = vcombine.low %v9421_v18, %v9422_v4  ;;  %v9417_v23 = vcombine.high %v11971_v44, %v11981_v54  ;;  %9722 = vmatpush3.bf16.msra.mxu1 %v9977_v20 }
 0xe5f   :  { %8728 = vrot.lane.b32.xlu0 %v8674_v16, %s10027_s28  ;;  %v9413_v31 = vpack.i.b16 %v11971_v44, %v8396_v62  ;;  %v9414_v37 = vpack.i.b16 %v11981_v54, %v8398_v61  ;;  %v8644_v60 = vrot.slane %v8637_v12, %v10147_v2  ;;  %v8629_v6 = vrot.slane %v8622_v34, %v10147_v2 }
 0xe60   :  { %8720 = vrot.lane.b32.xlu1 %v8614_v58, %s10027_s28  ;;  %v11997_v50 = vrot.slane %v8318_v30, %v10147_v2  ;;  %v12000_v11 = vrot.slane %v8316_v27, %v10147_v2  ;;  %v8781_v47 = vrot.slane %v8774_v24, %v10147_v2  ;;  %v8697_v14 = vrot.slane %v9417_v23, %v10147_v2 }
 0xe61   :  { %v8675_v29 = vcombine.low %v9413_v31, %v9414_v37  ;;  %v8382_v10 = vunpack.i.h.s16 %v11902_v3  ;;  %v8364_v57 = vrot.slane %v8357_v59, %v10147_v2  ;;  %v8370_v19 = vunpack.i.h.s16 %v11940_v13  ;;  %9723 = vmatprep.subr.bf16.mxu1 %v9978_v8 }
 0xe62   :  { %v8350_v45 = vcombine.high %v11997_v50, %v11997_v50  ;;  %v8406_v27 = vunpack.i.h.s16 %v12000_v11  ;;  %v8408_v41 = vunpack.i.h.s16 %v11997_v50  ;;  %v8788_v53 = vrot.slane %v8781_v47, %v10147_v2  ;;  %9724 = vmatpush3.bf16.msra.mxu1 %v9979_v55 }
 0xe63   :  { %8722 = vrot.lane.b32.xlu0 %v8629_v6, %s10027_s28  ;;  %v8348_v0 = vcombine.high %v12000_v11, %v12000_v11  ;;  %v9403_v36 = vpack.i.b16 %v11902_v3, %v8380_v49  ;;  %v8704_v51 = vrot.slane %v8697_v14, %v10147_v2  ;;  %v8682_v59 = vrot.slane %v8675_v29, %v10147_v2 }
 0xe64   :  { %8724 = vrot.lane.b32.xlu1 %v8644_v60, %s10027_s28  ;;  %v8412_v15 = vunpack.i.h.s16 %v8350_v45  ;;  %v8789_v16 = vcombine.low %v8350_v45, %v8364_v57  ;;  %v9415_v13 = vpack.i.b16 %v11997_v50, %v8406_v27  ;;  %v9404_v46 = vpack.i.b16 %v11914_v43, %v8382_v10 }
 0xe65   :  { %v9416_v32 = vpack.i.b16 %v8348_v0, %v8408_v41  ;;  %v8390_v39 = vunpack.i.h.s16 %v11905_v1  ;;  %v8464_v22 = vcombine.low %v11908_v38, %v11923_v21  ;;  %v8494_v26 = vcombine.low %v11927_v33, %v11936_v5 }
 0xe66   :  { %v12025_v63 = vpack.i.b16 %v8364_v57, %v8412_v15  ;;  %v8796_v28 = vrot.slane %v8789_v16, %v10147_v2  ;;  %v8509_v34 = vcombine.low %v9403_v36, %v9404_v46  ;;  %v8372_v1 = vunpack.i.h.s16 %v11959_v17 }
 0xe67   :  { %8732 = vrot.lane.b32.xlu0 %v8704_v51, %s10027_s28  ;;  %v8705_v35 = vcombine.low %v9415_v13, %v9416_v32  ;;  %v9405_v18 = vpack.i.b16 %v11917_v48, %v8390_v39  ;;  %v9401_v42 = vpack.i.b16 %v11959_v17, %v8370_v19  ;;  %v8410_v62 = vunpack.i.h.s16 %v8348_v0 }
 0xe68   :  { %8804 = vrot.lane.b32.xlu1 %v8788_v53, %s10027_s28  ;;  %v8803_v4 = vrot.slane %v8796_v28, %v10147_v2  ;;  %v9402_v21 = vpack.i.b16 %v11911_v7, %v8372_v1  ;;  %v8689_v33 = vrot.slane %v8682_v59, %v10147_v2  ;;  %v9420_v48 = vcombine.high %v11902_v3, %v11914_v43 }
 0xe69   :  { %v8524_v38 = vcombine.low %v9405_v18, %v11950_v56  ;;  %v8712_v5 = vrot.slane %v8705_v35, %v10147_v2  ;;  %v8347_v61 = vcombine.high %v11971_v44, %v11971_v44  ;;  %v8349_v56 = vcombine.high %v11981_v54, %v11981_v54 }
 0xe6a   :  { %v8479_v17 = vcombine.low %v9401_v42, %v9402_v21  ;;  %v8400_v7 = vunpack.i.h.s16 %v11981_v54  ;;  %v8539_v58 = vcombine.low %v11975_v25, %v11971_v44  ;;  %v9418_v49 = vpack.i.b16 %v8350_v45, %v8410_v62 }
 0xe6b   :  { %8806 = vrot.lane.b32.xlu0 %v8803_v4, %s10027_s28  ;;  %v8402_v9 = vunpack.i.h.s16 %v8347_v61  ;;  %v8719_v3 = vrot.slane %v8712_v5, %v10147_v2  ;;  %v8569_v30 = vcombine.low %v12000_v11, %v11997_v50  ;;  %v8471_v54 = vrot.slane %v8464_v22, %v10147_v2 }
 0xe6c   :  { %8730 = vrot.lane.b32.xlu1 %v8689_v33, %s10027_s28  ;;  %v9407_v43 = vpack.i.b16 %v8347_v61, %v8400_v7  ;;  %v8755_v24 = vcombine.low %v9418_v49, %v12025_v63  ;;  %v8486_v37 = vrot.slane %v8479_v17, %v10147_v2  ;;  %v8516_v44 = vrot.slane %v8509_v34, %v10147_v2 }
 0xe6d   :  { %v9408_v12 = vpack.i.b16 %v8349_v56, %v8402_v9  ;;  %v8501_v60 = vrot.slane %v8494_v26, %v10147_v2  ;;  %v8478_v40 = vrot.slane %v8471_v54, %v10147_v2  ;;  %v8747_v29 = vrot.slane %v9420_v48, %v10147_v2 }
 0xe6e   :  { %v8493_v50 = vrot.slane %v8486_v37, %v10147_v2  ;;  %v8523_v11 = vrot.slane %v8516_v44, %v10147_v2  ;;  %v8531_v19 = vrot.slane %v8524_v38, %v10147_v2  ;;  %v8546_v15 = vrot.slane %v8539_v58, %v10147_v2 }
 0xe6f   :  { %v8554_v23 = vcombine.low %v9407_v43, %v9408_v12  ;;  %v8508_v47 = vrot.slane %v8501_v60, %v10147_v2  ;;  %v8754_v51 = vrot.slane %v8747_v29, %v10147_v2  ;;  %v8762_v22 = vrot.slane %v8755_v24, %v10147_v2 }
 0xe70   :  { %8734 = vrot.lane.b32.xlu1 %v8719_v3, %s10027_s28  ;;  %v8538_v46 = vrot.slane %v8531_v19, %v10147_v2  ;;  %v8553_v28 = vrot.slane %v8546_v15, %v10147_v2  ;;  %v8576_v26 = vrot.slane %v8569_v30, %v10147_v2 }
 0xe71   :  { %v8561_v59 = vrot.slane %v8554_v23, %v10147_v2  ;;  %v8769_v5 = vrot.slane %v8762_v22, %v10147_v2 }
 0xe72   :  { %v8583_v48 = vrot.slane %v8576_v26, %v10147_v2 }
 0xe73   :  { %v8568_v63 = vrot.slane %v8561_v59, %v10147_v2 }
 0xecd   :  { %v8727_v31 = vpop.permute.xlu0 %8726 }
 0xece   :  { %v8819_v57 = vsel %vm656_vm10, %v8523_v11, %v8727_v31 }
 0xed1   :  { %v8729_v25 = vpop.permute.xlu0 %8728 }
 0xed2   :  { %v8721_v6 = vpop.permute.xlu1 %8720  ;;  %v8822_v1 = vsel %vm656_vm10, %v8538_v46, %v8729_v25 }
 0xed3   :  { %v8810_v10 = vsel %vm656_vm10, %v8478_v40, %v8721_v6  ;;  %v9423_v6 = vld [vmem:[%s12123_s4 + $0x6] ss:$0 sm:$0xff] }
 0xed5   :  { %v8723_v14 = vpop.permute.xlu0 %8722 }
 0xed6   :  { %v8725_v20 = vpop.permute.xlu1 %8724  ;;  %v8813_v45 = vsel %vm656_vm10, %v8493_v50, %v8723_v14 }
 0xed7   :  { %v8816_v27 = vsel %vm656_vm10, %v8508_v47, %v8725_v20  ;;  %v8848_v41 = vcombine.low %v8810_v10, %v8813_v45 }
 0xed8   :  { %v8864_v53 = vcombine.low %v8816_v27, %v8819_v57  ;;  %v8856_v0 = vcombine.low %v8813_v45, %v8816_v27 }
 0xed9   :  { %v8855_v36 = vrot.slane %v8848_v41, %v10991_v52  ;;  %v8733_v13 = vpop.permute.xlu0 %8732 }
 0xeda   :  { %v8863_v16 = vrot.slane %v8856_v0, %v10991_v52  ;;  %v8805_v8 = vpop.permute.xlu1 %8804  ;;  %v8871_v35 = vrot.slane %v8864_v53, %v10991_v52  ;;  %v8828_v42 = vsel %vm656_vm10, %v8568_v63, %v8733_v13 }
 0xedb   :  { %v8834_v32 = vsel %vm656_vm10, %v8754_v51, %v8805_v8 }
 0xedc   :  { %v8916_v39 = vcombine.low %v8855_v36, %v8863_v16  ;;  %v8872_v55 = vcombine.low %v8819_v57, %v8834_v32 }
 0xedd   :  { %v8807_v33 = vpop.permute.xlu0 %8806 }
 0xede   :  { %v8879_v34 = vrot.slane %v8872_v55, %v10991_v52  ;;  %v8731_v18 = vpop.permute.xlu1 %8730  ;;  %v8924_v7 = vrot.slane %v8916_v39, %v10991_v52  ;;  %v8837_v58 = vsel %vm656_vm10, %v8769_v5, %v8807_v33 }
 0xedf   :  { %v8825_v4 = vsel %vm656_vm10, %v8553_v28, %v8731_v18 }
 0xee0   :  { %v8917_v62 = vcombine.low %v8871_v35, %v8879_v34  ;;  %v8880_v38 = vcombine.low %v8822_v1, %v8825_v4  ;;  %v8888_v21 = vcombine.low %v8825_v4, %v8828_v42 }
 0xee2   :  { %v8887_v61 = vrot.slane %v8880_v38, %v10991_v52  ;;  %v8895_v17 = vrot.slane %v8888_v21, %v10991_v52  ;;  %v8735_v56 = vpop.permute.xlu1 %8734  ;;  %v8931_v9 = vrot.slane %v8917_v62, %v10991_v52 }
 0xee3   :  { %v8831_v49 = vsel %vm656_vm10, %v8583_v48, %v8735_v56 }
 0xee4   :  { %v8934_v3 = vcombine.low %v8887_v61, %v8895_v17  ;;  %v8896_v43 = vcombine.low %v8828_v42, %v8831_v49  ;;  %v8904_v12 = vcombine.low %v8831_v49, %v8837_v58  ;;  %v8932_v30 = vcombine.low %v8924_v7, %v8931_v9 }
 0xee5   :  { %v8933_v24 = vcombine.high %v8924_v7, %v8931_v9 }
 0xee6   :  { %v8903_v2 = vrot.slane %v8896_v43, %v10991_v52  ;;  %v8911_v23 = vrot.slane %v8904_v12, %v10991_v52  ;;  %v8942_v54 = vrot.slane %v8934_v3, %v10991_v52 }
 0xee7   :  { %9084 = vmatprep.mubr.bf16.mxu1 %v8933_v24 }
 0xee8   :  { %v8935_v31 = vcombine.low %v8903_v2, %v8911_v23  ;;  %9085 = vmatmul.mubr.bf16.vlgmr.msra.gmra.mrb[40].mxu1 %v8932_v30 }
 0xeea   :  { %v8949_v37 = vrot.slane %v8935_v31, %v10991_v52 }
 0xeec   :  { %v8951_v44 = vcombine.high %v8942_v54, %v8949_v37  ;;  %v8950_v25 = vcombine.low %v8942_v54, %v8949_v37 }
 0xeee   :  { %9092 = vmatprep.mubr.bf16.mxu1 %v8951_v44 }
 0xef0   :  { %9093 = vmatmul.mubr.bf16.gmra.mrb[44].mxu1 %v8950_v25 }
 0xfbb   :  { %v9725_v60 = vpop.f32.mrb[40].mxu1 }
 0xfbc   :  { %v9726_v40 = vpop.f32.mrb[41].mxu1 }
 0xfbd   :  { %v9727_v50 = vadd.f32 %v9726_v40, %v9725_v60  ;;  %v9728_v11 = vpop.f32.mrb[42].mxu1 }
 0xfbe   :  { %v9729_v47 = vpop.f32.mrb[43].mxu1 }
 0xfbf   :  { %v9087_v14 = vadd.f32 %v9727_v50, %v9423_v6  ;;  %v9730_v29 = vadd.f32 %v9729_v47, %v9728_v11 }
 0xfc1   :  { %v9101_v10 = vsub.f32 0.0, %v9087_v14  ;;  %v9090_v20 = vadd.f32 %v9730_v29, %v9423_v6 }
 0xfc3   :  { %v9105_v45 = vmul.f32 1.442695, %v9101_v10  ;;  %v9102_v57 = vsub.f32 0.0, %v9090_v20  ;;  %v9731_v52 = vpop.f32.mrb[44].mxu1 }
 0xfc4   :  { %v9732_v27 = vpop.f32.mrb[45].mxu1 }
 0xfc5   :  { %9986 = vpow2.f32 %v9105_v45  ;;  %v9107_v41 = vmul.f32 1.442695, %v9102_v57  ;;  %v9733_v19 = vadd.f32 %v9732_v27, %v9731_v52  ;;  %v9734_v53 = vpop.f32.mrb[46].mxu1 }
 0xfc6   :  { %v9735_v0 = vpop.f32.mrb[47].mxu1 }
 0xfc7   :  { %9988 = vpow2.f32 %v9107_v41  ;;  %v9095_v36 = vadd.f32 %v9733_v19, %v9423_v6  ;;  %v9736_v51 = vadd.f32 %v9735_v0, %v9734_v53 }
 0xfc9   :  { %v9103_v59 = vsub.f32 0.0, %v9095_v36  ;;  %v9098_v15 = vadd.f32 %v9736_v51, %v9423_v6 }
 0xfcb   :  { %v9109_v16 = vmul.f32 1.442695, %v9103_v59  ;;  %v9104_v8 = vsub.f32 0.0, %v9098_v15 }
 0xfcd   :  { %9990 = vpow2.f32 %v9109_v16  ;;  %v9111_v13 = vmul.f32 1.442695, %v9104_v8 }
 0xfcf   :  { %v9987_v32 = vpop.eup %9986  ;;  %9992 = vpow2.f32 %v9111_v13 }
 0xfd0   :  { %v9113_v46 = vadd.f32 1.0, %v9987_v32 }
 0xfd1   :  { %v9989_v39 = vpop.eup %9988 }
 0xfd2   :  { %9994 = vrcp.f32 %v9113_v46  ;;  %v9114_v55 = vadd.f32 1.0, %v9989_v39 }
 0xfd4   :  { %9996 = vrcp.f32 %v9114_v55 }
 0xfd7   :  { %v9991_v63 = vpop.eup %9990 }
 0xfd8   :  { %v9115_v28 = vadd.f32 1.0, %v9991_v63 }
 0xfd9   :  { %v9993_v22 = vpop.eup %9992 }
 0xfda   :  { %9998 = vrcp.f32 %v9115_v28  ;;  %v9116_v26 = vadd.f32 1.0, %v9993_v22 }
 0xfdc   :  { %v9995_v35 = vpop.eup %9994  ;;  %10000 = vrcp.f32 %v9116_v26 }
 0xfdd   :  { %9125 = vst.msk [vmem:[%s12124_s5] sm:$0xff] %vm152_vm1, %v9995_v35 }
 0xfde   :  { %v9997_v34 = vpop.eup %9996 }
 0xfdf   :  { %9126 = vst.msk [vmem:[%s12124_s5 + $0x8] sm:$0xff] %vm152_vm1, %v9997_v34 }
 0xfe4   :  { %v9999_v18 = vpop.eup %9998 }
 0xfe5   :  { %9127 = vst.msk [vmem:[%s12124_s5 + $0x10] sm:$0xff] %vm152_vm1, %v9999_v18 }
 0xfe6   :  { %v10001_v1 = vpop.eup %10000 }
 0xfe7   :  { %9128 = vst.msk [vmem:[%s12124_s5 + $0x18] sm:$0xff] %vm152_vm1, %v10001_v1 }
 0xfe8   :  { %9133 = vsyncpa [#allocation3], 1 }

</bundles_post_ra>
